<compile_context>
chip_gen: v6e
topology: v6e:2x2x1
jax: 0.10.0
libtpu: 0.0.40
codegen_flags: <defaults>
</compile_context>

<pallas_src>
import functools

import numpy as np
import jax
import jax.numpy as jnp
from jax.experimental import pallas as pl
from jax.experimental.pallas import tpu as pltpu


PARAM_ORDER = ("g1", "be1", "wq", "bq", "wk", "bk", "wv", "bv",
               "wo", "bo", "g2", "be2", "w1", "bf1", "w2", "bf2")


# ----------------------------------------------------------------------------
# Pallas kernel: full encoder stack for one batch element
# ----------------------------------------------------------------------------
def encoder_stack_kernel(src_ref,
                         g1_ref, be1_ref,
                         wq_ref, bq_ref, wk_ref, bk_ref, wv_ref, bv_ref,
                         wo_ref, bo_ref,
                         g2_ref, be2_ref,
                         w1_ref, bf1_ref, w2_ref, bf2_ref,
                         out_ref, attn_ref,
                         *, n_layers, nhead, head_dim):
    x = src_ref[...].astype(jnp.float32)                         # (L, D)
    scale = float(1.0 / np.sqrt(head_dim))
    inv_sqrt2 = float(1.0 / np.sqrt(2.0))

    for layer in range(n_layers):                                # static unroll
        # ---- LayerNorm 1 (f32) ----
        mu = jnp.mean(x, axis=-1, keepdims=True)
        var = jnp.mean((x - mu) ** 2, axis=-1, keepdims=True)
        xn = (x - mu) * jax.lax.rsqrt(var + 1e-5) * g1_ref[layer] + be1_ref[layer]
        xn_b = xn.astype(jnp.bfloat16)

        # ---- Multi-head attention: per-head weights (static leading-dim index),
        #      no lane slicing, no concat (output projection folded per head) ----
        attn_out = None
        for h in range(nhead):                                   # static unroll
            q = (jnp.dot(xn_b, wq_ref[layer, h],
                         preferred_element_type=jnp.float32)
                 + bq_ref[layer, h]) * scale                     # (L, hd) f32
            k = (jnp.dot(xn_b, wk_ref[layer, h],
                         preferred_element_type=jnp.float32)
                 + bk_ref[layer, h])                             # (L, hd)
            v = (jnp.dot(xn_b, wv_ref[layer, h],
                         preferred_element_type=jnp.float32)
                 + bv_ref[layer, h])                             # (L, hd)

            # scores: contract head_dim of q with head_dim of k (no explicit .T)
            s = jax.lax.dot_general(
                q.astype(jnp.bfloat16), k.astype(jnp.bfloat16),
                dimension_numbers=(((1,), (1,)), ((), ())),
                preferred_element_type=jnp.float32)              # (L, L)
            s = s - jnp.max(s, axis=-1, keepdims=True)
            e = jnp.exp(s)
            a = e * pl.reciprocal(jnp.sum(e, axis=-1, keepdims=True), approx=True)
            attn_ref[layer * nhead + h] = a                      # (L, L) f32

            ctx = jnp.dot(a.astype(jnp.bfloat16), v.astype(jnp.bfloat16),
                          preferred_element_type=jnp.float32)    # (L, hd)
            o_h = jnp.dot(ctx.astype(jnp.bfloat16), wo_ref[layer, h],
                          preferred_element_type=jnp.float32)    # (L, D)
            attn_out = o_h if attn_out is None else attn_out + o_h

        x = x + attn_out + bo_ref[layer]                         # residual 1 (dropout = id)

        # ---- LayerNorm 2 + position-wise FFN ----
        mu2 = jnp.mean(x, axis=-1, keepdims=True)
        var2 = jnp.mean((x - mu2) ** 2, axis=-1, keepdims=True)
        xn2 = (x - mu2) * jax.lax.rsqrt(var2 + 1e-5) * g2_ref[layer] + be2_ref[layer]

        h1 = jnp.dot(xn2.astype(jnp.bfloat16), w1_ref[layer],
                     preferred_element_type=jnp.float32) + bf1_ref[layer]  # (L, F)
        # exact (erf-based) GELU, matching torch.nn.functional.gelu default
        # TODO(synk): on v5e a tanh-approx GELU would reduce VALU pressure.
        h1 = 0.5 * h1 * (1.0 + jax.lax.erf(h1 * inv_sqrt2))
        ff = jnp.dot(h1.astype(jnp.bfloat16), w2_ref[layer],
                     preferred_element_type=jnp.float32) + bf2_ref[layer]  # (L, D)
        x = x + ff                                               # residual 2 (dropout = id)

    out_ref[...] = x.astype(out_ref.dtype)


# ----------------------------------------------------------------------------
# VMEM budget helper
# ----------------------------------------------------------------------------
def _round_up(v, m):
    return (v + m - 1) // m * m


def _block_vmem_bytes(shape, dtype):
    itemsize = jnp.dtype(dtype).itemsize
    s = [int(d) for d in shape] or [1]
    s[-1] = _round_up(s[-1], 128)
    if len(s) >= 2:
        s[-2] = _round_up(s[-2], 8 * max(1, 4 // itemsize))
    return int(np.prod(s)) * itemsize


# ----------------------------------------------------------------------------
# Wrapper: one pallas_call for the full stack, grid over batch
# ----------------------------------------------------------------------------
def run_encoder_stack(src, stacked, nhead):
    B, L, D = src.shape
    n_layers = int(stacked["wq"].shape[0])
    head_dim = D // nhead
    ff_dim = int(stacked["w1"].shape[-1])

    args = [src]
    in_specs = [pl.BlockSpec((None, L, D), lambda b: (b, 0, 0))]   # squeezed batch dim
    for name in PARAM_ORDER:
        a = stacked[name]
        nd = a.ndim
        in_specs.append(pl.BlockSpec(a.shape, lambda b, _nd=nd: (0,) * _nd))
        args.append(a)

    out_shape = (jax.ShapeDtypeStruct((B, L, D), src.dtype),
                 jax.ShapeDtypeStruct((B, n_layers * nhead, L, L), jnp.float32))
    out_specs = [pl.BlockSpec((None, L, D), lambda b: (b, 0, 0)),
                 pl.BlockSpec((None, n_layers * nhead, L, L),
                              lambda b: (b, 0, 0, 0))]

    # VMEM budget sized from actual block footprint (+ headroom for FFN intermediates
    # and double buffering), clamped to fit all chips (v7x has 64 MiB per TC).
    footprint = _block_vmem_bytes((L, D), src.dtype) * 2 * 2
    footprint += _block_vmem_bytes((n_layers * nhead, L, L), jnp.float32) * 2
    for name in PARAM_ORDER:
        a = stacked[name]
        footprint += _block_vmem_bytes(a.shape, a.dtype)
    footprint += _block_vmem_bytes((L, ff_dim), jnp.float32) * 4
    vmem_limit = int(min(max(2 * footprint + (8 << 20), 16 << 20), 64 << 20))

    out, attn = pl.pallas_call(
        functools.partial(encoder_stack_kernel, n_layers=n_layers,
                          nhead=nhead, head_dim=head_dim),
        out_shape=out_shape,
        grid_spec=pltpu.PrefetchScalarGridSpec(
            num_scalar_prefetch=0,
            grid=(B,),
            in_specs=in_specs,
            out_specs=out_specs),
        compiler_params=pltpu.CompilerParams(
            dimension_semantics=("parallel",),
            vmem_limit_bytes=vmem_limit),
    )(*args)

    attn = attn.reshape(B, n_layers, nhead, L, L)
    attentions = [attn[:, i] for i in range(n_layers)]
    return out, attentions


# ----------------------------------------------------------------------------
# Host-side parameter prep: stack layers, split heads, cast weights to bf16
# ----------------------------------------------------------------------------
def stack_params(layer_params, nhead):
    d_model = layer_params[0]["wq"].shape[0]
    hd = d_model // nhead

    def per_head_w(w):      # (D, D) in->out  ->  (H, D, hd)
        return jnp.transpose(w.reshape(d_model, nhead, hd), (1, 0, 2))

    def per_head_b(b):      # (1, D) -> (H, 1, hd)
        return b.reshape(nhead, hd)[:, None, :]

    def wo_per_head(w):     # (D, D) in->out  ->  (H, hd, D)
        return w.reshape(nhead, hd, d_model)

    ident = lambda a: a
    plan = {
        "wq": (per_head_w, jnp.bfloat16), "wk": (per_head_w, jnp.bfloat16),
        "wv": (per_head_w, jnp.bfloat16),
        "bq": (per_head_b, jnp.float32), "bk": (per_head_b, jnp.float32),
        "bv": (per_head_b, jnp.float32),
        "wo": (wo_per_head, jnp.bfloat16), "bo": (ident, jnp.float32),
        "g1": (ident, jnp.float32), "be1": (ident, jnp.float32),
        "g2": (ident, jnp.float32), "be2": (ident, jnp.float32),
        "w1": (ident, jnp.bfloat16), "bf1": (ident, jnp.float32),
        "w2": (ident, jnp.bfloat16), "bf2": (ident, jnp.float32),
    }
    stacked = {}
    for name, (fn, dt) in plan.items():
        stacked[name] = jnp.stack([fn(p[name]) for p in layer_params]).astype(dt)
    return stacked


def encoder_forward(src, layer_params, nhead):
    stacked = stack_params(layer_params, nhead)
    return run_encoder_stack(src, stacked, nhead)


# ----------------------------------------------------------------------------
# Deterministic parameter init (mirrors nn.Linear / nn.LayerNorm shapes)
# ----------------------------------------------------------------------------
def init_params(key, n_layers, d_model, ff_dim):
    def linear(k, fan_in, fan_out):
        bound = 1.0 / np.sqrt(fan_in)
        kw, kb = jax.random.split(k)
        w = jax.random.uniform(kw, (fan_in, fan_out), jnp.float32, -bound, bound)
        b = jax.random.uniform(kb, (1, fan_out), jnp.float32, -bound, bound)
        return w, b

    layers = []
    for i in range(n_layers):
        k = jax.random.fold_in(key, i)
        ks = jax.random.split(k, 6)
        wq, bq = linear(ks[0], d_model, d_model)
        wk, bk = linear(ks[1], d_model, d_model)
        wv, bv = linear(ks[2], d_model, d_model)
        wo, bo = linear(ks[3], d_model, d_model)
        w1, bf1 = linear(ks[4], d_model, ff_dim)
        w2, bf2 = linear(ks[5], ff_dim, d_model)
        layers.append(dict(
            g1=jnp.ones((1, d_model), jnp.float32), be1=jnp.zeros((1, d_model), jnp.float32),
            g2=jnp.ones((1, d_model), jnp.float32), be2=jnp.zeros((1, d_model), jnp.float32),
            wq=wq, bq=bq, wk=wk, bk=bk, wv=wv, bv=bv, wo=wo, bo=bo,
            w1=w1, bf1=bf1, w2=w2, bf2=bf2))
    return layers


# ----------------------------------------------------------------------------
# Pure-JAX f32 reference (for correctness check)
# ----------------------------------------------------------------------------
def ref_layer(x, p, nhead):
    B, L, D = x.shape
    hd = D // nhead

    def ln(t, g, b):
        mu = t.mean(-1, keepdims=True)
        var = ((t - mu) ** 2).mean(-1, keepdims=True)
        return (t - mu) / jnp.sqrt(var + 1e-5) * g + b

    xn = ln(x, p["g1"][0], p["be1"][0])
    q = xn @ p["wq"] + p["bq"][0]
    k = xn @ p["wk"] + p["bk"][0]
    v = xn @ p["wv"] + p["bv"][0]

    def split(t):
        return t.reshape(B, L, nhead, hd).transpose(0, 2, 1, 3)

    qh, kh, vh = split(q), split(k), split(v)
    s = qh @ kh.transpose(0, 1, 3, 2) / np.sqrt(hd)
    a = jax.nn.softmax(s, axis=-1)
    c = (a @ vh).transpose(0, 2, 1, 3).reshape(B, L, D)
    o = c @ p["wo"] + p["bo"][0]
    x1 = x + o
    x1n = ln(x1, p["g2"][0], p["be2"][0])
    h = x1n @ p["w1"] + p["bf1"][0]
    h = 0.5 * h * (1.0 + jax.lax.erf(h / np.sqrt(2.0)))
    ff = h @ p["w2"] + p["bf2"][0]
    return x1 + ff, a


def ref_encoder(src, layer_params, nhead):
    attns = []
    for p in layer_params:
        src, a = ref_layer(src, p, nhead)
        attns.append(a)
    return src, attns


# ----------------------------------------------------------------------------
if __name__ == "__main__":
    B, L, D, H, F, N_LAYERS = 2, 8, 32, 4, 64, 2

    key = jax.random.PRNGKey(0)
    k_src, k_par = jax.random.split(key)
    src = jax.random.normal(k_src, (B, L, D), jnp.float32)
    params = init_params(k_par, N_LAYERS, D, F)

    out, attns = encoder_forward(src, params, H)
    out = jax.block_until_ready(out)
    attns = [jax.block_until_ready(a) for a in attns]

    ref_out, ref_attns = ref_encoder(src, params, H)
    # bf16 MXU operands + approx softmax reciprocal -> slightly loosened tolerance vs f32 ref.
    assert np.allclose(np.asarray(out), np.asarray(ref_out), atol=5e-2, rtol=5e-2)
    for a, ra in zip(attns, ref_attns):
        assert np.allclose(np.asarray(a), np.asarray(ra), atol=2e-2, rtol=2e-2)

    print("KERNEL_OK")
</pallas_src>

<mosaic_0001>
module attributes {stable_mosaic.version = 11 : i64} {
  func.func @encoder_stack_kernel(%arg0: i32, %arg1: memref<1x8x32xf32, #tpu.memory_space<vmem>>, %arg2: memref<2x1x32xf32, #tpu.memory_space<vmem>>, %arg3: memref<2x1x32xf32, #tpu.memory_space<vmem>>, %arg4: memref<2x4x32x8xbf16, #tpu.memory_space<vmem>>, %arg5: memref<2x4x1x8xf32, #tpu.memory_space<vmem>>, %arg6: memref<2x4x32x8xbf16, #tpu.memory_space<vmem>>, %arg7: memref<2x4x1x8xf32, #tpu.memory_space<vmem>>, %arg8: memref<2x4x32x8xbf16, #tpu.memory_space<vmem>>, %arg9: memref<2x4x1x8xf32, #tpu.memory_space<vmem>>, %arg10: memref<2x4x8x32xbf16, #tpu.memory_space<vmem>>, %arg11: memref<2x1x32xf32, #tpu.memory_space<vmem>>, %arg12: memref<2x1x32xf32, #tpu.memory_space<vmem>>, %arg13: memref<2x1x32xf32, #tpu.memory_space<vmem>>, %arg14: memref<2x32x64xbf16, #tpu.memory_space<vmem>>, %arg15: memref<2x1x64xf32, #tpu.memory_space<vmem>>, %arg16: memref<2x64x32xbf16, #tpu.memory_space<vmem>>, %arg17: memref<2x1x32xf32, #tpu.memory_space<vmem>>, %arg18: memref<1x8x32xf32, #tpu.memory_space<vmem>>, %arg19: memref<1x8x8x8xf32, #tpu.memory_space<vmem>>) attributes {dimension_semantics = [#tpu.dimension_semantics<parallel>], iteration_bounds = array<i64: 2>, scalar_prefetch = 0 : i64, scratch_operands = 0 : i64, tpu.core_type = #tpu.core_type<tc>, window_params = [{transform_indices = @transform_0, window_bounds = array<i64: 1, 8, 32>}, {pipeline_mode = #tpu.pipeline_mode<synchronous>, transform_indices = @transform_1, window_bounds = array<i64: 2, 1, 32>}, {pipeline_mode = #tpu.pipeline_mode<synchronous>, transform_indices = @transform_2, window_bounds = array<i64: 2, 1, 32>}, {pipeline_mode = #tpu.pipeline_mode<synchronous>, transform_indices = @transform_3, window_bounds = array<i64: 2, 4, 32, 8>}, {pipeline_mode = #tpu.pipeline_mode<synchronous>, transform_indices = @transform_4, window_bounds = array<i64: 2, 4, 1, 8>}, {pipeline_mode = #tpu.pipeline_mode<synchronous>, transform_indices = @transform_5, window_bounds = array<i64: 2, 4, 32, 8>}, {pipeline_mode = #tpu.pipeline_mode<synchronous>, transform_indices = @transform_6, window_bounds = array<i64: 2, 4, 1, 8>}, {pipeline_mode = #tpu.pipeline_mode<synchronous>, transform_indices = @transform_7, window_bounds = array<i64: 2, 4, 32, 8>}, {pipeline_mode = #tpu.pipeline_mode<synchronous>, transform_indices = @transform_8, window_bounds = array<i64: 2, 4, 1, 8>}, {pipeline_mode = #tpu.pipeline_mode<synchronous>, transform_indices = @transform_9, window_bounds = array<i64: 2, 4, 8, 32>}, {pipeline_mode = #tpu.pipeline_mode<synchronous>, transform_indices = @transform_10, window_bounds = array<i64: 2, 1, 32>}, {pipeline_mode = #tpu.pipeline_mode<synchronous>, transform_indices = @transform_11, window_bounds = array<i64: 2, 1, 32>}, {pipeline_mode = #tpu.pipeline_mode<synchronous>, transform_indices = @transform_12, window_bounds = array<i64: 2, 1, 32>}, {pipeline_mode = #tpu.pipeline_mode<synchronous>, transform_indices = @transform_13, window_bounds = array<i64: 2, 32, 64>}, {pipeline_mode = #tpu.pipeline_mode<synchronous>, transform_indices = @transform_14, window_bounds = array<i64: 2, 1, 64>}, {pipeline_mode = #tpu.pipeline_mode<synchronous>, transform_indices = @transform_15, window_bounds = array<i64: 2, 64, 32>}, {pipeline_mode = #tpu.pipeline_mode<synchronous>, transform_indices = @transform_16, window_bounds = array<i64: 2, 1, 32>}, {transform_indices = @transform_17, window_bounds = array<i64: 1, 8, 32>}, {transform_indices = @transform_18, window_bounds = array<i64: 1, 8, 8, 8>}]} {
    %c0 = arith.constant 0 : index
    %c0_0 = arith.constant 0 : index
    %c0_1 = arith.constant 0 : index
    %0 = vector.load %arg1[%c0, %c0_0, %c0_1] : memref<1x8x32xf32, #tpu.memory_space<vmem>>, vector<1x8x32xf32>
    %1 = vector.shape_cast %0 : vector<1x8x32xf32> to vector<8x32xf32>
    %cst = arith.constant dense<0.000000e+00> : vector<8xf32>
    %2 = vector.multi_reduction <add>, %1, %cst [1] : vector<8x32xf32> to vector<8xf32>
    %3 = vector.shape_cast %2 : vector<8xf32> to vector<8x1xf32>
    %cst_2 = arith.constant 3.200000e+01 : f32
    %4 = vector.broadcast %cst_2 : f32 to vector<8x1xf32>
    %5 = arith.divf %3, %4 : vector<8x1xf32>
    %6 = vector.broadcast %5 : vector<8x1xf32> to vector<8x32xf32>
    %7 = arith.subf %1, %6 : vector<8x32xf32>
    %8 = arith.mulf %7, %7 : vector<8x32xf32>
    %cst_3 = arith.constant dense<0.000000e+00> : vector<8xf32>
    %9 = vector.multi_reduction <add>, %8, %cst_3 [1] : vector<8x32xf32> to vector<8xf32>
    %10 = vector.shape_cast %9 : vector<8xf32> to vector<8x1xf32>
    %cst_4 = arith.constant 3.200000e+01 : f32
    %11 = vector.broadcast %cst_4 : f32 to vector<8x1xf32>
    %12 = arith.divf %10, %11 : vector<8x1xf32>
    %13 = vector.broadcast %5 : vector<8x1xf32> to vector<8x32xf32>
    %14 = arith.subf %1, %13 : vector<8x32xf32>
    %cst_5 = arith.constant 9.99999974E-6 : f32
    %15 = vector.broadcast %cst_5 : f32 to vector<8x1xf32>
    %16 = arith.addf %12, %15 : vector<8x1xf32>
    %17 = math.rsqrt %16 : vector<8x1xf32>
    %18 = vector.broadcast %17 : vector<8x1xf32> to vector<8x32xf32>
    %19 = arith.mulf %14, %18 : vector<8x32xf32>
    %c0_6 = arith.constant 0 : index
    %c0_7 = arith.constant 0 : index
    %c0_8 = arith.constant 0 : index
    %20 = vector.load %arg2[%c0_6, %c0_7, %c0_8] : memref<2x1x32xf32, #tpu.memory_space<vmem>>, vector<1x1x32xf32>
    %21 = vector.shape_cast %20 : vector<1x1x32xf32> to vector<1x32xf32>
    %22 = vector.broadcast %21 : vector<1x32xf32> to vector<8x32xf32>
    %23 = arith.mulf %19, %22 : vector<8x32xf32>
    %c0_9 = arith.constant 0 : index
    %c0_10 = arith.constant 0 : index
    %c0_11 = arith.constant 0 : index
    %24 = vector.load %arg3[%c0_9, %c0_10, %c0_11] : memref<2x1x32xf32, #tpu.memory_space<vmem>>, vector<1x1x32xf32>
    %25 = vector.shape_cast %24 : vector<1x1x32xf32> to vector<1x32xf32>
    %26 = vector.broadcast %25 : vector<1x32xf32> to vector<8x32xf32>
    %27 = arith.addf %23, %26 : vector<8x32xf32>
    %28 = arith.truncf %27 : vector<8x32xf32> to vector<8x32xbf16>
    %c0_12 = arith.constant 0 : index
    %c0_13 = arith.constant 0 : index
    %c0_14 = arith.constant 0 : index
    %c0_15 = arith.constant 0 : index
    %29 = vector.load %arg4[%c0_12, %c0_13, %c0_14, %c0_15] : memref<2x4x32x8xbf16, #tpu.memory_space<vmem>>, vector<1x1x32x8xbf16>
    %30 = vector.shape_cast %29 : vector<1x1x32x8xbf16> to vector<32x8xbf16>
    %cst_16 = arith.constant dense<0.000000e+00> : vector<8x8xf32>
    %31 = tpu.matmul %28, %30, %cst_16 {dimension_numbers = #tpu.dot_dimension_numbers<[1], [0], [0], [1], [0, 0, 1, 1], [], []>} : vector<8x32xbf16>, vector<32x8xbf16>, vector<8x8xf32> -> vector<8x8xf32>
    %c0_17 = arith.constant 0 : index
    %c0_18 = arith.constant 0 : index
    %c0_19 = arith.constant 0 : index
    %c0_20 = arith.constant 0 : index
    %32 = vector.load %arg5[%c0_17, %c0_18, %c0_19, %c0_20] : memref<2x4x1x8xf32, #tpu.memory_space<vmem>>, vector<1x1x1x8xf32>
    %33 = vector.shape_cast %32 : vector<1x1x1x8xf32> to vector<1x8xf32>
    %34 = vector.broadcast %33 : vector<1x8xf32> to vector<8x8xf32>
    %35 = arith.addf %31, %34 : vector<8x8xf32>
    %cst_21 = arith.constant 0.353553385 : f32
    %36 = vector.broadcast %cst_21 : f32 to vector<8x8xf32>
    %37 = arith.mulf %35, %36 : vector<8x8xf32>
    %c0_22 = arith.constant 0 : index
    %c0_23 = arith.constant 0 : index
    %c0_24 = arith.constant 0 : index
    %c0_25 = arith.constant 0 : index
    %38 = vector.load %arg6[%c0_22, %c0_23, %c0_24, %c0_25] : memref<2x4x32x8xbf16, #tpu.memory_space<vmem>>, vector<1x1x32x8xbf16>
    %39 = vector.shape_cast %38 : vector<1x1x32x8xbf16> to vector<32x8xbf16>
    %cst_26 = arith.constant dense<0.000000e+00> : vector<8x8xf32>
    %40 = tpu.matmul %28, %39, %cst_26 {dimension_numbers = #tpu.dot_dimension_numbers<[1], [0], [0], [1], [0, 0, 1, 1], [], []>} : vector<8x32xbf16>, vector<32x8xbf16>, vector<8x8xf32> -> vector<8x8xf32>
    %c0_27 = arith.constant 0 : index
    %c0_28 = arith.constant 0 : index
    %c0_29 = arith.constant 0 : index
    %c0_30 = arith.constant 0 : index
    %41 = vector.load %arg7[%c0_27, %c0_28, %c0_29, %c0_30] : memref<2x4x1x8xf32, #tpu.memory_space<vmem>>, vector<1x1x1x8xf32>
    %42 = vector.shape_cast %41 : vector<1x1x1x8xf32> to vector<1x8xf32>
    %43 = vector.broadcast %42 : vector<1x8xf32> to vector<8x8xf32>
    %44 = arith.addf %40, %43 : vector<8x8xf32>
    %c0_31 = arith.constant 0 : index
    %c0_32 = arith.constant 0 : index
    %c0_33 = arith.constant 0 : index
    %c0_34 = arith.constant 0 : index
    %45 = vector.load %arg8[%c0_31, %c0_32, %c0_33, %c0_34] : memref<2x4x32x8xbf16, #tpu.memory_space<vmem>>, vector<1x1x32x8xbf16>
    %46 = vector.shape_cast %45 : vector<1x1x32x8xbf16> to vector<32x8xbf16>
    %cst_35 = arith.constant dense<0.000000e+00> : vector<8x8xf32>
    %47 = tpu.matmul %28, %46, %cst_35 {dimension_numbers = #tpu.dot_dimension_numbers<[1], [0], [0], [1], [0, 0, 1, 1], [], []>} : vector<8x32xbf16>, vector<32x8xbf16>, vector<8x8xf32> -> vector<8x8xf32>
    %c0_36 = arith.constant 0 : index
    %c0_37 = arith.constant 0 : index
    %c0_38 = arith.constant 0 : index
    %c0_39 = arith.constant 0 : index
    %48 = vector.load %arg9[%c0_36, %c0_37, %c0_38, %c0_39] : memref<2x4x1x8xf32, #tpu.memory_space<vmem>>, vector<1x1x1x8xf32>
    %49 = vector.shape_cast %48 : vector<1x1x1x8xf32> to vector<1x8xf32>
    %50 = vector.broadcast %49 : vector<1x8xf32> to vector<8x8xf32>
    %51 = arith.addf %47, %50 : vector<8x8xf32>
    %52 = arith.truncf %37 : vector<8x8xf32> to vector<8x8xbf16>
    %53 = arith.truncf %44 : vector<8x8xf32> to vector<8x8xbf16>
    %cst_40 = arith.constant dense<0.000000e+00> : vector<8x8xf32>
    %54 = tpu.matmul %52, %53, %cst_40 {dimension_numbers = #tpu.dot_dimension_numbers<[1], [1], [0], [0], [0, 0, 1, 0], [], []>} : vector<8x8xbf16>, vector<8x8xbf16>, vector<8x8xf32> -> vector<8x8xf32>
    %cst_41 = arith.constant dense<0xFF800000> : vector<8xf32>
    %55 = vector.multi_reduction <maximumf>, %54, %cst_41 [1] : vector<8x8xf32> to vector<8xf32>
    %56 = vector.shape_cast %55 : vector<8xf32> to vector<8x1xf32>
    %57 = vector.broadcast %56 : vector<8x1xf32> to vector<8x8xf32>
    %58 = arith.subf %54, %57 : vector<8x8xf32>
    %59 = math.exp %58 : vector<8x8xf32>
    %cst_42 = arith.constant dense<0.000000e+00> : vector<8xf32>
    %60 = vector.multi_reduction <add>, %59, %cst_42 [1] : vector<8x8xf32> to vector<8xf32>
    %61 = vector.shape_cast %60 : vector<8xf32> to vector<8x1xf32>
    %62 = tpu.reciprocal %61 {approx = true} : vector<8x1xf32> -> vector<8x1xf32>
    %63 = vector.broadcast %62 : vector<8x1xf32> to vector<8x8xf32>
    %64 = arith.mulf %59, %63 : vector<8x8xf32>
    %c0_43 = arith.constant 0 : index
    %c0_44 = arith.constant 0 : index
    %c0_45 = arith.constant 0 : index
    %c0_46 = arith.constant 0 : index
    %65 = vector.load %arg19[%c0_43, %c0_44, %c0_45, %c0_46] : memref<1x8x8x8xf32, #tpu.memory_space<vmem>>, vector<1x1x8x8xf32>
    %66 = vector.shape_cast %65 : vector<1x1x8x8xf32> to vector<8x8xf32>
    %67 = vector.shape_cast %64 : vector<8x8xf32> to vector<1x1x8x8xf32>
    tpu.vector_store %arg19[%c0_43, %c0_44, %c0_45, %c0_46], %67 {strides = array<i32>} : memref<1x8x8x8xf32, #tpu.memory_space<vmem>>, vector<1x1x8x8xf32>,
    %68 = arith.truncf %64 : vector<8x8xf32> to vector<8x8xbf16>
    %69 = arith.truncf %51 : vector<8x8xf32> to vector<8x8xbf16>
    %cst_47 = arith.constant dense<0.000000e+00> : vector<8x8xf32>
    %70 = tpu.matmul %68, %69, %cst_47 {dimension_numbers = #tpu.dot_dimension_numbers<[1], [0], [0], [1], [0, 0, 1, 1], [], []>} : vector<8x8xbf16>, vector<8x8xbf16>, vector<8x8xf32> -> vector<8x8xf32>
    %71 = arith.truncf %70 : vector<8x8xf32> to vector<8x8xbf16>
    %c0_48 = arith.constant 0 : index
    %c0_49 = arith.constant 0 : index
    %c0_50 = arith.constant 0 : index
    %c0_51 = arith.constant 0 : index
    %72 = vector.load %arg10[%c0_48, %c0_49, %c0_50, %c0_51] : memref<2x4x8x32xbf16, #tpu.memory_space<vmem>>, vector<1x1x8x32xbf16>
    %73 = vector.shape_cast %72 : vector<1x1x8x32xbf16> to vector<8x32xbf16>
    %cst_52 = arith.constant dense<0.000000e+00> : vector<8x32xf32>
    %74 = tpu.matmul %71, %73, %cst_52 {dimension_numbers = #tpu.dot_dimension_numbers<[1], [0], [0], [1], [0, 0, 1, 1], [], []>} : vector<8x8xbf16>, vector<8x32xbf16>, vector<8x32xf32> -> vector<8x32xf32>
    %c0_53 = arith.constant 0 : index
    %c1 = arith.constant 1 : index
    %c0_54 = arith.constant 0 : index
    %c0_55 = arith.constant 0 : index
    %75 = vector.load %arg4[%c0_53, %c1, %c0_54, %c0_55] : memref<2x4x32x8xbf16, #tpu.memory_space<vmem>>, vector<1x1x32x8xbf16>
    %76 = vector.shape_cast %75 : vector<1x1x32x8xbf16> to vector<32x8xbf16>
    %cst_56 = arith.constant dense<0.000000e+00> : vector<8x8xf32>
    %77 = tpu.matmul %28, %76, %cst_56 {dimension_numbers = #tpu.dot_dimension_numbers<[1], [0], [0], [1], [0, 0, 1, 1], [], []>} : vector<8x32xbf16>, vector<32x8xbf16>, vector<8x8xf32> -> vector<8x8xf32>
    %c0_57 = arith.constant 0 : index
    %c1_58 = arith.constant 1 : index
    %c0_59 = arith.constant 0 : index
    %c0_60 = arith.constant 0 : index
    %78 = vector.load %arg5[%c0_57, %c1_58, %c0_59, %c0_60] : memref<2x4x1x8xf32, #tpu.memory_space<vmem>>, vector<1x1x1x8xf32>
    %79 = vector.shape_cast %78 : vector<1x1x1x8xf32> to vector<1x8xf32>
    %80 = vector.broadcast %79 : vector<1x8xf32> to vector<8x8xf32>
    %81 = arith.addf %77, %80 : vector<8x8xf32>
    %cst_61 = arith.constant 0.353553385 : f32
    %82 = vector.broadcast %cst_61 : f32 to vector<8x8xf32>
    %83 = arith.mulf %81, %82 : vector<8x8xf32>
    %c0_62 = arith.constant 0 : index
    %c1_63 = arith.constant 1 : index
    %c0_64 = arith.constant 0 : index
    %c0_65 = arith.constant 0 : index
    %84 = vector.load %arg6[%c0_62, %c1_63, %c0_64, %c0_65] : memref<2x4x32x8xbf16, #tpu.memory_space<vmem>>, vector<1x1x32x8xbf16>
    %85 = vector.shape_cast %84 : vector<1x1x32x8xbf16> to vector<32x8xbf16>
    %cst_66 = arith.constant dense<0.000000e+00> : vector<8x8xf32>
    %86 = tpu.matmul %28, %85, %cst_66 {dimension_numbers = #tpu.dot_dimension_numbers<[1], [0], [0], [1], [0, 0, 1, 1], [], []>} : vector<8x32xbf16>, vector<32x8xbf16>, vector<8x8xf32> -> vector<8x8xf32>
    %c0_67 = arith.constant 0 : index
    %c1_68 = arith.constant 1 : index
    %c0_69 = arith.constant 0 : index
    %c0_70 = arith.constant 0 : index
    %87 = vector.load %arg7[%c0_67, %c1_68, %c0_69, %c0_70] : memref<2x4x1x8xf32, #tpu.memory_space<vmem>>, vector<1x1x1x8xf32>
    %88 = vector.shape_cast %87 : vector<1x1x1x8xf32> to vector<1x8xf32>
    %89 = vector.broadcast %88 : vector<1x8xf32> to vector<8x8xf32>
    %90 = arith.addf %86, %89 : vector<8x8xf32>
    %c0_71 = arith.constant 0 : index
    %c1_72 = arith.constant 1 : index
    %c0_73 = arith.constant 0 : index
    %c0_74 = arith.constant 0 : index
    %91 = vector.load %arg8[%c0_71, %c1_72, %c0_73, %c0_74] : memref<2x4x32x8xbf16, #tpu.memory_space<vmem>>, vector<1x1x32x8xbf16>
    %92 = vector.shape_cast %91 : vector<1x1x32x8xbf16> to vector<32x8xbf16>
    %cst_75 = arith.constant dense<0.000000e+00> : vector<8x8xf32>
    %93 = tpu.matmul %28, %92, %cst_75 {dimension_numbers = #tpu.dot_dimension_numbers<[1], [0], [0], [1], [0, 0, 1, 1], [], []>} : vector<8x32xbf16>, vector<32x8xbf16>, vector<8x8xf32> -> vector<8x8xf32>
    %c0_76 = arith.constant 0 : index
    %c1_77 = arith.constant 1 : index
    %c0_78 = arith.constant 0 : index
    %c0_79 = arith.constant 0 : index
    %94 = vector.load %arg9[%c0_76, %c1_77, %c0_78, %c0_79] : memref<2x4x1x8xf32, #tpu.memory_space<vmem>>, vector<1x1x1x8xf32>
    %95 = vector.shape_cast %94 : vector<1x1x1x8xf32> to vector<1x8xf32>
    %96 = vector.broadcast %95 : vector<1x8xf32> to vector<8x8xf32>
    %97 = arith.addf %93, %96 : vector<8x8xf32>
    %98 = arith.truncf %83 : vector<8x8xf32> to vector<8x8xbf16>
    %99 = arith.truncf %90 : vector<8x8xf32> to vector<8x8xbf16>
    %cst_80 = arith.constant dense<0.000000e+00> : vector<8x8xf32>
    %100 = tpu.matmul %98, %99, %cst_80 {dimension_numbers = #tpu.dot_dimension_numbers<[1], [1], [0], [0], [0, 0, 1, 0], [], []>} : vector<8x8xbf16>, vector<8x8xbf16>, vector<8x8xf32> -> vector<8x8xf32>
    %cst_81 = arith.constant dense<0xFF800000> : vector<8xf32>
    %101 = vector.multi_reduction <maximumf>, %100, %cst_81 [1] : vector<8x8xf32> to vector<8xf32>
    %102 = vector.shape_cast %101 : vector<8xf32> to vector<8x1xf32>
    %103 = vector.broadcast %102 : vector<8x1xf32> to vector<8x8xf32>
    %104 = arith.subf %100, %103 : vector<8x8xf32>
    %105 = math.exp %104 : vector<8x8xf32>
    %cst_82 = arith.constant dense<0.000000e+00> : vector<8xf32>
    %106 = vector.multi_reduction <add>, %105, %cst_82 [1] : vector<8x8xf32> to vector<8xf32>
    %107 = vector.shape_cast %106 : vector<8xf32> to vector<8x1xf32>
    %108 = tpu.reciprocal %107 {approx = true} : vector<8x1xf32> -> vector<8x1xf32>
    %109 = vector.broadcast %108 : vector<8x1xf32> to vector<8x8xf32>
    %110 = arith.mulf %105, %109 : vector<8x8xf32>
    %c0_83 = arith.constant 0 : index
    %c1_84 = arith.constant 1 : index
    %c0_85 = arith.constant 0 : index
    %c0_86 = arith.constant 0 : index
    %111 = vector.load %arg19[%c0_83, %c1_84, %c0_85, %c0_86] : memref<1x8x8x8xf32, #tpu.memory_space<vmem>>, vector<1x1x8x8xf32>
    %112 = vector.shape_cast %111 : vector<1x1x8x8xf32> to vector<8x8xf32>
    %113 = vector.shape_cast %110 : vector<8x8xf32> to vector<1x1x8x8xf32>
    tpu.vector_store %arg19[%c0_83, %c1_84, %c0_85, %c0_86], %113 {strides = array<i32>} : memref<1x8x8x8xf32, #tpu.memory_space<vmem>>, vector<1x1x8x8xf32>,
    %114 = arith.truncf %110 : vector<8x8xf32> to vector<8x8xbf16>
    %115 = arith.truncf %97 : vector<8x8xf32> to vector<8x8xbf16>
    %cst_87 = arith.constant dense<0.000000e+00> : vector<8x8xf32>
    %116 = tpu.matmul %114, %115, %cst_87 {dimension_numbers = #tpu.dot_dimension_numbers<[1], [0], [0], [1], [0, 0, 1, 1], [], []>} : vector<8x8xbf16>, vector<8x8xbf16>, vector<8x8xf32> -> vector<8x8xf32>
    %117 = arith.truncf %116 : vector<8x8xf32> to vector<8x8xbf16>
    %c0_88 = arith.constant 0 : index
    %c1_89 = arith.constant 1 : index
    %c0_90 = arith.constant 0 : index
    %c0_91 = arith.constant 0 : index
    %118 = vector.load %arg10[%c0_88, %c1_89, %c0_90, %c0_91] : memref<2x4x8x32xbf16, #tpu.memory_space<vmem>>, vector<1x1x8x32xbf16>
    %119 = vector.shape_cast %118 : vector<1x1x8x32xbf16> to vector<8x32xbf16>
    %cst_92 = arith.constant dense<0.000000e+00> : vector<8x32xf32>
    %120 = tpu.matmul %117, %119, %cst_92 {dimension_numbers = #tpu.dot_dimension_numbers<[1], [0], [0], [1], [0, 0, 1, 1], [], []>} : vector<8x8xbf16>, vector<8x32xbf16>, vector<8x32xf32> -> vector<8x32xf32>
    %121 = arith.addf %74, %120 : vector<8x32xf32>
    %c0_93 = arith.constant 0 : index
    %c2 = arith.constant 2 : index
    %c0_94 = arith.constant 0 : index
    %c0_95 = arith.constant 0 : index
    %122 = vector.load %arg4[%c0_93, %c2, %c0_94, %c0_95] : memref<2x4x32x8xbf16, #tpu.memory_space<vmem>>, vector<1x1x32x8xbf16>
    %123 = vector.shape_cast %122 : vector<1x1x32x8xbf16> to vector<32x8xbf16>
    %cst_96 = arith.constant dense<0.000000e+00> : vector<8x8xf32>
    %124 = tpu.matmul %28, %123, %cst_96 {dimension_numbers = #tpu.dot_dimension_numbers<[1], [0], [0], [1], [0, 0, 1, 1], [], []>} : vector<8x32xbf16>, vector<32x8xbf16>, vector<8x8xf32> -> vector<8x8xf32>
    %c0_97 = arith.constant 0 : index
    %c2_98 = arith.constant 2 : index
    %c0_99 = arith.constant 0 : index
    %c0_100 = arith.constant 0 : index
    %125 = vector.load %arg5[%c0_97, %c2_98, %c0_99, %c0_100] : memref<2x4x1x8xf32, #tpu.memory_space<vmem>>, vector<1x1x1x8xf32>
    %126 = vector.shape_cast %125 : vector<1x1x1x8xf32> to vector<1x8xf32>
    %127 = vector.broadcast %126 : vector<1x8xf32> to vector<8x8xf32>
    %128 = arith.addf %124, %127 : vector<8x8xf32>
    %cst_101 = arith.constant 0.353553385 : f32
    %129 = vector.broadcast %cst_101 : f32 to vector<8x8xf32>
    %130 = arith.mulf %128, %129 : vector<8x8xf32>
    %c0_102 = arith.constant 0 : index
    %c2_103 = arith.constant 2 : index
    %c0_104 = arith.constant 0 : index
    %c0_105 = arith.constant 0 : index
    %131 = vector.load %arg6[%c0_102, %c2_103, %c0_104, %c0_105] : memref<2x4x32x8xbf16, #tpu.memory_space<vmem>>, vector<1x1x32x8xbf16>
    %132 = vector.shape_cast %131 : vector<1x1x32x8xbf16> to vector<32x8xbf16>
    %cst_106 = arith.constant dense<0.000000e+00> : vector<8x8xf32>
    %133 = tpu.matmul %28, %132, %cst_106 {dimension_numbers = #tpu.dot_dimension_numbers<[1], [0], [0], [1], [0, 0, 1, 1], [], []>} : vector<8x32xbf16>, vector<32x8xbf16>, vector<8x8xf32> -> vector<8x8xf32>
    %c0_107 = arith.constant 0 : index
    %c2_108 = arith.constant 2 : index
    %c0_109 = arith.constant 0 : index
    %c0_110 = arith.constant 0 : index
    %134 = vector.load %arg7[%c0_107, %c2_108, %c0_109, %c0_110] : memref<2x4x1x8xf32, #tpu.memory_space<vmem>>, vector<1x1x1x8xf32>
    %135 = vector.shape_cast %134 : vector<1x1x1x8xf32> to vector<1x8xf32>
    %136 = vector.broadcast %135 : vector<1x8xf32> to vector<8x8xf32>
    %137 = arith.addf %133, %136 : vector<8x8xf32>
    %c0_111 = arith.constant 0 : index
    %c2_112 = arith.constant 2 : index
    %c0_113 = arith.constant 0 : index
    %c0_114 = arith.constant 0 : index
    %138 = vector.load %arg8[%c0_111, %c2_112, %c0_113, %c0_114] : memref<2x4x32x8xbf16, #tpu.memory_space<vmem>>, vector<1x1x32x8xbf16>
    %139 = vector.shape_cast %138 : vector<1x1x32x8xbf16> to vector<32x8xbf16>
    %cst_115 = arith.constant dense<0.000000e+00> : vector<8x8xf32>
    %140 = tpu.matmul %28, %139, %cst_115 {dimension_numbers = #tpu.dot_dimension_numbers<[1], [0], [0], [1], [0, 0, 1, 1], [], []>} : vector<8x32xbf16>, vector<32x8xbf16>, vector<8x8xf32> -> vector<8x8xf32>
    %c0_116 = arith.constant 0 : index
    %c2_117 = arith.constant 2 : index
    %c0_118 = arith.constant 0 : index
    %c0_119 = arith.constant 0 : index
    %141 = vector.load %arg9[%c0_116, %c2_117, %c0_118, %c0_119] : memref<2x4x1x8xf32, #tpu.memory_space<vmem>>, vector<1x1x1x8xf32>
    %142 = vector.shape_cast %141 : vector<1x1x1x8xf32> to vector<1x8xf32>
    %143 = vector.broadcast %142 : vector<1x8xf32> to vector<8x8xf32>
    %144 = arith.addf %140, %143 : vector<8x8xf32>
    %145 = arith.truncf %130 : vector<8x8xf32> to vector<8x8xbf16>
    %146 = arith.truncf %137 : vector<8x8xf32> to vector<8x8xbf16>
    %cst_120 = arith.constant dense<0.000000e+00> : vector<8x8xf32>
    %147 = tpu.matmul %145, %146, %cst_120 {dimension_numbers = #tpu.dot_dimension_numbers<[1], [1], [0], [0], [0, 0, 1, 0], [], []>} : vector<8x8xbf16>, vector<8x8xbf16>, vector<8x8xf32> -> vector<8x8xf32>
    %cst_121 = arith.constant dense<0xFF800000> : vector<8xf32>
    %148 = vector.multi_reduction <maximumf>, %147, %cst_121 [1] : vector<8x8xf32> to vector<8xf32>
    %149 = vector.shape_cast %148 : vector<8xf32> to vector<8x1xf32>
    %150 = vector.broadcast %149 : vector<8x1xf32> to vector<8x8xf32>
    %151 = arith.subf %147, %150 : vector<8x8xf32>
    %152 = math.exp %151 : vector<8x8xf32>
    %cst_122 = arith.constant dense<0.000000e+00> : vector<8xf32>
    %153 = vector.multi_reduction <add>, %152, %cst_122 [1] : vector<8x8xf32> to vector<8xf32>
    %154 = vector.shape_cast %153 : vector<8xf32> to vector<8x1xf32>
    %155 = tpu.reciprocal %154 {approx = true} : vector<8x1xf32> -> vector<8x1xf32>
    %156 = vector.broadcast %155 : vector<8x1xf32> to vector<8x8xf32>
    %157 = arith.mulf %152, %156 : vector<8x8xf32>
    %c0_123 = arith.constant 0 : index
    %c2_124 = arith.constant 2 : index
    %c0_125 = arith.constant 0 : index
    %c0_126 = arith.constant 0 : index
    %158 = vector.load %arg19[%c0_123, %c2_124, %c0_125, %c0_126] : memref<1x8x8x8xf32, #tpu.memory_space<vmem>>, vector<1x1x8x8xf32>
    %159 = vector.shape_cast %158 : vector<1x1x8x8xf32> to vector<8x8xf32>
    %160 = vector.shape_cast %157 : vector<8x8xf32> to vector<1x1x8x8xf32>
    tpu.vector_store %arg19[%c0_123, %c2_124, %c0_125, %c0_126], %160 {strides = array<i32>} : memref<1x8x8x8xf32, #tpu.memory_space<vmem>>, vector<1x1x8x8xf32>,
    %161 = arith.truncf %157 : vector<8x8xf32> to vector<8x8xbf16>
    %162 = arith.truncf %144 : vector<8x8xf32> to vector<8x8xbf16>
    %cst_127 = arith.constant dense<0.000000e+00> : vector<8x8xf32>
    %163 = tpu.matmul %161, %162, %cst_127 {dimension_numbers = #tpu.dot_dimension_numbers<[1], [0], [0], [1], [0, 0, 1, 1], [], []>} : vector<8x8xbf16>, vector<8x8xbf16>, vector<8x8xf32> -> vector<8x8xf32>
    %164 = arith.truncf %163 : vector<8x8xf32> to vector<8x8xbf16>
    %c0_128 = arith.constant 0 : index
    %c2_129 = arith.constant 2 : index
    %c0_130 = arith.constant 0 : index
    %c0_131 = arith.constant 0 : index
    %165 = vector.load %arg10[%c0_128, %c2_129, %c0_130, %c0_131] : memref<2x4x8x32xbf16, #tpu.memory_space<vmem>>, vector<1x1x8x32xbf16>
    %166 = vector.shape_cast %165 : vector<1x1x8x32xbf16> to vector<8x32xbf16>
    %cst_132 = arith.constant dense<0.000000e+00> : vector<8x32xf32>
    %167 = tpu.matmul %164, %166, %cst_132 {dimension_numbers = #tpu.dot_dimension_numbers<[1], [0], [0], [1], [0, 0, 1, 1], [], []>} : vector<8x8xbf16>, vector<8x32xbf16>, vector<8x32xf32> -> vector<8x32xf32>
    %168 = arith.addf %121, %167 : vector<8x32xf32>
    %c0_133 = arith.constant 0 : index
    %c3 = arith.constant 3 : index
    %c0_134 = arith.constant 0 : index
    %c0_135 = arith.constant 0 : index
    %169 = vector.load %arg4[%c0_133, %c3, %c0_134, %c0_135] : memref<2x4x32x8xbf16, #tpu.memory_space<vmem>>, vector<1x1x32x8xbf16>
    %170 = vector.shape_cast %169 : vector<1x1x32x8xbf16> to vector<32x8xbf16>
    %cst_136 = arith.constant dense<0.000000e+00> : vector<8x8xf32>
    %171 = tpu.matmul %28, %170, %cst_136 {dimension_numbers = #tpu.dot_dimension_numbers<[1], [0], [0], [1], [0, 0, 1, 1], [], []>} : vector<8x32xbf16>, vector<32x8xbf16>, vector<8x8xf32> -> vector<8x8xf32>
    %c0_137 = arith.constant 0 : index
    %c3_138 = arith.constant 3 : index
    %c0_139 = arith.constant 0 : index
    %c0_140 = arith.constant 0 : index
    %172 = vector.load %arg5[%c0_137, %c3_138, %c0_139, %c0_140] : memref<2x4x1x8xf32, #tpu.memory_space<vmem>>, vector<1x1x1x8xf32>
    %173 = vector.shape_cast %172 : vector<1x1x1x8xf32> to vector<1x8xf32>
    %174 = vector.broadcast %173 : vector<1x8xf32> to vector<8x8xf32>
    %175 = arith.addf %171, %174 : vector<8x8xf32>
    %cst_141 = arith.constant 0.353553385 : f32
    %176 = vector.broadcast %cst_141 : f32 to vector<8x8xf32>
    %177 = arith.mulf %175, %176 : vector<8x8xf32>
    %c0_142 = arith.constant 0 : index
    %c3_143 = arith.constant 3 : index
    %c0_144 = arith.constant 0 : index
    %c0_145 = arith.constant 0 : index
    %178 = vector.load %arg6[%c0_142, %c3_143, %c0_144, %c0_145] : memref<2x4x32x8xbf16, #tpu.memory_space<vmem>>, vector<1x1x32x8xbf16>
    %179 = vector.shape_cast %178 : vector<1x1x32x8xbf16> to vector<32x8xbf16>
    %cst_146 = arith.constant dense<0.000000e+00> : vector<8x8xf32>
    %180 = tpu.matmul %28, %179, %cst_146 {dimension_numbers = #tpu.dot_dimension_numbers<[1], [0], [0], [1], [0, 0, 1, 1], [], []>} : vector<8x32xbf16>, vector<32x8xbf16>, vector<8x8xf32> -> vector<8x8xf32>
    %c0_147 = arith.constant 0 : index
    %c3_148 = arith.constant 3 : index
    %c0_149 = arith.constant 0 : index
    %c0_150 = arith.constant 0 : index
    %181 = vector.load %arg7[%c0_147, %c3_148, %c0_149, %c0_150] : memref<2x4x1x8xf32, #tpu.memory_space<vmem>>, vector<1x1x1x8xf32>
    %182 = vector.shape_cast %181 : vector<1x1x1x8xf32> to vector<1x8xf32>
    %183 = vector.broadcast %182 : vector<1x8xf32> to vector<8x8xf32>
    %184 = arith.addf %180, %183 : vector<8x8xf32>
    %c0_151 = arith.constant 0 : index
    %c3_152 = arith.constant 3 : index
    %c0_153 = arith.constant 0 : index
    %c0_154 = arith.constant 0 : index
    %185 = vector.load %arg8[%c0_151, %c3_152, %c0_153, %c0_154] : memref<2x4x32x8xbf16, #tpu.memory_space<vmem>>, vector<1x1x32x8xbf16>
    %186 = vector.shape_cast %185 : vector<1x1x32x8xbf16> to vector<32x8xbf16>
    %cst_155 = arith.constant dense<0.000000e+00> : vector<8x8xf32>
    %187 = tpu.matmul %28, %186, %cst_155 {dimension_numbers = #tpu.dot_dimension_numbers<[1], [0], [0], [1], [0, 0, 1, 1], [], []>} : vector<8x32xbf16>, vector<32x8xbf16>, vector<8x8xf32> -> vector<8x8xf32>
    %c0_156 = arith.constant 0 : index
    %c3_157 = arith.constant 3 : index
    %c0_158 = arith.constant 0 : index
    %c0_159 = arith.constant 0 : index
    %188 = vector.load %arg9[%c0_156, %c3_157, %c0_158, %c0_159] : memref<2x4x1x8xf32, #tpu.memory_space<vmem>>, vector<1x1x1x8xf32>
    %189 = vector.shape_cast %188 : vector<1x1x1x8xf32> to vector<1x8xf32>
    %190 = vector.broadcast %189 : vector<1x8xf32> to vector<8x8xf32>
    %191 = arith.addf %187, %190 : vector<8x8xf32>
    %192 = arith.truncf %177 : vector<8x8xf32> to vector<8x8xbf16>
    %193 = arith.truncf %184 : vector<8x8xf32> to vector<8x8xbf16>
    %cst_160 = arith.constant dense<0.000000e+00> : vector<8x8xf32>
    %194 = tpu.matmul %192, %193, %cst_160 {dimension_numbers = #tpu.dot_dimension_numbers<[1], [1], [0], [0], [0, 0, 1, 0], [], []>} : vector<8x8xbf16>, vector<8x8xbf16>, vector<8x8xf32> -> vector<8x8xf32>
    %cst_161 = arith.constant dense<0xFF800000> : vector<8xf32>
    %195 = vector.multi_reduction <maximumf>, %194, %cst_161 [1] : vector<8x8xf32> to vector<8xf32>
    %196 = vector.shape_cast %195 : vector<8xf32> to vector<8x1xf32>
    %197 = vector.broadcast %196 : vector<8x1xf32> to vector<8x8xf32>
    %198 = arith.subf %194, %197 : vector<8x8xf32>
    %199 = math.exp %198 : vector<8x8xf32>
    %cst_162 = arith.constant dense<0.000000e+00> : vector<8xf32>
    %200 = vector.multi_reduction <add>, %199, %cst_162 [1] : vector<8x8xf32> to vector<8xf32>
    %201 = vector.shape_cast %200 : vector<8xf32> to vector<8x1xf32>
    %202 = tpu.reciprocal %201 {approx = true} : vector<8x1xf32> -> vector<8x1xf32>
    %203 = vector.broadcast %202 : vector<8x1xf32> to vector<8x8xf32>
    %204 = arith.mulf %199, %203 : vector<8x8xf32>
    %c0_163 = arith.constant 0 : index
    %c3_164 = arith.constant 3 : index
    %c0_165 = arith.constant 0 : index
    %c0_166 = arith.constant 0 : index
    %205 = vector.load %arg19[%c0_163, %c3_164, %c0_165, %c0_166] : memref<1x8x8x8xf32, #tpu.memory_space<vmem>>, vector<1x1x8x8xf32>
    %206 = vector.shape_cast %205 : vector<1x1x8x8xf32> to vector<8x8xf32>
    %207 = vector.shape_cast %204 : vector<8x8xf32> to vector<1x1x8x8xf32>
    tpu.vector_store %arg19[%c0_163, %c3_164, %c0_165, %c0_166], %207 {strides = array<i32>} : memref<1x8x8x8xf32, #tpu.memory_space<vmem>>, vector<1x1x8x8xf32>,
    %208 = arith.truncf %204 : vector<8x8xf32> to vector<8x8xbf16>
    %209 = arith.truncf %191 : vector<8x8xf32> to vector<8x8xbf16>
    %cst_167 = arith.constant dense<0.000000e+00> : vector<8x8xf32>
    %210 = tpu.matmul %208, %209, %cst_167 {dimension_numbers = #tpu.dot_dimension_numbers<[1], [0], [0], [1], [0, 0, 1, 1], [], []>} : vector<8x8xbf16>, vector<8x8xbf16>, vector<8x8xf32> -> vector<8x8xf32>
    %211 = arith.truncf %210 : vector<8x8xf32> to vector<8x8xbf16>
    %c0_168 = arith.constant 0 : index
    %c3_169 = arith.constant 3 : index
    %c0_170 = arith.constant 0 : index
    %c0_171 = arith.constant 0 : index
    %212 = vector.load %arg10[%c0_168, %c3_169, %c0_170, %c0_171] : memref<2x4x8x32xbf16, #tpu.memory_space<vmem>>, vector<1x1x8x32xbf16>
    %213 = vector.shape_cast %212 : vector<1x1x8x32xbf16> to vector<8x32xbf16>
    %cst_172 = arith.constant dense<0.000000e+00> : vector<8x32xf32>
    %214 = tpu.matmul %211, %213, %cst_172 {dimension_numbers = #tpu.dot_dimension_numbers<[1], [0], [0], [1], [0, 0, 1, 1], [], []>} : vector<8x8xbf16>, vector<8x32xbf16>, vector<8x32xf32> -> vector<8x32xf32>
    %215 = arith.addf %168, %214 : vector<8x32xf32>
    %216 = arith.addf %1, %215 : vector<8x32xf32>
    %c0_173 = arith.constant 0 : index
    %c0_174 = arith.constant 0 : index
    %c0_175 = arith.constant 0 : index
    %217 = vector.load %arg11[%c0_173, %c0_174, %c0_175] : memref<2x1x32xf32, #tpu.memory_space<vmem>>, vector<1x1x32xf32>
    %218 = vector.shape_cast %217 : vector<1x1x32xf32> to vector<1x32xf32>
    %219 = vector.broadcast %218 : vector<1x32xf32> to vector<8x32xf32>
    %220 = arith.addf %216, %219 : vector<8x32xf32>
    %cst_176 = arith.constant dense<0.000000e+00> : vector<8xf32>
    %221 = vector.multi_reduction <add>, %220, %cst_176 [1] : vector<8x32xf32> to vector<8xf32>
    %222 = vector.shape_cast %221 : vector<8xf32> to vector<8x1xf32>
    %cst_177 = arith.constant 3.200000e+01 : f32
    %223 = vector.broadcast %cst_177 : f32 to vector<8x1xf32>
    %224 = arith.divf %222, %223 : vector<8x1xf32>
    %225 = vector.broadcast %224 : vector<8x1xf32> to vector<8x32xf32>
    %226 = arith.subf %220, %225 : vector<8x32xf32>
    %227 = arith.mulf %226, %226 : vector<8x32xf32>
    %cst_178 = arith.constant dense<0.000000e+00> : vector<8xf32>
    %228 = vector.multi_reduction <add>, %227, %cst_178 [1] : vector<8x32xf32> to vector<8xf32>
    %229 = vector.shape_cast %228 : vector<8xf32> to vector<8x1xf32>
    %cst_179 = arith.constant 3.200000e+01 : f32
    %230 = vector.broadcast %cst_179 : f32 to vector<8x1xf32>
    %231 = arith.divf %229, %230 : vector<8x1xf32>
    %232 = vector.broadcast %224 : vector<8x1xf32> to vector<8x32xf32>
    %233 = arith.subf %220, %232 : vector<8x32xf32>
    %cst_180 = arith.constant 9.99999974E-6 : f32
    %234 = vector.broadcast %cst_180 : f32 to vector<8x1xf32>
    %235 = arith.addf %231, %234 : vector<8x1xf32>
    %236 = math.rsqrt %235 : vector<8x1xf32>
    %237 = vector.broadcast %236 : vector<8x1xf32> to vector<8x32xf32>
    %238 = arith.mulf %233, %237 : vector<8x32xf32>
    %c0_181 = arith.constant 0 : index
    %c0_182 = arith.constant 0 : index
    %c0_183 = arith.constant 0 : index
    %239 = vector.load %arg12[%c0_181, %c0_182, %c0_183] : memref<2x1x32xf32, #tpu.memory_space<vmem>>, vector<1x1x32xf32>
    %240 = vector.shape_cast %239 : vector<1x1x32xf32> to vector<1x32xf32>
    %241 = vector.broadcast %240 : vector<1x32xf32> to vector<8x32xf32>
    %242 = arith.mulf %238, %241 : vector<8x32xf32>
    %c0_184 = arith.constant 0 : index
    %c0_185 = arith.constant 0 : index
    %c0_186 = arith.constant 0 : index
    %243 = vector.load %arg13[%c0_184, %c0_185, %c0_186] : memref<2x1x32xf32, #tpu.memory_space<vmem>>, vector<1x1x32xf32>
    %244 = vector.shape_cast %243 : vector<1x1x32xf32> to vector<1x32xf32>
    %245 = vector.broadcast %244 : vector<1x32xf32> to vector<8x32xf32>
    %246 = arith.addf %242, %245 : vector<8x32xf32>
    %247 = arith.truncf %246 : vector<8x32xf32> to vector<8x32xbf16>
    %c0_187 = arith.constant 0 : index
    %c0_188 = arith.constant 0 : index
    %c0_189 = arith.constant 0 : index
    %248 = vector.load %arg14[%c0_187, %c0_188, %c0_189] : memref<2x32x64xbf16, #tpu.memory_space<vmem>>, vector<1x32x64xbf16>
    %249 = vector.shape_cast %248 : vector<1x32x64xbf16> to vector<32x64xbf16>
    %cst_190 = arith.constant dense<0.000000e+00> : vector<8x64xf32>
    %250 = tpu.matmul %247, %249, %cst_190 {dimension_numbers = #tpu.dot_dimension_numbers<[1], [0], [0], [1], [0, 0, 1, 1], [], []>} : vector<8x32xbf16>, vector<32x64xbf16>, vector<8x64xf32> -> vector<8x64xf32>
    %c0_191 = arith.constant 0 : index
    %c0_192 = arith.constant 0 : index
    %c0_193 = arith.constant 0 : index
    %251 = vector.load %arg15[%c0_191, %c0_192, %c0_193] : memref<2x1x64xf32, #tpu.memory_space<vmem>>, vector<1x1x64xf32>
    %252 = vector.shape_cast %251 : vector<1x1x64xf32> to vector<1x64xf32>
    %253 = vector.broadcast %252 : vector<1x64xf32> to vector<8x64xf32>
    %254 = arith.addf %250, %253 : vector<8x64xf32>
    %cst_194 = arith.constant 5.000000e-01 : f32
    %255 = vector.broadcast %cst_194 : f32 to vector<8x64xf32>
    %256 = arith.mulf %255, %254 : vector<8x64xf32>
    %cst_195 = arith.constant 0.707106769 : f32
    %257 = vector.broadcast %cst_195 : f32 to vector<8x64xf32>
    %258 = arith.mulf %254, %257 : vector<8x64xf32>
    %259 = math.erf %258 : vector<8x64xf32>
    %cst_196 = arith.constant 1.000000e+00 : f32
    %260 = vector.broadcast %cst_196 : f32 to vector<8x64xf32>
    %261 = arith.addf %260, %259 : vector<8x64xf32>
    %262 = arith.mulf %256, %261 : vector<8x64xf32>
    %263 = arith.truncf %262 : vector<8x64xf32> to vector<8x64xbf16>
    %c0_197 = arith.constant 0 : index
    %c0_198 = arith.constant 0 : index
    %c0_199 = arith.constant 0 : index
    %264 = vector.load %arg16[%c0_197, %c0_198, %c0_199] : memref<2x64x32xbf16, #tpu.memory_space<vmem>>, vector<1x64x32xbf16>
    %265 = vector.shape_cast %264 : vector<1x64x32xbf16> to vector<64x32xbf16>
    %cst_200 = arith.constant dense<0.000000e+00> : vector<8x32xf32>
    %266 = tpu.matmul %263, %265, %cst_200 {dimension_numbers = #tpu.dot_dimension_numbers<[1], [0], [0], [1], [0, 0, 1, 1], [], []>} : vector<8x64xbf16>, vector<64x32xbf16>, vector<8x32xf32> -> vector<8x32xf32>
    %c0_201 = arith.constant 0 : index
    %c0_202 = arith.constant 0 : index
    %c0_203 = arith.constant 0 : index
    %267 = vector.load %arg17[%c0_201, %c0_202, %c0_203] : memref<2x1x32xf32, #tpu.memory_space<vmem>>, vector<1x1x32xf32>
    %268 = vector.shape_cast %267 : vector<1x1x32xf32> to vector<1x32xf32>
    %269 = vector.broadcast %268 : vector<1x32xf32> to vector<8x32xf32>
    %270 = arith.addf %266, %269 : vector<8x32xf32>
    %271 = arith.addf %220, %270 : vector<8x32xf32>
    %cst_204 = arith.constant dense<0.000000e+00> : vector<8xf32>
    %272 = vector.multi_reduction <add>, %271, %cst_204 [1] : vector<8x32xf32> to vector<8xf32>
    %273 = vector.shape_cast %272 : vector<8xf32> to vector<8x1xf32>
    %cst_205 = arith.constant 3.200000e+01 : f32
    %274 = vector.broadcast %cst_205 : f32 to vector<8x1xf32>
    %275 = arith.divf %273, %274 : vector<8x1xf32>
    %276 = vector.broadcast %275 : vector<8x1xf32> to vector<8x32xf32>
    %277 = arith.subf %271, %276 : vector<8x32xf32>
    %278 = arith.mulf %277, %277 : vector<8x32xf32>
    %cst_206 = arith.constant dense<0.000000e+00> : vector<8xf32>
    %279 = vector.multi_reduction <add>, %278, %cst_206 [1] : vector<8x32xf32> to vector<8xf32>
    %280 = vector.shape_cast %279 : vector<8xf32> to vector<8x1xf32>
    %cst_207 = arith.constant 3.200000e+01 : f32
    %281 = vector.broadcast %cst_207 : f32 to vector<8x1xf32>
    %282 = arith.divf %280, %281 : vector<8x1xf32>
    %283 = vector.broadcast %275 : vector<8x1xf32> to vector<8x32xf32>
    %284 = arith.subf %271, %283 : vector<8x32xf32>
    %cst_208 = arith.constant 9.99999974E-6 : f32
    %285 = vector.broadcast %cst_208 : f32 to vector<8x1xf32>
    %286 = arith.addf %282, %285 : vector<8x1xf32>
    %287 = math.rsqrt %286 : vector<8x1xf32>
    %288 = vector.broadcast %287 : vector<8x1xf32> to vector<8x32xf32>
    %289 = arith.mulf %284, %288 : vector<8x32xf32>
    %c1_209 = arith.constant 1 : index
    %c0_210 = arith.constant 0 : index
    %c0_211 = arith.constant 0 : index
    %290 = vector.load %arg2[%c1_209, %c0_210, %c0_211] : memref<2x1x32xf32, #tpu.memory_space<vmem>>, vector<1x1x32xf32>
    %291 = vector.shape_cast %290 : vector<1x1x32xf32> to vector<1x32xf32>
    %292 = vector.broadcast %291 : vector<1x32xf32> to vector<8x32xf32>
    %293 = arith.mulf %289, %292 : vector<8x32xf32>
    %c1_212 = arith.constant 1 : index
    %c0_213 = arith.constant 0 : index
    %c0_214 = arith.constant 0 : index
    %294 = vector.load %arg3[%c1_212, %c0_213, %c0_214] : memref<2x1x32xf32, #tpu.memory_space<vmem>>, vector<1x1x32xf32>
    %295 = vector.shape_cast %294 : vector<1x1x32xf32> to vector<1x32xf32>
    %296 = vector.broadcast %295 : vector<1x32xf32> to vector<8x32xf32>
    %297 = arith.addf %293, %296 : vector<8x32xf32>
    %298 = arith.truncf %297 : vector<8x32xf32> to vector<8x32xbf16>
    %c1_215 = arith.constant 1 : index
    %c0_216 = arith.constant 0 : index
    %c0_217 = arith.constant 0 : index
    %c0_218 = arith.constant 0 : index
    %299 = vector.load %arg4[%c1_215, %c0_216, %c0_217, %c0_218] : memref<2x4x32x8xbf16, #tpu.memory_space<vmem>>, vector<1x1x32x8xbf16>
    %300 = vector.shape_cast %299 : vector<1x1x32x8xbf16> to vector<32x8xbf16>
    %cst_219 = arith.constant dense<0.000000e+00> : vector<8x8xf32>
    %301 = tpu.matmul %298, %300, %cst_219 {dimension_numbers = #tpu.dot_dimension_numbers<[1], [0], [0], [1], [0, 0, 1, 1], [], []>} : vector<8x32xbf16>, vector<32x8xbf16>, vector<8x8xf32> -> vector<8x8xf32>
    %c1_220 = arith.constant 1 : index
    %c0_221 = arith.constant 0 : index
    %c0_222 = arith.constant 0 : index
    %c0_223 = arith.constant 0 : index
    %302 = vector.load %arg5[%c1_220, %c0_221, %c0_222, %c0_223] : memref<2x4x1x8xf32, #tpu.memory_space<vmem>>, vector<1x1x1x8xf32>
    %303 = vector.shape_cast %302 : vector<1x1x1x8xf32> to vector<1x8xf32>
    %304 = vector.broadcast %303 : vector<1x8xf32> to vector<8x8xf32>
    %305 = arith.addf %301, %304 : vector<8x8xf32>
    %cst_224 = arith.constant 0.353553385 : f32
    %306 = vector.broadcast %cst_224 : f32 to vector<8x8xf32>
    %307 = arith.mulf %305, %306 : vector<8x8xf32>
    %c1_225 = arith.constant 1 : index
    %c0_226 = arith.constant 0 : index
    %c0_227 = arith.constant 0 : index
    %c0_228 = arith.constant 0 : index
    %308 = vector.load %arg6[%c1_225, %c0_226, %c0_227, %c0_228] : memref<2x4x32x8xbf16, #tpu.memory_space<vmem>>, vector<1x1x32x8xbf16>
    %309 = vector.shape_cast %308 : vector<1x1x32x8xbf16> to vector<32x8xbf16>
    %cst_229 = arith.constant dense<0.000000e+00> : vector<8x8xf32>
    %310 = tpu.matmul %298, %309, %cst_229 {dimension_numbers = #tpu.dot_dimension_numbers<[1], [0], [0], [1], [0, 0, 1, 1], [], []>} : vector<8x32xbf16>, vector<32x8xbf16>, vector<8x8xf32> -> vector<8x8xf32>
    %c1_230 = arith.constant 1 : index
    %c0_231 = arith.constant 0 : index
    %c0_232 = arith.constant 0 : index
    %c0_233 = arith.constant 0 : index
    %311 = vector.load %arg7[%c1_230, %c0_231, %c0_232, %c0_233] : memref<2x4x1x8xf32, #tpu.memory_space<vmem>>, vector<1x1x1x8xf32>
    %312 = vector.shape_cast %311 : vector<1x1x1x8xf32> to vector<1x8xf32>
    %313 = vector.broadcast %312 : vector<1x8xf32> to vector<8x8xf32>
    %314 = arith.addf %310, %313 : vector<8x8xf32>
    %c1_234 = arith.constant 1 : index
    %c0_235 = arith.constant 0 : index
    %c0_236 = arith.constant 0 : index
    %c0_237 = arith.constant 0 : index
    %315 = vector.load %arg8[%c1_234, %c0_235, %c0_236, %c0_237] : memref<2x4x32x8xbf16, #tpu.memory_space<vmem>>, vector<1x1x32x8xbf16>
    %316 = vector.shape_cast %315 : vector<1x1x32x8xbf16> to vector<32x8xbf16>
    %cst_238 = arith.constant dense<0.000000e+00> : vector<8x8xf32>
    %317 = tpu.matmul %298, %316, %cst_238 {dimension_numbers = #tpu.dot_dimension_numbers<[1], [0], [0], [1], [0, 0, 1, 1], [], []>} : vector<8x32xbf16>, vector<32x8xbf16>, vector<8x8xf32> -> vector<8x8xf32>
    %c1_239 = arith.constant 1 : index
    %c0_240 = arith.constant 0 : index
    %c0_241 = arith.constant 0 : index
    %c0_242 = arith.constant 0 : index
    %318 = vector.load %arg9[%c1_239, %c0_240, %c0_241, %c0_242] : memref<2x4x1x8xf32, #tpu.memory_space<vmem>>, vector<1x1x1x8xf32>
    %319 = vector.shape_cast %318 : vector<1x1x1x8xf32> to vector<1x8xf32>
    %320 = vector.broadcast %319 : vector<1x8xf32> to vector<8x8xf32>
    %321 = arith.addf %317, %320 : vector<8x8xf32>
    %322 = arith.truncf %307 : vector<8x8xf32> to vector<8x8xbf16>
    %323 = arith.truncf %314 : vector<8x8xf32> to vector<8x8xbf16>
    %cst_243 = arith.constant dense<0.000000e+00> : vector<8x8xf32>
    %324 = tpu.matmul %322, %323, %cst_243 {dimension_numbers = #tpu.dot_dimension_numbers<[1], [1], [0], [0], [0, 0, 1, 0], [], []>} : vector<8x8xbf16>, vector<8x8xbf16>, vector<8x8xf32> -> vector<8x8xf32>
    %cst_244 = arith.constant dense<0xFF800000> : vector<8xf32>
    %325 = vector.multi_reduction <maximumf>, %324, %cst_244 [1] : vector<8x8xf32> to vector<8xf32>
    %326 = vector.shape_cast %325 : vector<8xf32> to vector<8x1xf32>
    %327 = vector.broadcast %326 : vector<8x1xf32> to vector<8x8xf32>
    %328 = arith.subf %324, %327 : vector<8x8xf32>
    %329 = math.exp %328 : vector<8x8xf32>
    %cst_245 = arith.constant dense<0.000000e+00> : vector<8xf32>
    %330 = vector.multi_reduction <add>, %329, %cst_245 [1] : vector<8x8xf32> to vector<8xf32>
    %331 = vector.shape_cast %330 : vector<8xf32> to vector<8x1xf32>
    %332 = tpu.reciprocal %331 {approx = true} : vector<8x1xf32> -> vector<8x1xf32>
    %333 = vector.broadcast %332 : vector<8x1xf32> to vector<8x8xf32>
    %334 = arith.mulf %329, %333 : vector<8x8xf32>
    %c0_246 = arith.constant 0 : index
    %c4 = arith.constant 4 : index
    %c0_247 = arith.constant 0 : index
    %c0_248 = arith.constant 0 : index
    %335 = vector.load %arg19[%c0_246, %c4, %c0_247, %c0_248] : memref<1x8x8x8xf32, #tpu.memory_space<vmem>>, vector<1x1x8x8xf32>
    %336 = vector.shape_cast %335 : vector<1x1x8x8xf32> to vector<8x8xf32>
    %337 = vector.shape_cast %334 : vector<8x8xf32> to vector<1x1x8x8xf32>
    tpu.vector_store %arg19[%c0_246, %c4, %c0_247, %c0_248], %337 {strides = array<i32>} : memref<1x8x8x8xf32, #tpu.memory_space<vmem>>, vector<1x1x8x8xf32>,
    %338 = arith.truncf %334 : vector<8x8xf32> to vector<8x8xbf16>
    %339 = arith.truncf %321 : vector<8x8xf32> to vector<8x8xbf16>
    %cst_249 = arith.constant dense<0.000000e+00> : vector<8x8xf32>
    %340 = tpu.matmul %338, %339, %cst_249 {dimension_numbers = #tpu.dot_dimension_numbers<[1], [0], [0], [1], [0, 0, 1, 1], [], []>} : vector<8x8xbf16>, vector<8x8xbf16>, vector<8x8xf32> -> vector<8x8xf32>
    %341 = arith.truncf %340 : vector<8x8xf32> to vector<8x8xbf16>
    %c1_250 = arith.constant 1 : index
    %c0_251 = arith.constant 0 : index
    %c0_252 = arith.constant 0 : index
    %c0_253 = arith.constant 0 : index
    %342 = vector.load %arg10[%c1_250, %c0_251, %c0_252, %c0_253] : memref<2x4x8x32xbf16, #tpu.memory_space<vmem>>, vector<1x1x8x32xbf16>
    %343 = vector.shape_cast %342 : vector<1x1x8x32xbf16> to vector<8x32xbf16>
    %cst_254 = arith.constant dense<0.000000e+00> : vector<8x32xf32>
    %344 = tpu.matmul %341, %343, %cst_254 {dimension_numbers = #tpu.dot_dimension_numbers<[1], [0], [0], [1], [0, 0, 1, 1], [], []>} : vector<8x8xbf16>, vector<8x32xbf16>, vector<8x32xf32> -> vector<8x32xf32>
    %c1_255 = arith.constant 1 : index
    %c1_256 = arith.constant 1 : index
    %c0_257 = arith.constant 0 : index
    %c0_258 = arith.constant 0 : index
    %345 = vector.load %arg4[%c1_255, %c1_256, %c0_257, %c0_258] : memref<2x4x32x8xbf16, #tpu.memory_space<vmem>>, vector<1x1x32x8xbf16>
    %346 = vector.shape_cast %345 : vector<1x1x32x8xbf16> to vector<32x8xbf16>
    %cst_259 = arith.constant dense<0.000000e+00> : vector<8x8xf32>
    %347 = tpu.matmul %298, %346, %cst_259 {dimension_numbers = #tpu.dot_dimension_numbers<[1], [0], [0], [1], [0, 0, 1, 1], [], []>} : vector<8x32xbf16>, vector<32x8xbf16>, vector<8x8xf32> -> vector<8x8xf32>
    %c1_260 = arith.constant 1 : index
    %c1_261 = arith.constant 1 : index
    %c0_262 = arith.constant 0 : index
    %c0_263 = arith.constant 0 : index
    %348 = vector.load %arg5[%c1_260, %c1_261, %c0_262, %c0_263] : memref<2x4x1x8xf32, #tpu.memory_space<vmem>>, vector<1x1x1x8xf32>
    %349 = vector.shape_cast %348 : vector<1x1x1x8xf32> to vector<1x8xf32>
    %350 = vector.broadcast %349 : vector<1x8xf32> to vector<8x8xf32>
    %351 = arith.addf %347, %350 : vector<8x8xf32>
    %cst_264 = arith.constant 0.353553385 : f32
    %352 = vector.broadcast %cst_264 : f32 to vector<8x8xf32>
    %353 = arith.mulf %351, %352 : vector<8x8xf32>
    %c1_265 = arith.constant 1 : index
    %c1_266 = arith.constant 1 : index
    %c0_267 = arith.constant 0 : index
    %c0_268 = arith.constant 0 : index
    %354 = vector.load %arg6[%c1_265, %c1_266, %c0_267, %c0_268] : memref<2x4x32x8xbf16, #tpu.memory_space<vmem>>, vector<1x1x32x8xbf16>
    %355 = vector.shape_cast %354 : vector<1x1x32x8xbf16> to vector<32x8xbf16>
    %cst_269 = arith.constant dense<0.000000e+00> : vector<8x8xf32>
    %356 = tpu.matmul %298, %355, %cst_269 {dimension_numbers = #tpu.dot_dimension_numbers<[1], [0], [0], [1], [0, 0, 1, 1], [], []>} : vector<8x32xbf16>, vector<32x8xbf16>, vector<8x8xf32> -> vector<8x8xf32>
    %c1_270 = arith.constant 1 : index
    %c1_271 = arith.constant 1 : index
    %c0_272 = arith.constant 0 : index
    %c0_273 = arith.constant 0 : index
    %357 = vector.load %arg7[%c1_270, %c1_271, %c0_272, %c0_273] : memref<2x4x1x8xf32, #tpu.memory_space<vmem>>, vector<1x1x1x8xf32>
    %358 = vector.shape_cast %357 : vector<1x1x1x8xf32> to vector<1x8xf32>
    %359 = vector.broadcast %358 : vector<1x8xf32> to vector<8x8xf32>
    %360 = arith.addf %356, %359 : vector<8x8xf32>
    %c1_274 = arith.constant 1 : index
    %c1_275 = arith.constant 1 : index
    %c0_276 = arith.constant 0 : index
    %c0_277 = arith.constant 0 : index
    %361 = vector.load %arg8[%c1_274, %c1_275, %c0_276, %c0_277] : memref<2x4x32x8xbf16, #tpu.memory_space<vmem>>, vector<1x1x32x8xbf16>
    %362 = vector.shape_cast %361 : vector<1x1x32x8xbf16> to vector<32x8xbf16>
    %cst_278 = arith.constant dense<0.000000e+00> : vector<8x8xf32>
    %363 = tpu.matmul %298, %362, %cst_278 {dimension_numbers = #tpu.dot_dimension_numbers<[1], [0], [0], [1], [0, 0, 1, 1], [], []>} : vector<8x32xbf16>, vector<32x8xbf16>, vector<8x8xf32> -> vector<8x8xf32>
    %c1_279 = arith.constant 1 : index
    %c1_280 = arith.constant 1 : index
    %c0_281 = arith.constant 0 : index
    %c0_282 = arith.constant 0 : index
    %364 = vector.load %arg9[%c1_279, %c1_280, %c0_281, %c0_282] : memref<2x4x1x8xf32, #tpu.memory_space<vmem>>, vector<1x1x1x8xf32>
    %365 = vector.shape_cast %364 : vector<1x1x1x8xf32> to vector<1x8xf32>
    %366 = vector.broadcast %365 : vector<1x8xf32> to vector<8x8xf32>
    %367 = arith.addf %363, %366 : vector<8x8xf32>
    %368 = arith.truncf %353 : vector<8x8xf32> to vector<8x8xbf16>
    %369 = arith.truncf %360 : vector<8x8xf32> to vector<8x8xbf16>
    %cst_283 = arith.constant dense<0.000000e+00> : vector<8x8xf32>
    %370 = tpu.matmul %368, %369, %cst_283 {dimension_numbers = #tpu.dot_dimension_numbers<[1], [1], [0], [0], [0, 0, 1, 0], [], []>} : vector<8x8xbf16>, vector<8x8xbf16>, vector<8x8xf32> -> vector<8x8xf32>
    %cst_284 = arith.constant dense<0xFF800000> : vector<8xf32>
    %371 = vector.multi_reduction <maximumf>, %370, %cst_284 [1] : vector<8x8xf32> to vector<8xf32>
    %372 = vector.shape_cast %371 : vector<8xf32> to vector<8x1xf32>
    %373 = vector.broadcast %372 : vector<8x1xf32> to vector<8x8xf32>
    %374 = arith.subf %370, %373 : vector<8x8xf32>
    %375 = math.exp %374 : vector<8x8xf32>
    %cst_285 = arith.constant dense<0.000000e+00> : vector<8xf32>
    %376 = vector.multi_reduction <add>, %375, %cst_285 [1] : vector<8x8xf32> to vector<8xf32>
    %377 = vector.shape_cast %376 : vector<8xf32> to vector<8x1xf32>
    %378 = tpu.reciprocal %377 {approx = true} : vector<8x1xf32> -> vector<8x1xf32>
    %379 = vector.broadcast %378 : vector<8x1xf32> to vector<8x8xf32>
    %380 = arith.mulf %375, %379 : vector<8x8xf32>
    %c0_286 = arith.constant 0 : index
    %c5 = arith.constant 5 : index
    %c0_287 = arith.constant 0 : index
    %c0_288 = arith.constant 0 : index
    %381 = vector.load %arg19[%c0_286, %c5, %c0_287, %c0_288] : memref<1x8x8x8xf32, #tpu.memory_space<vmem>>, vector<1x1x8x8xf32>
    %382 = vector.shape_cast %381 : vector<1x1x8x8xf32> to vector<8x8xf32>
    %383 = vector.shape_cast %380 : vector<8x8xf32> to vector<1x1x8x8xf32>
    tpu.vector_store %arg19[%c0_286, %c5, %c0_287, %c0_288], %383 {strides = array<i32>} : memref<1x8x8x8xf32, #tpu.memory_space<vmem>>, vector<1x1x8x8xf32>,
    %384 = arith.truncf %380 : vector<8x8xf32> to vector<8x8xbf16>
    %385 = arith.truncf %367 : vector<8x8xf32> to vector<8x8xbf16>
    %cst_289 = arith.constant dense<0.000000e+00> : vector<8x8xf32>
    %386 = tpu.matmul %384, %385, %cst_289 {dimension_numbers = #tpu.dot_dimension_numbers<[1], [0], [0], [1], [0, 0, 1, 1], [], []>} : vector<8x8xbf16>, vector<8x8xbf16>, vector<8x8xf32> -> vector<8x8xf32>
    %387 = arith.truncf %386 : vector<8x8xf32> to vector<8x8xbf16>
    %c1_290 = arith.constant 1 : index
    %c1_291 = arith.constant 1 : index
    %c0_292 = arith.constant 0 : index
    %c0_293 = arith.constant 0 : index
    %388 = vector.load %arg10[%c1_290, %c1_291, %c0_292, %c0_293] : memref<2x4x8x32xbf16, #tpu.memory_space<vmem>>, vector<1x1x8x32xbf16>
    %389 = vector.shape_cast %388 : vector<1x1x8x32xbf16> to vector<8x32xbf16>
    %cst_294 = arith.constant dense<0.000000e+00> : vector<8x32xf32>
    %390 = tpu.matmul %387, %389, %cst_294 {dimension_numbers = #tpu.dot_dimension_numbers<[1], [0], [0], [1], [0, 0, 1, 1], [], []>} : vector<8x8xbf16>, vector<8x32xbf16>, vector<8x32xf32> -> vector<8x32xf32>
    %391 = arith.addf %344, %390 : vector<8x32xf32>
    %c1_295 = arith.constant 1 : index
    %c2_296 = arith.constant 2 : index
    %c0_297 = arith.constant 0 : index
    %c0_298 = arith.constant 0 : index
    %392 = vector.load %arg4[%c1_295, %c2_296, %c0_297, %c0_298] : memref<2x4x32x8xbf16, #tpu.memory_space<vmem>>, vector<1x1x32x8xbf16>
    %393 = vector.shape_cast %392 : vector<1x1x32x8xbf16> to vector<32x8xbf16>
    %cst_299 = arith.constant dense<0.000000e+00> : vector<8x8xf32>
    %394 = tpu.matmul %298, %393, %cst_299 {dimension_numbers = #tpu.dot_dimension_numbers<[1], [0], [0], [1], [0, 0, 1, 1], [], []>} : vector<8x32xbf16>, vector<32x8xbf16>, vector<8x8xf32> -> vector<8x8xf32>
    %c1_300 = arith.constant 1 : index
    %c2_301 = arith.constant 2 : index
    %c0_302 = arith.constant 0 : index
    %c0_303 = arith.constant 0 : index
    %395 = vector.load %arg5[%c1_300, %c2_301, %c0_302, %c0_303] : memref<2x4x1x8xf32, #tpu.memory_space<vmem>>, vector<1x1x1x8xf32>
    %396 = vector.shape_cast %395 : vector<1x1x1x8xf32> to vector<1x8xf32>
    %397 = vector.broadcast %396 : vector<1x8xf32> to vector<8x8xf32>
    %398 = arith.addf %394, %397 : vector<8x8xf32>
    %cst_304 = arith.constant 0.353553385 : f32
    %399 = vector.broadcast %cst_304 : f32 to vector<8x8xf32>
    %400 = arith.mulf %398, %399 : vector<8x8xf32>
    %c1_305 = arith.constant 1 : index
    %c2_306 = arith.constant 2 : index
    %c0_307 = arith.constant 0 : index
    %c0_308 = arith.constant 0 : index
    %401 = vector.load %arg6[%c1_305, %c2_306, %c0_307, %c0_308] : memref<2x4x32x8xbf16, #tpu.memory_space<vmem>>, vector<1x1x32x8xbf16>
    %402 = vector.shape_cast %401 : vector<1x1x32x8xbf16> to vector<32x8xbf16>
    %cst_309 = arith.constant dense<0.000000e+00> : vector<8x8xf32>
    %403 = tpu.matmul %298, %402, %cst_309 {dimension_numbers = #tpu.dot_dimension_numbers<[1], [0], [0], [1], [0, 0, 1, 1], [], []>} : vector<8x32xbf16>, vector<32x8xbf16>, vector<8x8xf32> -> vector<8x8xf32>
    %c1_310 = arith.constant 1 : index
    %c2_311 = arith.constant 2 : index
    %c0_312 = arith.constant 0 : index
    %c0_313 = arith.constant 0 : index
    %404 = vector.load %arg7[%c1_310, %c2_311, %c0_312, %c0_313] : memref<2x4x1x8xf32, #tpu.memory_space<vmem>>, vector<1x1x1x8xf32>
    %405 = vector.shape_cast %404 : vector<1x1x1x8xf32> to vector<1x8xf32>
    %406 = vector.broadcast %405 : vector<1x8xf32> to vector<8x8xf32>
    %407 = arith.addf %403, %406 : vector<8x8xf32>
    %c1_314 = arith.constant 1 : index
    %c2_315 = arith.constant 2 : index
    %c0_316 = arith.constant 0 : index
    %c0_317 = arith.constant 0 : index
    %408 = vector.load %arg8[%c1_314, %c2_315, %c0_316, %c0_317] : memref<2x4x32x8xbf16, #tpu.memory_space<vmem>>, vector<1x1x32x8xbf16>
    %409 = vector.shape_cast %408 : vector<1x1x32x8xbf16> to vector<32x8xbf16>
    %cst_318 = arith.constant dense<0.000000e+00> : vector<8x8xf32>
    %410 = tpu.matmul %298, %409, %cst_318 {dimension_numbers = #tpu.dot_dimension_numbers<[1], [0], [0], [1], [0, 0, 1, 1], [], []>} : vector<8x32xbf16>, vector<32x8xbf16>, vector<8x8xf32> -> vector<8x8xf32>
    %c1_319 = arith.constant 1 : index
    %c2_320 = arith.constant 2 : index
    %c0_321 = arith.constant 0 : index
    %c0_322 = arith.constant 0 : index
    %411 = vector.load %arg9[%c1_319, %c2_320, %c0_321, %c0_322] : memref<2x4x1x8xf32, #tpu.memory_space<vmem>>, vector<1x1x1x8xf32>
    %412 = vector.shape_cast %411 : vector<1x1x1x8xf32> to vector<1x8xf32>
    %413 = vector.broadcast %412 : vector<1x8xf32> to vector<8x8xf32>
    %414 = arith.addf %410, %413 : vector<8x8xf32>
    %415 = arith.truncf %400 : vector<8x8xf32> to vector<8x8xbf16>
    %416 = arith.truncf %407 : vector<8x8xf32> to vector<8x8xbf16>
    %cst_323 = arith.constant dense<0.000000e+00> : vector<8x8xf32>
    %417 = tpu.matmul %415, %416, %cst_323 {dimension_numbers = #tpu.dot_dimension_numbers<[1], [1], [0], [0], [0, 0, 1, 0], [], []>} : vector<8x8xbf16>, vector<8x8xbf16>, vector<8x8xf32> -> vector<8x8xf32>
    %cst_324 = arith.constant dense<0xFF800000> : vector<8xf32>
    %418 = vector.multi_reduction <maximumf>, %417, %cst_324 [1] : vector<8x8xf32> to vector<8xf32>
    %419 = vector.shape_cast %418 : vector<8xf32> to vector<8x1xf32>
    %420 = vector.broadcast %419 : vector<8x1xf32> to vector<8x8xf32>
    %421 = arith.subf %417, %420 : vector<8x8xf32>
    %422 = math.exp %421 : vector<8x8xf32>
    %cst_325 = arith.constant dense<0.000000e+00> : vector<8xf32>
    %423 = vector.multi_reduction <add>, %422, %cst_325 [1] : vector<8x8xf32> to vector<8xf32>
    %424 = vector.shape_cast %423 : vector<8xf32> to vector<8x1xf32>
    %425 = tpu.reciprocal %424 {approx = true} : vector<8x1xf32> -> vector<8x1xf32>
    %426 = vector.broadcast %425 : vector<8x1xf32> to vector<8x8xf32>
    %427 = arith.mulf %422, %426 : vector<8x8xf32>
    %c0_326 = arith.constant 0 : index
    %c6 = arith.constant 6 : index
    %c0_327 = arith.constant 0 : index
    %c0_328 = arith.constant 0 : index
    %428 = vector.load %arg19[%c0_326, %c6, %c0_327, %c0_328] : memref<1x8x8x8xf32, #tpu.memory_space<vmem>>, vector<1x1x8x8xf32>
    %429 = vector.shape_cast %428 : vector<1x1x8x8xf32> to vector<8x8xf32>
    %430 = vector.shape_cast %427 : vector<8x8xf32> to vector<1x1x8x8xf32>
    tpu.vector_store %arg19[%c0_326, %c6, %c0_327, %c0_328], %430 {strides = array<i32>} : memref<1x8x8x8xf32, #tpu.memory_space<vmem>>, vector<1x1x8x8xf32>,
    %431 = arith.truncf %427 : vector<8x8xf32> to vector<8x8xbf16>
    %432 = arith.truncf %414 : vector<8x8xf32> to vector<8x8xbf16>
    %cst_329 = arith.constant dense<0.000000e+00> : vector<8x8xf32>
    %433 = tpu.matmul %431, %432, %cst_329 {dimension_numbers = #tpu.dot_dimension_numbers<[1], [0], [0], [1], [0, 0, 1, 1], [], []>} : vector<8x8xbf16>, vector<8x8xbf16>, vector<8x8xf32> -> vector<8x8xf32>
    %434 = arith.truncf %433 : vector<8x8xf32> to vector<8x8xbf16>
    %c1_330 = arith.constant 1 : index
    %c2_331 = arith.constant 2 : index
    %c0_332 = arith.constant 0 : index
    %c0_333 = arith.constant 0 : index
    %435 = vector.load %arg10[%c1_330, %c2_331, %c0_332, %c0_333] : memref<2x4x8x32xbf16, #tpu.memory_space<vmem>>, vector<1x1x8x32xbf16>
    %436 = vector.shape_cast %435 : vector<1x1x8x32xbf16> to vector<8x32xbf16>
    %cst_334 = arith.constant dense<0.000000e+00> : vector<8x32xf32>
    %437 = tpu.matmul %434, %436, %cst_334 {dimension_numbers = #tpu.dot_dimension_numbers<[1], [0], [0], [1], [0, 0, 1, 1], [], []>} : vector<8x8xbf16>, vector<8x32xbf16>, vector<8x32xf32> -> vector<8x32xf32>
    %438 = arith.addf %391, %437 : vector<8x32xf32>
    %c1_335 = arith.constant 1 : index
    %c3_336 = arith.constant 3 : index
    %c0_337 = arith.constant 0 : index
    %c0_338 = arith.constant 0 : index
    %439 = vector.load %arg4[%c1_335, %c3_336, %c0_337, %c0_338] : memref<2x4x32x8xbf16, #tpu.memory_space<vmem>>, vector<1x1x32x8xbf16>
    %440 = vector.shape_cast %439 : vector<1x1x32x8xbf16> to vector<32x8xbf16>
    %cst_339 = arith.constant dense<0.000000e+00> : vector<8x8xf32>
    %441 = tpu.matmul %298, %440, %cst_339 {dimension_numbers = #tpu.dot_dimension_numbers<[1], [0], [0], [1], [0, 0, 1, 1], [], []>} : vector<8x32xbf16>, vector<32x8xbf16>, vector<8x8xf32> -> vector<8x8xf32>
    %c1_340 = arith.constant 1 : index
    %c3_341 = arith.constant 3 : index
    %c0_342 = arith.constant 0 : index
    %c0_343 = arith.constant 0 : index
    %442 = vector.load %arg5[%c1_340, %c3_341, %c0_342, %c0_343] : memref<2x4x1x8xf32, #tpu.memory_space<vmem>>, vector<1x1x1x8xf32>
    %443 = vector.shape_cast %442 : vector<1x1x1x8xf32> to vector<1x8xf32>
    %444 = vector.broadcast %443 : vector<1x8xf32> to vector<8x8xf32>
    %445 = arith.addf %441, %444 : vector<8x8xf32>
    %cst_344 = arith.constant 0.353553385 : f32
    %446 = vector.broadcast %cst_344 : f32 to vector<8x8xf32>
    %447 = arith.mulf %445, %446 : vector<8x8xf32>
    %c1_345 = arith.constant 1 : index
    %c3_346 = arith.constant 3 : index
    %c0_347 = arith.constant 0 : index
    %c0_348 = arith.constant 0 : index
    %448 = vector.load %arg6[%c1_345, %c3_346, %c0_347, %c0_348] : memref<2x4x32x8xbf16, #tpu.memory_space<vmem>>, vector<1x1x32x8xbf16>
    %449 = vector.shape_cast %448 : vector<1x1x32x8xbf16> to vector<32x8xbf16>
    %cst_349 = arith.constant dense<0.000000e+00> : vector<8x8xf32>
    %450 = tpu.matmul %298, %449, %cst_349 {dimension_numbers = #tpu.dot_dimension_numbers<[1], [0], [0], [1], [0, 0, 1, 1], [], []>} : vector<8x32xbf16>, vector<32x8xbf16>, vector<8x8xf32> -> vector<8x8xf32>
    %c1_350 = arith.constant 1 : index
    %c3_351 = arith.constant 3 : index
    %c0_352 = arith.constant 0 : index
    %c0_353 = arith.constant 0 : index
    %451 = vector.load %arg7[%c1_350, %c3_351, %c0_352, %c0_353] : memref<2x4x1x8xf32, #tpu.memory_space<vmem>>, vector<1x1x1x8xf32>
    %452 = vector.shape_cast %451 : vector<1x1x1x8xf32> to vector<1x8xf32>
    %453 = vector.broadcast %452 : vector<1x8xf32> to vector<8x8xf32>
    %454 = arith.addf %450, %453 : vector<8x8xf32>
    %c1_354 = arith.constant 1 : index
    %c3_355 = arith.constant 3 : index
    %c0_356 = arith.constant 0 : index
    %c0_357 = arith.constant 0 : index
    %455 = vector.load %arg8[%c1_354, %c3_355, %c0_356, %c0_357] : memref<2x4x32x8xbf16, #tpu.memory_space<vmem>>, vector<1x1x32x8xbf16>
    %456 = vector.shape_cast %455 : vector<1x1x32x8xbf16> to vector<32x8xbf16>
    %cst_358 = arith.constant dense<0.000000e+00> : vector<8x8xf32>
    %457 = tpu.matmul %298, %456, %cst_358 {dimension_numbers = #tpu.dot_dimension_numbers<[1], [0], [0], [1], [0, 0, 1, 1], [], []>} : vector<8x32xbf16>, vector<32x8xbf16>, vector<8x8xf32> -> vector<8x8xf32>
    %c1_359 = arith.constant 1 : index
    %c3_360 = arith.constant 3 : index
    %c0_361 = arith.constant 0 : index
    %c0_362 = arith.constant 0 : index
    %458 = vector.load %arg9[%c1_359, %c3_360, %c0_361, %c0_362] : memref<2x4x1x8xf32, #tpu.memory_space<vmem>>, vector<1x1x1x8xf32>
    %459 = vector.shape_cast %458 : vector<1x1x1x8xf32> to vector<1x8xf32>
    %460 = vector.broadcast %459 : vector<1x8xf32> to vector<8x8xf32>
    %461 = arith.addf %457, %460 : vector<8x8xf32>
    %462 = arith.truncf %447 : vector<8x8xf32> to vector<8x8xbf16>
    %463 = arith.truncf %454 : vector<8x8xf32> to vector<8x8xbf16>
    %cst_363 = arith.constant dense<0.000000e+00> : vector<8x8xf32>
    %464 = tpu.matmul %462, %463, %cst_363 {dimension_numbers = #tpu.dot_dimension_numbers<[1], [1], [0], [0], [0, 0, 1, 0], [], []>} : vector<8x8xbf16>, vector<8x8xbf16>, vector<8x8xf32> -> vector<8x8xf32>
    %cst_364 = arith.constant dense<0xFF800000> : vector<8xf32>
    %465 = vector.multi_reduction <maximumf>, %464, %cst_364 [1] : vector<8x8xf32> to vector<8xf32>
    %466 = vector.shape_cast %465 : vector<8xf32> to vector<8x1xf32>
    %467 = vector.broadcast %466 : vector<8x1xf32> to vector<8x8xf32>
    %468 = arith.subf %464, %467 : vector<8x8xf32>
    %469 = math.exp %468 : vector<8x8xf32>
    %cst_365 = arith.constant dense<0.000000e+00> : vector<8xf32>
    %470 = vector.multi_reduction <add>, %469, %cst_365 [1] : vector<8x8xf32> to vector<8xf32>
    %471 = vector.shape_cast %470 : vector<8xf32> to vector<8x1xf32>
    %472 = tpu.reciprocal %471 {approx = true} : vector<8x1xf32> -> vector<8x1xf32>
    %473 = vector.broadcast %472 : vector<8x1xf32> to vector<8x8xf32>
    %474 = arith.mulf %469, %473 : vector<8x8xf32>
    %c0_366 = arith.constant 0 : index
    %c7 = arith.constant 7 : index
    %c0_367 = arith.constant 0 : index
    %c0_368 = arith.constant 0 : index
    %475 = vector.load %arg19[%c0_366, %c7, %c0_367, %c0_368] : memref<1x8x8x8xf32, #tpu.memory_space<vmem>>, vector<1x1x8x8xf32>
    %476 = vector.shape_cast %475 : vector<1x1x8x8xf32> to vector<8x8xf32>
    %477 = vector.shape_cast %474 : vector<8x8xf32> to vector<1x1x8x8xf32>
    tpu.vector_store %arg19[%c0_366, %c7, %c0_367, %c0_368], %477 {strides = array<i32>} : memref<1x8x8x8xf32, #tpu.memory_space<vmem>>, vector<1x1x8x8xf32>,
    %478 = arith.truncf %474 : vector<8x8xf32> to vector<8x8xbf16>
    %479 = arith.truncf %461 : vector<8x8xf32> to vector<8x8xbf16>
    %cst_369 = arith.constant dense<0.000000e+00> : vector<8x8xf32>
    %480 = tpu.matmul %478, %479, %cst_369 {dimension_numbers = #tpu.dot_dimension_numbers<[1], [0], [0], [1], [0, 0, 1, 1], [], []>} : vector<8x8xbf16>, vector<8x8xbf16>, vector<8x8xf32> -> vector<8x8xf32>
    %481 = arith.truncf %480 : vector<8x8xf32> to vector<8x8xbf16>
    %c1_370 = arith.constant 1 : index
    %c3_371 = arith.constant 3 : index
    %c0_372 = arith.constant 0 : index
    %c0_373 = arith.constant 0 : index
    %482 = vector.load %arg10[%c1_370, %c3_371, %c0_372, %c0_373] : memref<2x4x8x32xbf16, #tpu.memory_space<vmem>>, vector<1x1x8x32xbf16>
    %483 = vector.shape_cast %482 : vector<1x1x8x32xbf16> to vector<8x32xbf16>
    %cst_374 = arith.constant dense<0.000000e+00> : vector<8x32xf32>
    %484 = tpu.matmul %481, %483, %cst_374 {dimension_numbers = #tpu.dot_dimension_numbers<[1], [0], [0], [1], [0, 0, 1, 1], [], []>} : vector<8x8xbf16>, vector<8x32xbf16>, vector<8x32xf32> -> vector<8x32xf32>
    %485 = arith.addf %438, %484 : vector<8x32xf32>
    %486 = arith.addf %271, %485 : vector<8x32xf32>
    %c1_375 = arith.constant 1 : index
    %c0_376 = arith.constant 0 : index
    %c0_377 = arith.constant 0 : index
    %487 = vector.load %arg11[%c1_375, %c0_376, %c0_377] : memref<2x1x32xf32, #tpu.memory_space<vmem>>, vector<1x1x32xf32>
    %488 = vector.shape_cast %487 : vector<1x1x32xf32> to vector<1x32xf32>
    %489 = vector.broadcast %488 : vector<1x32xf32> to vector<8x32xf32>
    %490 = arith.addf %486, %489 : vector<8x32xf32>
    %cst_378 = arith.constant dense<0.000000e+00> : vector<8xf32>
    %491 = vector.multi_reduction <add>, %490, %cst_378 [1] : vector<8x32xf32> to vector<8xf32>
    %492 = vector.shape_cast %491 : vector<8xf32> to vector<8x1xf32>
    %cst_379 = arith.constant 3.200000e+01 : f32
    %493 = vector.broadcast %cst_379 : f32 to vector<8x1xf32>
    %494 = arith.divf %492, %493 : vector<8x1xf32>
    %495 = vector.broadcast %494 : vector<8x1xf32> to vector<8x32xf32>
    %496 = arith.subf %490, %495 : vector<8x32xf32>
    %497 = arith.mulf %496, %496 : vector<8x32xf32>
    %cst_380 = arith.constant dense<0.000000e+00> : vector<8xf32>
    %498 = vector.multi_reduction <add>, %497, %cst_380 [1] : vector<8x32xf32> to vector<8xf32>
    %499 = vector.shape_cast %498 : vector<8xf32> to vector<8x1xf32>
    %cst_381 = arith.constant 3.200000e+01 : f32
    %500 = vector.broadcast %cst_381 : f32 to vector<8x1xf32>
    %501 = arith.divf %499, %500 : vector<8x1xf32>
    %502 = vector.broadcast %494 : vector<8x1xf32> to vector<8x32xf32>
    %503 = arith.subf %490, %502 : vector<8x32xf32>
    %cst_382 = arith.constant 9.99999974E-6 : f32
    %504 = vector.broadcast %cst_382 : f32 to vector<8x1xf32>
    %505 = arith.addf %501, %504 : vector<8x1xf32>
    %506 = math.rsqrt %505 : vector<8x1xf32>
    %507 = vector.broadcast %506 : vector<8x1xf32> to vector<8x32xf32>
    %508 = arith.mulf %503, %507 : vector<8x32xf32>
    %c1_383 = arith.constant 1 : index
    %c0_384 = arith.constant 0 : index
    %c0_385 = arith.constant 0 : index
    %509 = vector.load %arg12[%c1_383, %c0_384, %c0_385] : memref<2x1x32xf32, #tpu.memory_space<vmem>>, vector<1x1x32xf32>
    %510 = vector.shape_cast %509 : vector<1x1x32xf32> to vector<1x32xf32>
    %511 = vector.broadcast %510 : vector<1x32xf32> to vector<8x32xf32>
    %512 = arith.mulf %508, %511 : vector<8x32xf32>
    %c1_386 = arith.constant 1 : index
    %c0_387 = arith.constant 0 : index
    %c0_388 = arith.constant 0 : index
    %513 = vector.load %arg13[%c1_386, %c0_387, %c0_388] : memref<2x1x32xf32, #tpu.memory_space<vmem>>, vector<1x1x32xf32>
    %514 = vector.shape_cast %513 : vector<1x1x32xf32> to vector<1x32xf32>
    %515 = vector.broadcast %514 : vector<1x32xf32> to vector<8x32xf32>
    %516 = arith.addf %512, %515 : vector<8x32xf32>
    %517 = arith.truncf %516 : vector<8x32xf32> to vector<8x32xbf16>
    %c1_389 = arith.constant 1 : index
    %c0_390 = arith.constant 0 : index
    %c0_391 = arith.constant 0 : index
    %518 = vector.load %arg14[%c1_389, %c0_390, %c0_391] : memref<2x32x64xbf16, #tpu.memory_space<vmem>>, vector<1x32x64xbf16>
    %519 = vector.shape_cast %518 : vector<1x32x64xbf16> to vector<32x64xbf16>
    %cst_392 = arith.constant dense<0.000000e+00> : vector<8x64xf32>
    %520 = tpu.matmul %517, %519, %cst_392 {dimension_numbers = #tpu.dot_dimension_numbers<[1], [0], [0], [1], [0, 0, 1, 1], [], []>} : vector<8x32xbf16>, vector<32x64xbf16>, vector<8x64xf32> -> vector<8x64xf32>
    %c1_393 = arith.constant 1 : index
    %c0_394 = arith.constant 0 : index
    %c0_395 = arith.constant 0 : index
    %521 = vector.load %arg15[%c1_393, %c0_394, %c0_395] : memref<2x1x64xf32, #tpu.memory_space<vmem>>, vector<1x1x64xf32>
    %522 = vector.shape_cast %521 : vector<1x1x64xf32> to vector<1x64xf32>
    %523 = vector.broadcast %522 : vector<1x64xf32> to vector<8x64xf32>
    %524 = arith.addf %520, %523 : vector<8x64xf32>
    %cst_396 = arith.constant 5.000000e-01 : f32
    %525 = vector.broadcast %cst_396 : f32 to vector<8x64xf32>
    %526 = arith.mulf %525, %524 : vector<8x64xf32>
    %cst_397 = arith.constant 0.707106769 : f32
    %527 = vector.broadcast %cst_397 : f32 to vector<8x64xf32>
    %528 = arith.mulf %524, %527 : vector<8x64xf32>
    %529 = math.erf %528 : vector<8x64xf32>
    %cst_398 = arith.constant 1.000000e+00 : f32
    %530 = vector.broadcast %cst_398 : f32 to vector<8x64xf32>
    %531 = arith.addf %530, %529 : vector<8x64xf32>
    %532 = arith.mulf %526, %531 : vector<8x64xf32>
    %533 = arith.truncf %532 : vector<8x64xf32> to vector<8x64xbf16>
    %c1_399 = arith.constant 1 : index
    %c0_400 = arith.constant 0 : index
    %c0_401 = arith.constant 0 : index
    %534 = vector.load %arg16[%c1_399, %c0_400, %c0_401] : memref<2x64x32xbf16, #tpu.memory_space<vmem>>, vector<1x64x32xbf16>
    %535 = vector.shape_cast %534 : vector<1x64x32xbf16> to vector<64x32xbf16>
    %cst_402 = arith.constant dense<0.000000e+00> : vector<8x32xf32>
    %536 = tpu.matmul %533, %535, %cst_402 {dimension_numbers = #tpu.dot_dimension_numbers<[1], [0], [0], [1], [0, 0, 1, 1], [], []>} : vector<8x64xbf16>, vector<64x32xbf16>, vector<8x32xf32> -> vector<8x32xf32>
    %c1_403 = arith.constant 1 : index
    %c0_404 = arith.constant 0 : index
    %c0_405 = arith.constant 0 : index
    %537 = vector.load %arg17[%c1_403, %c0_404, %c0_405] : memref<2x1x32xf32, #tpu.memory_space<vmem>>, vector<1x1x32xf32>
    %538 = vector.shape_cast %537 : vector<1x1x32xf32> to vector<1x32xf32>
    %539 = vector.broadcast %538 : vector<1x32xf32> to vector<8x32xf32>
    %540 = arith.addf %536, %539 : vector<8x32xf32>
    %541 = arith.addf %490, %540 : vector<8x32xf32>
    %c0_406 = arith.constant 0 : index
    %c0_407 = arith.constant 0 : index
    %c0_408 = arith.constant 0 : index
    %542 = vector.load %arg18[%c0_406, %c0_407, %c0_408] : memref<1x8x32xf32, #tpu.memory_space<vmem>>, vector<1x8x32xf32>
    %543 = vector.shape_cast %542 : vector<1x8x32xf32> to vector<8x32xf32>
    %544 = vector.shape_cast %541 : vector<8x32xf32> to vector<1x8x32xf32>
    tpu.vector_store %arg18[%c0_406, %c0_407, %c0_408], %544 {strides = array<i32>} : memref<1x8x32xf32, #tpu.memory_space<vmem>>, vector<1x8x32xf32>,
    return
  }
  func.func @transform_0(%arg0: i32) -> (i32, i32, i32) {
    %c0_i32 = arith.constant 0 : i32
    %c0_i32_0 = arith.constant 0 : i32
    %c0_i32_1 = arith.constant 0 : i32
    return %arg0, %c0_i32, %c0_i32_0 : i32, i32, i32
  }
  func.func @transform_1(%arg0: i32) -> (i32, i32, i32) {
    %c0_i32 = arith.constant 0 : i32
    %c0_i32_0 = arith.constant 0 : i32
    %c0_i32_1 = arith.constant 0 : i32
    %c0_i32_2 = arith.constant 0 : i32
    return %c0_i32, %c0_i32_0, %c0_i32_1 : i32, i32, i32
  }
  func.func @transform_2(%arg0: i32) -> (i32, i32, i32) {
    %c0_i32 = arith.constant 0 : i32
    %c0_i32_0 = arith.constant 0 : i32
    %c0_i32_1 = arith.constant 0 : i32
    %c0_i32_2 = arith.constant 0 : i32
    return %c0_i32, %c0_i32_0, %c0_i32_1 : i32, i32, i32
  }
  func.func @transform_3(%arg0: i32) -> (i32, i32, i32, i32) {
    %c0_i32 = arith.constant 0 : i32
    %c0_i32_0 = arith.constant 0 : i32
    %c0_i32_1 = arith.constant 0 : i32
    %c0_i32_2 = arith.constant 0 : i32
    %c0_i32_3 = arith.constant 0 : i32
    return %c0_i32, %c0_i32_0, %c0_i32_1, %c0_i32_2 : i32, i32, i32, i32
  }
  func.func @transform_4(%arg0: i32) -> (i32, i32, i32, i32) {
    %c0_i32 = arith.constant 0 : i32
    %c0_i32_0 = arith.constant 0 : i32
    %c0_i32_1 = arith.constant 0 : i32
    %c0_i32_2 = arith.constant 0 : i32
    %c0_i32_3 = arith.constant 0 : i32
    return %c0_i32, %c0_i32_0, %c0_i32_1, %c0_i32_2 : i32, i32, i32, i32
  }
  func.func @transform_5(%arg0: i32) -> (i32, i32, i32, i32) {
    %c0_i32 = arith.constant 0 : i32
    %c0_i32_0 = arith.constant 0 : i32
    %c0_i32_1 = arith.constant 0 : i32
    %c0_i32_2 = arith.constant 0 : i32
    %c0_i32_3 = arith.constant 0 : i32
    return %c0_i32, %c0_i32_0, %c0_i32_1, %c0_i32_2 : i32, i32, i32, i32
  }
  func.func @transform_6(%arg0: i32) -> (i32, i32, i32, i32) {
    %c0_i32 = arith.constant 0 : i32
    %c0_i32_0 = arith.constant 0 : i32
    %c0_i32_1 = arith.constant 0 : i32
    %c0_i32_2 = arith.constant 0 : i32
    %c0_i32_3 = arith.constant 0 : i32
    return %c0_i32, %c0_i32_0, %c0_i32_1, %c0_i32_2 : i32, i32, i32, i32
  }
  func.func @transform_7(%arg0: i32) -> (i32, i32, i32, i32) {
    %c0_i32 = arith.constant 0 : i32
    %c0_i32_0 = arith.constant 0 : i32
    %c0_i32_1 = arith.constant 0 : i32
    %c0_i32_2 = arith.constant 0 : i32
    %c0_i32_3 = arith.constant 0 : i32
    return %c0_i32, %c0_i32_0, %c0_i32_1, %c0_i32_2 : i32, i32, i32, i32
  }
  func.func @transform_8(%arg0: i32) -> (i32, i32, i32, i32) {
    %c0_i32 = arith.constant 0 : i32
    %c0_i32_0 = arith.constant 0 : i32
    %c0_i32_1 = arith.constant 0 : i32
    %c0_i32_2 = arith.constant 0 : i32
    %c0_i32_3 = arith.constant 0 : i32
    return %c0_i32, %c0_i32_0, %c0_i32_1, %c0_i32_2 : i32, i32, i32, i32
  }
  func.func @transform_9(%arg0: i32) -> (i32, i32, i32, i32) {
    %c0_i32 = arith.constant 0 : i32
    %c0_i32_0 = arith.constant 0 : i32
    %c0_i32_1 = arith.constant 0 : i32
    %c0_i32_2 = arith.constant 0 : i32
    %c0_i32_3 = arith.constant 0 : i32
    return %c0_i32, %c0_i32_0, %c0_i32_1, %c0_i32_2 : i32, i32, i32, i32
  }
  func.func @transform_10(%arg0: i32) -> (i32, i32, i32) {
    %c0_i32 = arith.constant 0 : i32
    %c0_i32_0 = arith.constant 0 : i32
    %c0_i32_1 = arith.constant 0 : i32
    %c0_i32_2 = arith.constant 0 : i32
    return %c0_i32, %c0_i32_0, %c0_i32_1 : i32, i32, i32
  }
  func.func @transform_11(%arg0: i32) -> (i32, i32, i32) {
    %c0_i32 = arith.constant 0 : i32
    %c0_i32_0 = arith.constant 0 : i32
    %c0_i32_1 = arith.constant 0 : i32
    %c0_i32_2 = arith.constant 0 : i32
    return %c0_i32, %c0_i32_0, %c0_i32_1 : i32, i32, i32
  }
  func.func @transform_12(%arg0: i32) -> (i32, i32, i32) {
    %c0_i32 = arith.constant 0 : i32
    %c0_i32_0 = arith.constant 0 : i32
    %c0_i32_1 = arith.constant 0 : i32
    %c0_i32_2 = arith.constant 0 : i32
    return %c0_i32, %c0_i32_0, %c0_i32_1 : i32, i32, i32
  }
  func.func @transform_13(%arg0: i32) -> (i32, i32, i32) {
    %c0_i32 = arith.constant 0 : i32
    %c0_i32_0 = arith.constant 0 : i32
    %c0_i32_1 = arith.constant 0 : i32
    %c0_i32_2 = arith.constant 0 : i32
    return %c0_i32, %c0_i32_0, %c0_i32_1 : i32, i32, i32
  }
  func.func @transform_14(%arg0: i32) -> (i32, i32, i32) {
    %c0_i32 = arith.constant 0 : i32
    %c0_i32_0 = arith.constant 0 : i32
    %c0_i32_1 = arith.constant 0 : i32
    %c0_i32_2 = arith.constant 0 : i32
    return %c0_i32, %c0_i32_0, %c0_i32_1 : i32, i32, i32
  }
  func.func @transform_15(%arg0: i32) -> (i32, i32, i32) {
    %c0_i32 = arith.constant 0 : i32
    %c0_i32_0 = arith.constant 0 : i32
    %c0_i32_1 = arith.constant 0 : i32
    %c0_i32_2 = arith.constant 0 : i32
    return %c0_i32, %c0_i32_0, %c0_i32_1 : i32, i32, i32
  }
  func.func @transform_16(%arg0: i32) -> (i32, i32, i32) {
    %c0_i32 = arith.constant 0 : i32
    %c0_i32_0 = arith.constant 0 : i32
    %c0_i32_1 = arith.constant 0 : i32
    %c0_i32_2 = arith.constant 0 : i32
    return %c0_i32, %c0_i32_0, %c0_i32_1 : i32, i32, i32
  }
  func.func @transform_17(%arg0: i32) -> (i32, i32, i32) {
    %c0_i32 = arith.constant 0 : i32
    %c0_i32_0 = arith.constant 0 : i32
    %c0_i32_1 = arith.constant 0 : i32
    return %arg0, %c0_i32, %c0_i32_0 : i32, i32, i32
  }
  func.func @transform_18(%arg0: i32) -> (i32, i32, i32, i32) {
    %c0_i32 = arith.constant 0 : i32
    %c0_i32_0 = arith.constant 0 : i32
    %c0_i32_1 = arith.constant 0 : i32
    %c0_i32_2 = arith.constant 0 : i32
    return %arg0, %c0_i32, %c0_i32_0, %c0_i32_1 : i32, i32, i32, i32
  }
}

</mosaic_0001>

<bundles_post_ra>
// kernel: tpu_custom_call.1
= control target key start
LH: loop header
LB: loop body
LE: loop exit
PB: predicated region body
PF: predicated region fallthrough
CT: control target
= control target key end

     0   :  { %s5983_s0 = inlined_call_operand.vmem [shape: f32[2,8,32], index: 0, kind: input, shape index: {}]   ;;  %s5984_s1 = inlined_call_operand.vmem [shape: f32[2,1,32], index: 1, kind: input, shape index: {}]   ;;  %s5985_s2 = inlined_call_operand.vmem [shape: f32[2,1,32], index: 2, kind: input, shape index: {}]   ;;  %s5986_s3 = inlined_call_operand.vmem [shape: bf16[2,4,32,8], index: 3, kind: input, shape index: {}]   ;;  %s5987_s4 = inlined_call_operand.vmem [shape: f32[2,4,1,8], index: 4, kind: input, shape index: {}]   ;;  %s5988_s5 = inlined_call_operand.vmem [shape: bf16[2,4,32,8], index: 5, kind: input, shape index: {}]   ;;  %s5989_s6 = inlined_call_operand.vmem [shape: f32[2,4,1,8], index: 6, kind: input, shape index: {}]   ;;  %s5990_s7 = inlined_call_operand.vmem [shape: bf16[2,4,32,8], index: 7, kind: input, shape index: {}]   ;;  %s5991_s8 = inlined_call_operand.vmem [shape: f32[2,4,1,8], index: 8, kind: input, shape index: {}]   ;;  %s5992_s9 = inlined_call_operand.vmem [shape: bf16[2,4,8,32], index: 9, kind: input, shape index: {}]   ;;  %s5993_s10 = inlined_call_operand.vmem [shape: f32[2,1,32], index: 10, kind: input, shape index: {}]   ;;  %s5994_s11 = inlined_call_operand.vmem [shape: f32[2,1,32], index: 11, kind: input, shape index: {}]   ;;  %s5995_s12 = inlined_call_operand.vmem [shape: f32[2,1,32], index: 12, kind: input, shape index: {}]   ;;  %s5996_s13 = inlined_call_operand.vmem [shape: bf16[2,32,64], index: 13, kind: input, shape index: {}]   ;;  %s5997_s14 = inlined_call_operand.vmem [shape: f32[2,1,64], index: 14, kind: input, shape index: {}]   ;;  %s5998_s15 = inlined_call_operand.vmem [shape: bf16[2,64,32], index: 15, kind: input, shape index: {}]   ;;  %s5999_s16 = inlined_call_operand.vmem [shape: f32[2,1,32], index: 16, kind: input, shape index: {}]   ;;  %s6000_s17 = inlined_call_operand.hbm [shape: f32[2,8,32], index: 17, kind: output, shape index: {0}]   ;;  %s6001_s18 = inlined_call_operand.hbm [shape: f32[2,8,8,8], index: 18, kind: output, shape index: {1}]  }
   0x1   :  { %6010 = sst [smem:[#allocation14_spill]] %s5983_s0 }
   0x2   :  { %6011 = sst [smem:[#allocation15_spill]] %s5984_s1 }
   0x3   :  { %6012 = sst [smem:[#allocation16_spill]] %s5985_s2 }
   0x4   :  { %6013 = sst [smem:[#allocation17_spill]] %s5986_s3 }
   0x5   :  { %6014 = sst [smem:[#allocation18_spill]] %s5987_s4 }
   0x6   :  { %6015 = sst [smem:[#allocation19_spill]] %s5988_s5 }
   0x7   :  { %6016 = sst [smem:[#allocation20_spill]] %s5989_s6 }
   0x8   :  { %6017 = sst [smem:[#allocation21_spill]] %s5990_s7 }
   0x9   :  { %24 = vsyncpa [#allocation3], 0 }
   0xa   :  { %26 = vsyncpa [#allocation3 + $0x1], 0 }
   0xb   :  { %27 = vsyncpa [#allocation5], 0 }
   0xc   :  { %29 = vsyncpa [#allocation5 + $0x1], 0  ;;  %s5167_s27 = smov 0   ;;  %s5169_s28 = smov 0  }
   0xd   :  { %s5171_s29 = smov 0   ;;  %s5173_s30 = smov 0  }
   0xe LB: > { %6018 = sst [smem:[#allocation8_spill]] %s5052_s27  ;;  %s5188_s0 = sadd.s32 4294967295, %s5064_s30   ;;  %s5064_s30 = sphi %s5173_s30, %s6037_s30   ;;  %s5060_s29 = sphi %s5171_s29, %s6040_s29   ;;  %s5056_s28 = sphi %s5169_s28, %s6039_s28   ;;  %s5052_s27 = sphi %s5167_s27, %s6038_s27  }
   0xf   : > { %6019 = sst [smem:[#allocation9_spill]] %s5056_s28  ;;  %s4007_s19 = sadd.s32 4294967294, %s5064_s30  }
  0x10   : > { %6020 = sst [smem:[#allocation10_spill]] %s5060_s29  ;;  %s5192_s1 = sadd.s32 1, %s5064_s30  }
  0x11   : > { %6021 = sst [smem:[#allocation11_spill]] %s5192_s1  ;;  %s404_s20 = sadd.s32 1, %s5060_s29 }
  0x12   : > { %s401_s21 = ssub.s32 %s5064_s30, %s5192_s1  ;;  %p414_p0 = scmp.ne.s32.totalorder %s5060_s29, %s5056_s28 }
  0x13   : > { %p402_p1 = scmp.eq.s32.totalorder %s401_s21, 0  ;;  %p415_p2 = scmp.eq.s32.totalorder %s5188_s0, 1 }
  0x14   : > { %p420_p3 = scmp.ne.s32.totalorder %s5056_s28, %s5052_s27  ;;  %p421_p4 = scmp.eq.s32.totalorder %s4007_s19, 1 }
  0x15   : > { %s5203_s22 = scalar_select %p402_p1, %s5060_s29, %s404_s20  }
  0x16   : > { %p5205_p5 = por %p415_p2, %p414_p0  ;;  %p5209_p6 = por %p421_p4, %p420_p3 }
  0x17   : > { %6022 = sst [smem:[#allocation12_spill]] %s5203_s22  ;;  %p4010_p7 = scmp.ge.s32.totalorder %s5064_s30, 1 }
  0x18   : > { %s6024_s23 = scalar_select %p5209_p6, 1, 0 }
  0x19   : > { %p520_p8 = scmp.lt.s32.totalorder %s5064_s30, 3 }
  0x1a   : > { %6025 = sst [smem:[#allocation13_spill]] %s6024_s23 }
  0x1b   : > { %p521_p9 = pnand %p4010_p7, %p520_p8 }
  0x1c   : > { %p578_p10 = scmp.lt.s32.totalorder (!%p521_p9), %s5188_s0, 1  ;;  %s6026_s20 = sld [smem:[#allocation14_spill]] (!%p521_p9) }
  0x1d   : > { %524 = sbr.rel (%p521_p9) target bundleno = 9437 (0x24dd), region = 88  ;;  %s6027_s3 = sld [smem:[#allocation17_spill]] (!%p521_p9) }
  0x1e   : > { %s6028_s7 = sld [smem:[#allocation21_spill]] (!%p521_p9)  ;;  %s4309_s29 = sshll.u32 (!%p521_p9), %s5188_s0, 10 }
  0x1f   : > { %s6030_s22 = sld [smem:[#allocation16_spill]] (!%p521_p9)  ;;  %s5906_s27 = scalar_lea.hbm (!%p521_p9), %s6001_s18, %s4309_s29 }
  0x20   : > { %s6031_s5 = sld [smem:[#allocation19_spill]] (!%p521_p9) }
  0x21   : > { %s6032_s6 = sld [smem:[#allocation20_spill]] (!%p521_p9) }
  0x22   : > { %s579_s24 = scalar_select %p578_p10, %s5188_s0, 1  ;;  %vm584_vm0 = vcmask 261120   ;;  %v5066_v9 = vmov 0.0   ;;  %vm5067_vm1 = vmmov 0   ;;  %v4024_v24 = vld [vmem:[%s5991_s8] ss:$0 sm:$0xff] }
  0x23   : > { %v4870_v7 = vld [vmem:[%s6027_s3 + $0x8] sm:$0xff]   ;;  %4446 = vmatprep.subr.bf16.mxu1 %v5066_v9  ;;  %4462 = vmatprep.subr.bf16.mxu0 %v5066_v9  ;;  %v4872_v10 = vld [vmem:[%s6027_s3] sm:$0xff]   ;;  %vm875_vm2 = vcmask 1043456   ;;  %s6033_s4 = sld [smem:[#allocation18_spill]]  ;;  %vm811_vm3 = vcmask 64512   ;;  %v4876_v47 = vld [vmem:[%s6027_s3 + $0x18] sm:$0xff]  }
  0x24   : > { %s4013_s25 = sshll.u32 %s579_s24, 3  ;;  %v4871_v8 = vld [vmem:[%s6028_s7 + $0x8] sm:$0xff]   ;;  %4447 = vmatpush3.bf16.msra.mxu1 %v4870_v7  ;;  %v4873_v11 = vld [vmem:[%s6028_s7] sm:$0xff]   ;;  %4450 = vmatprep.mubr.msk.bf16.mxu1 %vm5067_vm1, %v5066_v9  ;;  %v4877_v49 = vld [vmem:[%s6027_s3 + $0x10] sm:$0xff]   ;;  %s5324_s24 = sand.u32 1, %s5056_s28   ;;  %vm2181_vm4 = vcmask 523264  }
  0x25   : > { %s581_s21 = scalar_lea.vmem %s6026_s20, %s4013_s25  ;;  %4463 = vmatpush3.bf16.msra.mxu0 %v4871_v8  ;;  %4448 = vmatprep.subr.bf16.mxu1 %v5066_v9  ;;  %s6029_s25 = sld [smem:[#allocation15_spill]]  ;;  %v4015_v18 = vld [vmem:[%s6030_s22] ss:$0 sm:$0xff]  ;;  %v4878_v50 = vld [vmem:[%s6028_s7 + $0x18] sm:$0xff]   ;;  %v4879_v51 = vld [vmem:[%s6028_s7 + $0x10] sm:$0xff]  }
  0x26   : > { %v5220_v0 = vld [vmem:[%s581_s21] sm:$0xff]  ;;  %4464 = vmatprep.subr.bf16.mxu0 %v5066_v9  ;;  %4466 = vmatprep.mubr.msk.bf16.mxu0 %vm5067_vm1, %v5066_v9  ;;  %v4874_v21 = vld [vmem:[%s6031_s5 + $0x8] sm:$0xff]   ;;  %s4012_s26 = sshll.u32 %s5324_s24, 6  ;;  %s5068_s28 = smov [#allocation4]  }
  0x27   : > { %v585_v1 = vsel %vm584_vm0, %v5220_v0, 0.0  ;;  %v4875_v23 = vld [vmem:[%s6031_s5] sm:$0xff]   ;;  %s5330_s20 = scalar_lea.vmem [#allocation4], %s4012_s26 }
  0x28   : > { %586 = vadd.xlane.f32.xlu0 %v585_v1  ;;  %4449 = vmatpush3.bf16.msra.mxu1 %v4872_v10  ;;  %v4020_v36 = vld [vmem:[%s6032_s6] ss:$0 sm:$0xff]  ;;  %v4053_v61 = vld [vmem:[%s5991_s8 + $0x1] ss:$0 sm:$0xff]  ;;  %s3913_s26 = sshll.u32 %s5330_s20, 4  ;;  %s5901_s26 = int_to_ptr.vmem [resolvable:$true] %s3913_s26 }
  0x29   : > { %4465 = vmatpush3.bf16.msra.mxu0 %v4873_v11  ;;  %4454 = vmatprep.subr.bf16.mxu1 %v5066_v9  ;;  %v4016_v37 = vld [vmem:[%s6033_s4] ss:$0 sm:$0xff]  ;;  %s4974_s23 = scalar_lea.vmem %s5901_s26, 1024 }
  0x2a   : > { %4476 = vmatprep.subr.bf16.mxu0 %v5066_v9  ;;  %p4975_p11 = scmp.ne.s32.totalorder %s5901_s26, %s4974_s23 }
  0x2b   : > { %v4014_v16 = vld [vmem:[%s6029_s25] ss:$0 sm:$0xff] }
  0x2c   : > { %p4976_p12 = pnand %p4975_p11, %p5205_p5 }
  0x2e   : > { %p4977_p13 = pneg %p4976_p12 }
  0xb1   : > { %v587_v2 = vpop.xlane.xlu0 %586 }
  0xb2   : > { %v589_v3 = vmul.f32 0.03125, %v587_v2 }
  0xb4   : > { %v590_v4 = vsub.f32 %v5220_v0, %v589_v3 }
  0xb6   : > { %v591_v5 = vmul.f32 %v590_v4, %v590_v4 }
  0xb8   : > { %v592_v6 = vsel %vm584_vm0, %v591_v5, 0.0 }
  0xb9   : > { %593 = vadd.xlane.f32.xlu0 %v592_v6 }
 0x142   : > { %v594_v12 = vpop.xlane.xlu0 %593 }
 0x143   : > { %v595_v13 = vmul.f32 0.03125, %v594_v12 }
 0x145   : > { %v596_v14 = vadd.f32 1e-05, %v595_v13 }
 0x147   : > { %4930 = vrsqrt.f32 %v596_v14 }
 0x154   : > { %v4931_v15 = vpop.eup %4930 }
 0x155   : > { %v598_v17 = vmul.f32 %v4931_v15, %v590_v4  ;;  %v4880_v15 = vld [vmem:[%s6031_s5 + $0x18] sm:$0xff]  }
 0x157   : > { %v606_v19 = vmul.f32 %v4014_v16, %v598_v17  ;;  %v4881_v17 = vld [vmem:[%s6031_s5 + $0x10] sm:$0xff]  }
 0x159   : > { %v614_v20 = vadd.f32 %v4015_v18, %v606_v19 }
 0x15b   : > { %v5257_v22 = vpack.c.bf16 %v614_v20, %v614_v20 }
 0x15d   : > { %4451 = vmatmul.mubr.msk.bf16.vlgmr.msra.gmra.mxu1 %vm584_vm0, %v5257_v22  ;;  %4467 = vmatmul.mubr.msk.bf16.vlgmr.msra.gmra.mxu0 %vm584_vm0, %v5257_v22 }
 0x15e   : > { %4455 = vmatpush3.bf16.msra.mxu1 %v4874_v21  ;;  %4458 = vmatprep.mubr.msk.bf16.mxu1 %vm5067_vm1, %v5066_v9 }
 0x15f   : > { %4456 = vmatprep.subr.bf16.mxu1 %v5066_v9  ;;  %4478 = vmatprep.mubr.msk.bf16.mxu0 %vm5067_vm1, %v5066_v9 }
 0x162   : > { %4457 = vmatpush3.bf16.msra.mxu1 %v4875_v23  ;;  %v4044_v23 = vld [vmem:[%s6032_s6 + $0x1] ss:$0 sm:$0xff] }
 0x163   : > { %4470 = vmatprep.subr.bf16.mxu1 %v5066_v9 }
 0x165   : > { %4459 = vmatmul.mubr.msk.bf16.vlgmr.msra.gmra.mxu1 %vm584_vm0, %v5257_v22 }
 0x166   : > { %4472 = vmatprep.mubr.msk.bf16.mxu1 %vm5067_vm1, %v5066_v9 }
 0x21d   : > { %v676_v25 = vpop.f32.mrf.mxu1  ;;  %v803_v26 = vpop.f32.mrf.mxu0 }
 0x21e   : > { %v804_v27 = vadd.f32 %v4024_v24, %v803_v26  ;;  %v677_v41 = vadd.f32 %v4016_v37, %v676_v25  ;;  %v4035_v24 = vld [vmem:[%s6033_s4 + $0x1] ss:$0 sm:$0xff] }
 0x21f   : > { %v4452_v28 = vpop.f32.mrf.mxu1  ;;  %v4468_v29 = vpop.f32.mrf.mxu0 }
 0x220   : > { %v871_v30 = vpack.c.bf16 %v804_v27, %v804_v27  ;;  %v682_v46 = vmul.f32 0.35355338, %v677_v41 }
 0x221   : > { %v679_v31 = vpop.f32.mrf.mxu1  ;;  %v806_v32 = vpop.f32.mrf.mxu0 }
 0x222   : > { %v877_v33 = vsel %vm875_vm2, %v871_v30, 0  ;;  %v809_v48 = vpack.c.bf16 %v682_v46, %v682_v46 }
 0x223   : > { %v4453_v34 = vpop.f32.mrf.mxu1  ;;  %v4469_v35 = vpop.f32.mrf.mxu0  ;;  %4477 = vmatpush3.bf16.msra.mxu0 %v877_v33 }
 0x224   : > { %4490 = vmatprep.subr.bf16.mxu0 %v5066_v9 }
 0x225   : > { %v740_v38 = vpop.f32.mrf.mxu1 }
 0x226   : > { %v741_v39 = vadd.f32 %v4020_v36, %v740_v38 }
 0x227   : > { %v4460_v40 = vpop.f32.mrf.mxu1 }
 0x228   : > { %v810_v42 = vpack.c.bf16 %v741_v39, %v741_v39 }
 0x229   : > { %v743_v43 = vpop.f32.mrf.mxu1 }
 0x22a   : > { %v816_v44 = vsel %vm811_vm3, %v810_v42, 0 }
 0x22b   : > { %v4461_v45 = vpop.f32.mrf.mxu1  ;;  %4471 = vmatpush3.bf16.xpose.msra.mxu1 %v816_v44 }
 0x22c   : > { %4482 = vmatprep.subr.bf16.mxu1 %v5066_v9  ;;  %v4060_v45 = vld [vmem:[%s5992_s9 + $0x4] sm:$0xf] }
 0x22d   : > { %v1233_v46 = vsel %vm875_vm2, %v4060_v45, 0 }
 0x232   : > { %4473 = vmatmul.mubr.msk.bf16.vlgmr.msra.gmra.mxu1 %vm811_vm3, %v809_v48 }
 0x233   : > { %4483 = vmatpush3.bf16.msra.mxu1 %v4876_v47  ;;  %4486 = vmatprep.mubr.msk.bf16.mxu1 %vm5067_vm1, %v5066_v9 }
 0x234   : > { %4484 = vmatprep.subr.bf16.mxu1 %v5066_v9 }
 0x237   : > { %4485 = vmatpush3.bf16.msra.mxu1 %v4877_v49  ;;  %v920_v49 = vld [vmem:[%s5992_s9] sm:$0xf] }
 0x238   : > { %4498 = vmatprep.subr.bf16.mxu1 %v5066_v9 }
 0x23a   : > { %4487 = vmatmul.mubr.msk.bf16.vlgmr.msra.gmra.mxu1 %vm584_vm0, %v5257_v22 }
 0x23b   : > { %4499 = vmatpush3.bf16.msra.mxu1 %v4878_v50  ;;  %4502 = vmatprep.mubr.msk.bf16.mxu1 %vm5067_vm1, %v5066_v9 }
 0x23c   : > { %4500 = vmatprep.subr.bf16.mxu1 %v5066_v9 }
 0x23f   : > { %4501 = vmatpush3.bf16.msra.mxu1 %v4879_v51 }
 0x240   : > { %4512 = vmatprep.subr.bf16.mxu1 %v5066_v9 }
 0x242   : > { %4503 = vmatmul.mubr.msk.bf16.vlgmr.msra.gmra.mxu1 %vm584_vm0, %v5257_v22 }
 0x243   : > { %4514 = vmatprep.mubr.msk.bf16.mxu1 %vm5067_vm1, %v5066_v9 }
 0x2f2   : > { %v852_v52 = vpop.f32.mrf.mxu1 }
 0x2f3   : > { %v858_v53 = vsel %vm811_vm3, %v852_v52, -inf }
 0x2f4   : > { %859 = vmax.xlane.f32.xlu1 %v858_v53  ;;  %v4474_v54 = vpop.f32.mrf.mxu1  ;;  %v4882_v53 = vld [vmem:[%s6031_s5 + $0x28] sm:$0xff]  }
 0x2f6   : > { %v855_v55 = vpop.f32.mrf.mxu1 }
 0x2f7   : > { %v4883_v55 = vld [vmem:[%s6031_s5 + $0x20] sm:$0xff]  }
 0x2f8   : > { %v4475_v56 = vpop.f32.mrf.mxu1 }
 0x2fa   : > { %v980_v57 = vpop.f32.mrf.mxu1 }
 0x2fb   : > { %v981_v28 = vadd.f32 %v4035_v24, %v980_v57  ;;  %v4884_v57 = vld [vmem:[%s6027_s3 + $0x28] sm:$0xff]  }
 0x2fc   : > { %v4488_v58 = vpop.f32.mrf.mxu1 }
 0x2fd   : > { %v986_v33 = vmul.f32 0.35355338, %v981_v28  ;;  %v4086_v28 = vld [vmem:[%s5991_s8 + $0x2] ss:$0 sm:$0xff] }
 0x2fe   : > { %v983_v59 = vpop.f32.mrf.mxu1 }
 0x2ff   : > { %v1117_v34 = vpack.c.bf16 %v986_v33, %v986_v33 }
 0x300   : > { %v4489_v60 = vpop.f32.mrf.mxu1 }
 0x302   : > { %v1111_v62 = vpop.f32.mrf.mxu1 }
 0x303   : > { %v1112_v63 = vadd.f32 %v4053_v61, %v1111_v62  ;;  %v4885_v61 = vld [vmem:[%s6027_s3 + $0x20] sm:$0xff]  }
 0x304   : > { %v4504_v1 = vpop.f32.mrf.mxu1 }
 0x305   : > { %v1179_v2 = vpack.c.bf16 %v1112_v63, %v1112_v63  ;;  %v4886_v1 = vld [vmem:[%s6028_s7 + $0x28] sm:$0xff]  }
 0x306   : > { %v1114_v3 = vpop.f32.mrf.mxu1 }
 0x307   : > { %v1184_v4 = vsel %vm875_vm2, %v1179_v2, 0 }
 0x308   : > { %v4505_v5 = vpop.f32.mrf.mxu1  ;;  %4513 = vmatpush3.bf16.msra.mxu1 %v1184_v4  ;;  %v4887_v4 = vld [vmem:[%s6028_s7 + $0x20] sm:$0xff]  }
 0x309   : > { %4524 = vmatprep.subr.bf16.mxu1 %v5066_v9 }
 0x37d   : > { %v860_v6 = vpop.xlane.xlu1 %859 }
 0x37e   : > { %v861_v7 = vsub.f32 %v852_v52, %v860_v6  ;;  %v1279_v52 = vsel %vm875_vm2, %v920_v49, 0  ;;  %v4077_v6 = vld [vmem:[%s6032_s6 + $0x2] ss:$0 sm:$0xff] }
 0x380   : > { %v862_v8 = vmul.f32 1.442695, %v861_v7 }
 0x382   : > { %4932 = vpow2.f32 %v862_v8 }
 0x38f   : > { %v4933_v10 = vpop.eup %4932 }
 0x390   : > { %v864_v11 = vsel %vm811_vm3, %v4933_v10, 0.0 }
 0x391   : > { %865 = vadd.xlane.f32.xlu1 %v864_v11 }
 0x41a   : > { %v866_v12 = vpop.xlane.xlu1 %865 }
 0x41b   : > { %4934 = vrcp.f32 %v866_v12 }
 0x428   : > { %v4935_v13 = vpop.eup %4934 }
 0x429   : > { %v868_v14 = vmul.f32 %v4935_v13, %v4933_v10 }
 0x42b   : > { %v870_v16 = vpack.c.bf16 %v868_v14, %v868_v14  ;;  %869 = vst.msk [vmem:[%s5330_s20] sm:$0xff] %vm811_vm3, %v868_v14 }
 0x42d   : > { %4479 = vmatmul.mubr.msk.bf16.vlgmr.msra.gmra.mxu0 %vm811_vm3, %v870_v16 }
 0x42e   : > { %4491 = vmatpush3.bf16.msra.mxu0 %v4880_v15  ;;  %4494 = vmatprep.mubr.msk.bf16.mxu0 %vm5067_vm1, %v5066_v9 }
 0x42f   : > { %4492 = vmatprep.subr.bf16.mxu0 %v5066_v9 }
 0x432   : > { %4493 = vmatpush3.bf16.msra.mxu0 %v4881_v17 }
 0x433   : > { %4506 = vmatprep.subr.bf16.mxu0 %v5066_v9 }
 0x435   : > { %4495 = vmatmul.mubr.msk.bf16.vlgmr.msra.gmra.mxu0 %vm584_vm0, %v5257_v22 }
 0x436   : > { %4508 = vmatprep.mubr.msk.bf16.mxu0 %vm5067_vm1, %v5066_v9 }
 0x4ed   : > { %v913_v18 = vpop.f32.mrf.mxu0 }
 0x4ee   : > { %v919_v54 = vpack.c.bf16 %v913_v18, %v913_v18 }
 0x4ef   : > { %v4480_v19 = vpop.f32.mrf.mxu0 }
 0x4f0   : > { %v4068_v19 = vld [vmem:[%s6033_s4 + $0x2] ss:$0 sm:$0xff] }
 0x4f1   : > { %v916_v20 = vpop.f32.mrf.mxu0 }
 0x4f3   : > { %v4481_v21 = vpop.f32.mrf.mxu0 }
 0x4f5   : > { %v1046_v25 = vpop.f32.mrf.mxu0 }
 0x4f6   : > { %v1047_v26 = vadd.f32 %v4044_v23, %v1046_v25 }
 0x4f7   : > { %v4496_v27 = vpop.f32.mrf.mxu0 }
 0x4f8   : > { %v1118_v29 = vpack.c.bf16 %v1047_v26, %v1047_v26 }
 0x4f9   : > { %v1049_v30 = vpop.f32.mrf.mxu0 }
 0x4fa   : > { %v1123_v31 = vsel %vm811_vm3, %v1118_v29, 0 }
 0x4fb   : > { %v4497_v32 = vpop.f32.mrf.mxu0  ;;  %4507 = vmatpush3.bf16.xpose.msra.mxu0 %v1123_v31 }
 0x4fc   : > { %4518 = vmatprep.subr.bf16.mxu0 %v5066_v9 }
 0x502   : > { %4509 = vmatmul.mubr.msk.bf16.vlgmr.msra.gmra.mxu0 %vm811_vm3, %v1117_v34 }
 0x503   : > { %4520 = vmatprep.mubr.msk.bf16.mxu0 %vm5067_vm1, %v5066_v9  ;;  %4519 = vmatpush3.bf16.msra.mxu0 %v1233_v46  ;;  %v4093_v46 = vld [vmem:[%s5992_s9 + $0x8] sm:$0xf] }
 0x504   : > { %4530 = vmatprep.subr.bf16.mxu0 %v5066_v9 }
 0x5c2   : > { %v1159_v35 = vpop.f32.mrf.mxu0 }
 0x5c3   : > { %v1165_v36 = vsel %vm811_vm3, %v1159_v35, -inf }
 0x5c4   : > { %1166 = vmax.xlane.f32.xlu0 %v1165_v36  ;;  %v4510_v37 = vpop.f32.mrf.mxu0 }
 0x5c6   : > { %v1162_v38 = vpop.f32.mrf.mxu0 }
 0x5c8   : > { %v4511_v39 = vpop.f32.mrf.mxu0 }
 0x64d   : > { %v1167_v40 = vpop.xlane.xlu0 %1166 }
 0x64e   : > { %v1168_v41 = vsub.f32 %v1159_v35, %v1167_v40 }
 0x650   : > { %v1169_v42 = vmul.f32 1.442695, %v1168_v41 }
 0x652   : > { %4936 = vpow2.f32 %v1169_v42 }
 0x65f   : > { %v4937_v43 = vpop.eup %4936 }
 0x660   : > { %v1171_v44 = vsel %vm811_vm3, %v4937_v43, 0.0 }
 0x661   : > { %1172 = vadd.xlane.f32.xlu1 %v1171_v44 }
 0x6ea   : > { %v1173_v47 = vpop.xlane.xlu1 %1172 }
 0x6eb   : > { %4938 = vrcp.f32 %v1173_v47  ;;  %v1633_v47 = vsel %vm875_vm2, %v4093_v46, 0 }
 0x6f8   : > { %v4939_v48 = vpop.eup %4938 }
 0x6f9   : > { %v1175_v50 = vmul.f32 %v4939_v48, %v4937_v43 }
 0x6fb   : > { %v1178_v51 = vpack.c.bf16 %v1175_v50, %v1175_v50  ;;  %4058 = vst.msk [vmem:[%s5330_s20 + $0x8] sm:$0xff] %vm811_vm3, %v1175_v50 }
 0x6fd   : > { %4515 = vmatmul.mubr.msk.bf16.vlgmr.msra.gmra.mxu1 %vm811_vm3, %v1178_v51  ;;  %v4888_v51 = vld [vmem:[%s6027_s3 + $0x38] sm:$0xff]  }
 0x6fe   : > { %4525 = vmatpush3.bf16.msra.mxu1 %v1279_v52  ;;  %4526 = vmatprep.mubr.msk.bf16.mxu1 %vm5067_vm1, %v5066_v9 }
 0x6ff   : > { %4538 = vmatprep.subr.bf16.mxu1 %v5066_v9 }
 0x705   : > { %4527 = vmatmul.mubr.msk.bf16.vlgmr.msra.gmra.mxu1 %vm811_vm3, %v919_v54  ;;  %v4890_v54 = vld [vmem:[%s6028_s7 + $0x38] sm:$0xff]  }
 0x706   : > { %4539 = vmatpush3.bf16.msra.mxu1 %v4882_v53  ;;  %4542 = vmatprep.mubr.msk.bf16.mxu1 %vm5067_vm1, %v5066_v9  ;;  %v4889_v53 = vld [vmem:[%s6027_s3 + $0x30] sm:$0xff]  }
 0x707   : > { %4540 = vmatprep.subr.bf16.mxu1 %v5066_v9 }
 0x70a   : > { %4541 = vmatpush3.bf16.msra.mxu1 %v4883_v55  ;;  %v4891_v55 = vld [vmem:[%s6028_s7 + $0x30] sm:$0xff]  }
 0x70b   : > { %4554 = vmatprep.subr.bf16.mxu1 %v5066_v9 }
 0x70d   : > { %4543 = vmatmul.mubr.msk.bf16.vlgmr.msra.gmra.mxu1 %vm584_vm0, %v5257_v22 }
 0x70e   : > { %4556 = vmatprep.mubr.msk.bf16.mxu1 %vm5067_vm1, %v5066_v9 }
 0x7bd   : > { %v1220_v56 = vpop.f32.mrf.mxu1 }
 0x7be   : > { %v1226_v58 = vpack.c.bf16 %v1220_v56, %v1220_v56 }
 0x7bf   : > { %v4516_v59 = vpop.f32.mrf.mxu1 }
 0x7c0   : > { %4521 = vmatmul.mubr.msk.bf16.vlgmr.msra.gmra.mxu0 %vm811_vm3, %v1226_v58 }
 0x7c1   : > { %v1223_v60 = vpop.f32.mrf.mxu1  ;;  %4531 = vmatpush3.bf16.msra.mxu0 %v4884_v57  ;;  %4534 = vmatprep.mubr.msk.bf16.mxu0 %vm5067_vm1, %v5066_v9  ;;  %v4892_v57 = vld [vmem:[%s6031_s5 + $0x38] sm:$0xff]  }
 0x7c2   : > { %4532 = vmatprep.subr.bf16.mxu0 %v5066_v9 }
 0x7c3   : > { %v4517_v62 = vpop.f32.mrf.mxu1 }
 0x7c5   : > { %v5399_v63 = vpop.f32.mrf.mxu1  ;;  %4533 = vmatpush3.bf16.msra.mxu0 %v4885_v61  ;;  %v4893_v61 = vld [vmem:[%s6031_s5 + $0x30] sm:$0xff]  }
 0x7c6   : > { %4546 = vmatprep.subr.bf16.mxu0 %v5066_v9 }
 0x7c7   : > { %v4528_v2 = vpop.f32.mrf.mxu1 }
 0x7c8   : > { %4535 = vmatmul.mubr.msk.bf16.vlgmr.msra.gmra.mxu0 %vm584_vm0, %v5257_v22 }
 0x7c9   : > { %v1318_v3 = vpop.f32.mrf.mxu1  ;;  %4547 = vmatpush3.bf16.msra.mxu0 %v4886_v1  ;;  %4550 = vmatprep.mubr.msk.bf16.mxu0 %vm5067_vm1, %v5066_v9 }
 0x7ca   : > { %4548 = vmatprep.subr.bf16.mxu0 %v5066_v9 }
 0x7cb   : > { %v4529_v5 = vpop.f32.mrf.mxu1 }
 0x7cc   : > { %v4118_v5 = vld [vmem:[%s5991_s8 + $0x3] ss:$0 sm:$0xff] }
 0x7cd   : > { %v1446_v7 = vpop.f32.mrf.mxu1  ;;  %4549 = vmatpush3.bf16.msra.mxu0 %v4887_v4 }
 0x7ce   : > { %v1447_v8 = vadd.f32 %v4077_v6, %v1446_v7  ;;  %4560 = vmatprep.subr.bf16.mxu0 %v5066_v9 }
 0x7cf   : > { %v4544_v10 = vpop.f32.mrf.mxu1 }
 0x7d0   : > { %v1518_v11 = vpack.c.bf16 %v1447_v8, %v1447_v8  ;;  %4551 = vmatmul.mubr.msk.bf16.vlgmr.msra.gmra.mxu0 %vm584_vm0, %v5257_v22 }
 0x7d1   : > { %v1449_v12 = vpop.f32.mrf.mxu1  ;;  %4562 = vmatprep.mubr.msk.bf16.mxu0 %vm5067_vm1, %v5066_v9 }
 0x7d2   : > { %v1523_v13 = vsel %vm811_vm3, %v1518_v11, 0 }
 0x7d3   : > { %v4545_v14 = vpop.f32.mrf.mxu1  ;;  %4555 = vmatpush3.bf16.xpose.msra.mxu1 %v1523_v13 }
 0x7d4   : > { %4566 = vmatprep.subr.bf16.mxu1 %v5066_v9 }
 0x880   : > { %v5423_v15 = vpop.f32.mrf.mxu0 }
 0x882   : > { %v4522_v16 = vpop.f32.mrf.mxu0 }
 0x884   : > { %v1272_v17 = vpop.f32.mrf.mxu0 }
 0x886   : > { %v4523_v18 = vpop.f32.mrf.mxu0 }
 0x888   : > { %v1380_v20 = vpop.f32.mrf.mxu0 }
 0x889   : > { %v1381_v21 = vadd.f32 %v4068_v19, %v1380_v20  ;;  %v4109_v20 = vld [vmem:[%s6032_s6 + $0x3] ss:$0 sm:$0xff] }
 0x88a   : > { %v4536_v23 = vpop.f32.mrf.mxu0 }
 0x88b   : > { %v1386_v24 = vmul.f32 0.35355338, %v1381_v21  ;;  %v4100_v21 = vld [vmem:[%s6033_s4 + $0x3] ss:$0 sm:$0xff] }
 0x88c   : > { %v1383_v25 = vpop.f32.mrf.mxu0 }
 0x88d   : > { %v1517_v26 = vpack.c.bf16 %v1386_v24, %v1386_v24 }
 0x88e   : > { %v4537_v27 = vpop.f32.mrf.mxu0 }
 0x88f   : > { %4557 = vmatmul.mubr.msk.bf16.vlgmr.msra.gmra.mxu1 %vm811_vm3, %v1517_v26 }
 0x890   : > { %v1511_v29 = vpop.f32.mrf.mxu0  ;;  %4568 = vmatprep.mubr.msk.bf16.mxu1 %vm5067_vm1, %v5066_v9  ;;  %4567 = vmatpush3.bf16.msra.mxu1 %v1633_v47 }
 0x891   : > { %v1512_v30 = vadd.f32 %v4086_v28, %v1511_v29  ;;  %4580 = vmatprep.subr.bf16.mxu1 %v5066_v9 }
 0x892   : > { %v4552_v31 = vpop.f32.mrf.mxu0 }
 0x893   : > { %v1579_v32 = vpack.c.bf16 %v1512_v30, %v1512_v30 }
 0x894   : > { %v1514_v33 = vpop.f32.mrf.mxu0 }
 0x895   : > { %v1584_v34 = vsel %vm875_vm2, %v1579_v32, 0 }
 0x896   : > { %v4553_v35 = vpop.f32.mrf.mxu0  ;;  %4561 = vmatpush3.bf16.msra.mxu0 %v1584_v34 }
 0x897   : > { %4572 = vmatprep.subr.bf16.mxu0 %v5066_v9 }
 0x94f   : > { %v1559_v36 = vpop.f32.mrf.mxu1 }
 0x950   : > { %v1565_v37 = vsel %vm811_vm3, %v1559_v36, -inf }
 0x951   : > { %1566 = vmax.xlane.f32.xlu0 %v1565_v37  ;;  %v4558_v38 = vpop.f32.mrf.mxu1 }
 0x953   : > { %v1562_v39 = vpop.f32.mrf.mxu1 }
 0x955   : > { %v4559_v40 = vpop.f32.mrf.mxu1 }
 0x9da   : > { %v1567_v41 = vpop.xlane.xlu0 %1566 }
 0x9db   : > { %v1568_v42 = vsub.f32 %v1559_v36, %v1567_v41  ;;  %v4125_v41 = vld [vmem:[%s5992_s9 + $0xc] sm:$0xf] }
 0x9dd   : > { %v1569_v43 = vmul.f32 1.442695, %v1568_v42  ;;  %v1988_v42 = vsel %vm875_vm2, %v4125_v41, 0 }
 0x9df   : > { %4940 = vpow2.f32 %v1569_v43 }
 0x9ec   : > { %v4941_v44 = vpop.eup %4940 }
 0x9ed   : > { %v1571_v45 = vsel %vm811_vm3, %v4941_v44, 0.0 }
 0x9ee   : > { %1572 = vadd.xlane.f32.xlu1 %v1571_v45 }
 0xa77   : > { %v1573_v48 = vpop.xlane.xlu1 %1572 }
 0xa78   : > { %4942 = vrcp.f32 %v1573_v48 }
 0xa85   : > { %v4943_v49 = vpop.eup %4942 }
 0xa86   : > { %v1575_v50 = vmul.f32 %v4943_v49, %v4941_v44 }
 0xa88   : > { %v1578_v52 = vpack.c.bf16 %v1575_v50, %v1575_v50  ;;  %4091 = vst.msk [vmem:[%s5330_s20 + $0x10] sm:$0xff] %vm811_vm3, %v1575_v50 }
 0xa8a   : > { %4563 = vmatmul.mubr.msk.bf16.vlgmr.msra.gmra.mxu0 %vm811_vm3, %v1578_v52 }
 0xa8b   : > { %4573 = vmatpush3.bf16.msra.mxu0 %v4888_v51  ;;  %4576 = vmatprep.mubr.msk.bf16.mxu0 %vm5067_vm1, %v5066_v9 }
 0xa8c   : > { %4574 = vmatprep.subr.bf16.mxu0 %v5066_v9 }
 0xa8f   : > { %4575 = vmatpush3.bf16.msra.mxu0 %v4889_v53 }
 0xa90   : > { %4588 = vmatprep.subr.bf16.mxu0 %v5066_v9 }
 0xa92   : > { %4577 = vmatmul.mubr.msk.bf16.vlgmr.msra.gmra.mxu0 %vm584_vm0, %v5257_v22 }
 0xa93   : > { %4589 = vmatpush3.bf16.msra.mxu0 %v4890_v54  ;;  %4592 = vmatprep.mubr.msk.bf16.mxu0 %vm5067_vm1, %v5066_v9  ;;  %v4127_v54 = vld [vmem:[%s5993_s10] ss:$0 sm:$0xff] }
 0xa94   : > { %4590 = vmatprep.subr.bf16.mxu0 %v5066_v9 }
 0xa97   : > { %4591 = vmatpush3.bf16.msra.mxu0 %v4891_v55 }
 0xa98   : > { %4602 = vmatprep.subr.bf16.mxu0 %v5066_v9 }
 0xa9a   : > { %4593 = vmatmul.mubr.msk.bf16.vlgmr.msra.gmra.mxu0 %vm584_vm0, %v5257_v22 }
 0xa9b   : > { %4604 = vmatprep.mubr.msk.bf16.mxu0 %vm5067_vm1, %v5066_v9 }
 0xb4a   : > { %v1620_v56 = vpop.f32.mrf.mxu0 }
 0xb4b   : > { %v1626_v58 = vpack.c.bf16 %v1620_v56, %v1620_v56 }
 0xb4c   : > { %v4564_v59 = vpop.f32.mrf.mxu0 }
 0xb4d   : > { %4569 = vmatmul.mubr.msk.bf16.vlgmr.msra.gmra.mxu1 %vm811_vm3, %v1626_v58 }
 0xb4e   : > { %v1623_v60 = vpop.f32.mrf.mxu0  ;;  %4581 = vmatpush3.bf16.msra.mxu1 %v4892_v57  ;;  %4584 = vmatprep.mubr.msk.bf16.mxu1 %vm5067_vm1, %v5066_v9 }
 0xb4f   : > { %4582 = vmatprep.subr.bf16.mxu1 %v5066_v9 }
 0xb50   : > { %v4565_v62 = vpop.f32.mrf.mxu0 }
 0xb52   : > { %v1735_v1 = vpop.f32.mrf.mxu0  ;;  %4583 = vmatpush3.bf16.msra.mxu1 %v4893_v61 }
 0xb53   : > { %4596 = vmatprep.subr.bf16.mxu1 %v5066_v9  ;;  %v1736_v26 = vadd.f32 %v4100_v21, %v1735_v1 }
 0xb54   : > { %v4578_v2 = vpop.f32.mrf.mxu0 }
 0xb55   : > { %4585 = vmatmul.mubr.msk.bf16.vlgmr.msra.gmra.mxu1 %vm584_vm0, %v5257_v22  ;;  %v1316_v22 = vadd.f32 %v5399_v63, %v5423_v15  ;;  %v1741_v29 = vmul.f32 0.35355338, %v1736_v26 }
 0xb56   : > { %v1738_v3 = vpop.f32.mrf.mxu0  ;;  %4598 = vmatprep.mubr.msk.bf16.mxu1 %vm5067_vm1, %v5066_v9 }
 0xb57   : > { %v1872_v30 = vpack.c.bf16 %v1741_v29, %v1741_v29 }
 0xb58   : > { %v4579_v4 = vpop.f32.mrf.mxu0 }
 0xb59   : > { %v4894_v4 = vld [vmem:[%s5996_s13 + $0x8] sm:$0xff]  }
 0xb5a   : > { %v1866_v6 = vpop.f32.mrf.mxu0 }
 0xb5b   : > { %v1867_v7 = vadd.f32 %v4118_v5, %v1866_v6 }
 0xb5c   : > { %v4594_v8 = vpop.f32.mrf.mxu0 }
 0xb5d   : > { %v1934_v10 = vpack.c.bf16 %v1867_v7, %v1867_v7 }
 0xb5e   : > { %v1869_v11 = vpop.f32.mrf.mxu0 }
 0xb5f   : > { %v1939_v12 = vsel %vm875_vm2, %v1934_v10, 0  ;;  %v4128_v10 = vld [vmem:[%s5994_s11] ss:$0 sm:$0xff] }
 0xb60   : > { %v4595_v13 = vpop.f32.mrf.mxu0  ;;  %4603 = vmatpush3.bf16.msra.mxu0 %v1939_v12  ;;  %v4129_v12 = vld [vmem:[%s5995_s12] ss:$0 sm:$0xff] }
 0xb61   : > { %4614 = vmatprep.subr.bf16.mxu0 %v5066_v9 }
 0xc0d   : > { %v1669_v14 = vpop.f32.mrf.mxu1 }
 0xc0e   : > { %v1675_v16 = vadd.f32 %v1669_v14, %v1316_v22 }
 0xc0f   : > { %v4570_v17 = vpop.f32.mrf.mxu1 }
 0xc10   : > { %v4897_v17 = vld [vmem:[%s5998_s15 + $0x10] sm:$0xff]  }
 0xc11   : > { %v1672_v18 = vpop.f32.mrf.mxu1 }
 0xc12   : > { %v4898_v18 = vld [vmem:[%s5998_s15 + $0x8] sm:$0xff]  }
 0xc13   : > { %v4571_v19 = vpop.f32.mrf.mxu1 }
 0xc14   : > { %v4899_v19 = vld [vmem:[%s5998_s15] sm:$0xff]  }
 0xc15   : > { %v1801_v23 = vpop.f32.mrf.mxu1 }
 0xc16   : > { %v1802_v24 = vadd.f32 %v4109_v20, %v1801_v23  ;;  %v4130_v20 = vld [vmem:[%s5997_s14] ss:$0 sm:$0xff] }
 0xc17   : > { %v4586_v25 = vpop.f32.mrf.mxu1 }
 0xc18   : > { %v1873_v27 = vpack.c.bf16 %v1802_v24, %v1802_v24 }
 0xc19   : > { %v1804_v28 = vpop.f32.mrf.mxu1 }
 0xc1a   : > { %v1878_v63 = vsel %vm811_vm3, %v1873_v27, 0 }
 0xc1b   : > { %v4587_v15 = vpop.f32.mrf.mxu1  ;;  %4597 = vmatpush3.bf16.xpose.msra.mxu1 %v1878_v63 }
 0xc1c   : > { %4608 = vmatprep.subr.bf16.mxu1 %v5066_v9 }
 0xc22   : > { %4599 = vmatmul.mubr.msk.bf16.vlgmr.msra.gmra.mxu1 %vm811_vm3, %v1872_v30 }
 0xc23   : > { %4610 = vmatprep.mubr.msk.bf16.mxu1 %vm5067_vm1, %v5066_v9  ;;  %4609 = vmatpush3.bf16.msra.mxu1 %v1988_v42 }
 0xc24   : > { %4622 = vmatprep.subr.bf16.mxu1 %v5066_v9 }
 0xce2   : > { %v1914_v31 = vpop.f32.mrf.mxu1 }
 0xce3   : > { %v1920_v32 = vsel %vm811_vm3, %v1914_v31, -inf }
 0xce4   : > { %1921 = vmax.xlane.f32.xlu0 %v1920_v32  ;;  %v4600_v33 = vpop.f32.mrf.mxu1 }
 0xce6   : > { %v1917_v34 = vpop.f32.mrf.mxu1 }
 0xce8   : > { %v4601_v35 = vpop.f32.mrf.mxu1 }
 0xd6d   : > { %v1922_v36 = vpop.xlane.xlu0 %1921 }
 0xd6e   : > { %v1923_v37 = vsub.f32 %v1914_v31, %v1922_v36  ;;  %v4134_v31 = vld [vmem:[%s5999_s16] ss:$0 sm:$0xff] }
 0xd70   : > { %v1924_v38 = vmul.f32 1.442695, %v1923_v37 }
 0xd72   : > { %4944 = vpow2.f32 %v1924_v38 }
 0xd7f   : > { %v4945_v39 = vpop.eup %4944 }
 0xd80   : > { %v1926_v40 = vsel %vm811_vm3, %v4945_v39, 0.0 }
 0xd81   : > { %1927 = vadd.xlane.f32.xlu1 %v1926_v40 }
 0xe0a   : > { %v1928_v43 = vpop.xlane.xlu1 %1927 }
 0xe0b   : > { %4946 = vrcp.f32 %v1928_v43 }
 0xe18   : > { %v4947_v44 = vpop.eup %4946 }
 0xe19   : > { %v1930_v45 = vmul.f32 %v4947_v44, %v4945_v39  ;;  %v4900_v44 = vld [vmem:[%s6027_s3 + $0x48] sm:$0xff]  }
 0xe1b   : > { %v1933_v46 = vpack.c.bf16 %v1930_v45, %v1930_v45  ;;  %4123 = vst.msk [vmem:[%s5330_s20 + $0x18] sm:$0xff] %vm811_vm3, %v1930_v45  ;;  %v4901_v45 = vld [vmem:[%s6028_s7 + $0x48] sm:$0xff]  }
 0xe1d   : > { %4605 = vmatmul.mubr.msk.bf16.vlgmr.msra.gmra.mxu0 %vm811_vm3, %v1933_v46  ;;  %v4902_v46 = vld [vmem:[%s6027_s3 + $0x40] sm:$0xff]  }
 0xe1e   : > { %4618 = vmatprep.mubr.msk.bf16.mxu0 %vm5067_vm1, %v5066_v9  ;;  %4615 = vmatpush3.bf16.msra.mxu0 %v4894_v4 }
 0xe1f   : > { %4616 = vmatprep.subr.bf16.mxu0 %v5066_v9 }
 0xedd   : > { %v1975_v47 = vpop.f32.mrf.mxu0 }
 0xede   : > { %v1981_v48 = vpack.c.bf16 %v1975_v47, %v1975_v47  ;;  %v4903_v47 = vld [vmem:[%s6028_s7 + $0x40] sm:$0xff]  }
 0xedf   : > { %v4606_v49 = vpop.f32.mrf.mxu0 }
 0xee0   : > { %4611 = vmatmul.mubr.msk.bf16.vlgmr.msra.gmra.mxu1 %vm811_vm3, %v1981_v48 }
 0xee1   : > { %v1978_v50 = vpop.f32.mrf.mxu0  ;;  %4630 = vmatprep.mubr.msk.bf16.mxu1 %vm5067_vm1, %v5066_v9 }
 0xee3   : > { %v4607_v51 = vpop.f32.mrf.mxu0 }
 0xfa0   : > { %v2024_v52 = vpop.f32.mrf.mxu1 }
 0xfa1   : > { %v2030_v53 = vadd.f32 %v2024_v52, %v1675_v16  ;;  %v4896_v16 = vld [vmem:[%s5998_s15 + $0x18] sm:$0xff]   ;;  %v4141_v52 = vld [vmem:[%s6029_s25 + $0x1] ss:$0 sm:$0xff] }
 0xfa2   : > { %v4612_v55 = vpop.f32.mrf.mxu1  ;;  %4623 = vmatpush3.bf16.msra.mxu1 %v4896_v16 }
 0xfa3   : > { %v2031_v56 = vadd.f32 %v2030_v53, %v5220_v0  ;;  %v4895_v0 = vld [vmem:[%s5996_s13] sm:$0xff]   ;;  %4624 = vmatprep.subr.bf16.mxu1 %v5066_v9 }
 0xfa4   : > { %v2027_v57 = vpop.f32.mrf.mxu1  ;;  %4617 = vmatpush3.bf16.msra.mxu0 %v4895_v0 }
 0xfa5   : > { %v2039_v58 = vadd.f32 %v4127_v54, %v2031_v56  ;;  %4634 = vmatprep.subr.bf16.mxu0 %v5066_v9  ;;  %v4143_v54 = vld [vmem:[%s6030_s22 + $0x1] ss:$0 sm:$0xff]  ;;  %v4904_v57 = vld [vmem:[%s6031_s5 + $0x48] sm:$0xff]  }
 0xfa6   : > { %v4613_v59 = vpop.f32.mrf.mxu1  ;;  %4625 = vmatpush3.bf16.msra.mxu1 %v4897_v17 }
 0xfa7   : > { %v2040_v60 = vsel %vm584_vm0, %v2039_v58, 0.0  ;;  %4626 = vmatprep.subr.bf16.mxu1 %v5066_v9  ;;  %v4905_v59 = vld [vmem:[%s6031_s5 + $0x40] sm:$0xff]  }
 0xfa8   : > { %2041 = vadd.xlane.f32.xlu0 %v2040_v60  ;;  %v4167_v60 = vld [vmem:[%s5991_s8 + $0x4] ss:$0 sm:$0xff] }
 0xfaa   : > { %4627 = vmatpush3.bf16.msra.mxu1 %v4898_v18 }
 0xfab   : > { %4628 = vmatprep.subr.bf16.mxu1 %v5066_v9 }
 0xfae   : > { %4629 = vmatpush3.bf16.msra.mxu1 %v4899_v19 }
 0xfaf   : > { %4650 = vmatprep.subr.bf16.mxu1 %v5066_v9 }
0x1031   : > { %v2042_v61 = vpop.xlane.xlu0 %2041 }
0x1032   : > { %v2043_v62 = vmul.f32 0.03125, %v2042_v61 }
0x1034   : > { %v2044_v1 = vsub.f32 %v2039_v58, %v2043_v62 }
0x1036   : > { %v2045_v2 = vmul.f32 %v2044_v1, %v2044_v1 }
0x1038   : > { %v2046_v3 = vsel %vm584_vm0, %v2045_v2, 0.0 }
0x1039   : > { %2047 = vadd.xlane.f32.xlu1 %v2046_v3 }
0x10c2   : > { %v2048_v5 = vpop.xlane.xlu1 %2047 }
0x10c3   : > { %v2049_v6 = vmul.f32 0.03125, %v2048_v5 }
0x10c5   : > { %v2050_v7 = vadd.f32 1e-05, %v2049_v6 }
0x10c7   : > { %4948 = vrsqrt.f32 %v2050_v7 }
0x10d4   : > { %v4949_v8 = vpop.eup %4948 }
0x10d5   : > { %v2052_v11 = vmul.f32 %v4949_v8, %v2044_v1 }
0x10d7   : > { %v2060_v13 = vmul.f32 %v4128_v10, %v2052_v11  ;;  %v4158_v10 = vld [vmem:[%s6032_s6 + $0x4] ss:$0 sm:$0xff] }
0x10d8   : > { %v4149_v11 = vld [vmem:[%s6033_s4 + $0x4] ss:$0 sm:$0xff] }
0x10d9   : > { %v2068_v22 = vadd.f32 %v4129_v12, %v2060_v13 }
0x10db   : > { %v2069_v14 = vpack.c.bf16 %v2068_v22, %v2068_v22 }
0x10dd   : > { %4619 = vmatmul.mubr.msk.bf16.vlgmr.msra.gmra.mxu0 %vm584_vm0, %v2069_v14 }
0x10de   : > { %4638 = vmatprep.mubr.msk.bf16.mxu0 %vm5067_vm1, %v5066_v9  ;;  %4635 = vmatpush3.bf16.msra.mxu0 %v4900_v44 }
0x10df   : > { %4636 = vmatprep.subr.bf16.mxu0 %v5066_v9 }
0x10e2   : > { %4637 = vmatpush3.bf16.msra.mxu0 %v4902_v46 }
0x10e3   : > { %4642 = vmatprep.subr.bf16.mxu0 %v5066_v9 }
0x119d   : > { %v2130_v21 = vpop.f32.mrf.mxu0 }
0x119e   : > { %v2131_v23 = vadd.f32 %v4130_v20, %v2130_v21  ;;  %v4906_v21 = vld [vmem:[%s6027_s3 + $0x58] sm:$0xff]  }
0x119f   : > { %v4620_v24 = vpop.f32.mrf.mxu0 }
0x11a0   : > { %v2137_v25 = vmul.f32 0.70710677, %v2131_v23  ;;  %v2136_v63 = vmul.f32 0.5, %v2131_v23  ;;  %v4907_v24 = vld [vmem:[%s6027_s3 + $0x50] sm:$0xff]  }
0x11a1   : > { %v2133_v26 = vpop.f32.mrf.mxu0 }
0x11a2   : > { %4950 = verf.f32 %v2137_v25  ;;  %v4908_v25 = vld [vmem:[%s6028_s7 + $0x58] sm:$0xff]   ;;  %v4909_v26 = vld [vmem:[%s6028_s7 + $0x50] sm:$0xff]  }
0x11a3   : > { %v4621_v27 = vpop.f32.mrf.mxu0 }
0x11af   : > { %v4951_v28 = vpop.eup %4950 }
0x11b0   : > { %v2139_v15 = vadd.f32 1.0, %v4951_v28 }
0x11b2   : > { %v2140_v29 = vmul.f32 %v2139_v15, %v2136_v63 }
0x11b4   : > { %v2141_v30 = vpack.c.bf16 %v2140_v29, %v2140_v29 }
0x11b6   : > { %4631 = vmatmul.mubr.msk.bf16.vlgmr.msra.gmra.mxu1 %vm2181_vm4, %v2141_v30 }
0x11b7   : > { %4654 = vmatprep.mubr.msk.bf16.mxu1 %vm5067_vm1, %v5066_v9  ;;  %4651 = vmatpush3.bf16.msra.mxu1 %v4901_v45 }
0x11b8   : > { %4652 = vmatprep.subr.bf16.mxu1 %v5066_v9 }
0x11bb   : > { %4653 = vmatpush3.bf16.msra.mxu1 %v4903_v47 }
0x11bc   : > { %4664 = vmatprep.subr.bf16.mxu1 %v5066_v9 }
0x1276   : > { %v2219_v32 = vpop.f32.mrf.mxu1 }
0x1277   : > { %v2220_v33 = vadd.f32 %v4134_v31, %v2219_v32 }
0x1278   : > { %v4632_v34 = vpop.f32.mrf.mxu1 }
0x1279   : > { %v5568_v35 = vadd.f32 %v2220_v33, %v2039_v58  ;;  %v4198_v34 = vld [vmem:[%s5991_s8 + $0x5] ss:$0 sm:$0xff] }
0x127a   : > { %v2222_v36 = vpop.f32.mrf.mxu1 }
0x127b   : > { %v2226_v37 = vsel %vm584_vm0, %v5568_v35, 0.0 }
0x127c   : > { %2227 = vadd.xlane.f32.xlu0 %v2226_v37  ;;  %v4633_v38 = vpop.f32.mrf.mxu1 }
0x1305   : > { %v2228_v39 = vpop.xlane.xlu0 %2227 }
0x1306   : > { %v2229_v40 = vmul.f32 0.03125, %v2228_v39 }
0x1308   : > { %v2230_v41 = vsub.f32 %v5568_v35, %v2229_v40 }
0x130a   : > { %v2231_v42 = vmul.f32 %v2230_v41, %v2230_v41 }
0x130c   : > { %v2232_v43 = vsel %vm584_vm0, %v2231_v42, 0.0 }
0x130d   : > { %2233 = vadd.xlane.f32.xlu1 %v2232_v43 }
0x1396   : > { %v2234_v48 = vpop.xlane.xlu1 %2233 }
0x1397   : > { %v2235_v49 = vmul.f32 0.03125, %v2234_v48 }
0x1399   : > { %v2236_v50 = vadd.f32 1e-05, %v2235_v49 }
0x139b   : > { %4952 = vrsqrt.f32 %v2236_v50 }
0x13a8   : > { %v4953_v51 = vpop.eup %4952 }
0x13a9   : > { %v2238_v53 = vmul.f32 %v4953_v51, %v2230_v41  ;;  %v4910_v51 = vld [vmem:[%s6031_s5 + $0x58] sm:$0xff]  }
0x13ab   : > { %v2247_v55 = vmul.f32 %v4141_v52, %v2238_v53  ;;  %v4911_v53 = vld [vmem:[%s6031_s5 + $0x50] sm:$0xff]  }
0x13ad   : > { %v2256_v56 = vadd.f32 %v4143_v54, %v2247_v55 }
0x13af   : > { %v5599_v58 = vpack.c.bf16 %v2256_v56, %v2256_v56 }
0x13b1   : > { %4639 = vmatmul.mubr.msk.bf16.vlgmr.msra.gmra.mxu0 %vm584_vm0, %v5599_v58  ;;  %4655 = vmatmul.mubr.msk.bf16.vlgmr.msra.gmra.mxu1 %vm584_vm0, %v5599_v58 }
0x13b2   : > { %4643 = vmatpush3.bf16.msra.mxu0 %v4904_v57  ;;  %4646 = vmatprep.mubr.msk.bf16.mxu0 %vm5067_vm1, %v5066_v9 }
0x13b3   : > { %4644 = vmatprep.subr.bf16.mxu0 %v5066_v9  ;;  %4666 = vmatprep.mubr.msk.bf16.mxu1 %vm5067_vm1, %v5066_v9 }
0x13b6   : > { %4645 = vmatpush3.bf16.msra.mxu0 %v4905_v59  ;;  %v4189_v59 = vld [vmem:[%s6032_s6 + $0x5] ss:$0 sm:$0xff] }
0x13b7   : > { %4658 = vmatprep.subr.bf16.mxu0 %v5066_v9 }
0x13b9   : > { %4647 = vmatmul.mubr.msk.bf16.vlgmr.msra.gmra.mxu0 %vm584_vm0, %v5599_v58 }
0x13ba   : > { %4660 = vmatprep.mubr.msk.bf16.mxu0 %vm5067_vm1, %v5066_v9 }
0x1471   : > { %v2320_v61 = vpop.f32.mrf.mxu0  ;;  %v2451_v62 = vpop.f32.mrf.mxu1 }
0x1472   : > { %v2452_v1 = vadd.f32 %v4167_v60, %v2451_v62  ;;  %v2321_v14 = vadd.f32 %v4149_v11, %v2320_v61  ;;  %v4180_v60 = vld [vmem:[%s6033_s4 + $0x5] ss:$0 sm:$0xff] }
0x1473   : > { %v4640_v2 = vpop.f32.mrf.mxu0  ;;  %v4656_v3 = vpop.f32.mrf.mxu1 }
0x1474   : > { %v2519_v4 = vpack.c.bf16 %v2452_v1, %v2452_v1  ;;  %v2326_v20 = vmul.f32 0.35355338, %v2321_v14 }
0x1475   : > { %v2323_v0 = vpop.f32.mrf.mxu0  ;;  %v2454_v5 = vpop.f32.mrf.mxu1 }
0x1476   : > { %v2524_v6 = vsel %vm875_vm2, %v2519_v4, 0  ;;  %v2457_v23 = vpack.c.bf16 %v2326_v20, %v2326_v20 }
0x1477   : > { %v4641_v7 = vpop.f32.mrf.mxu0  ;;  %v4657_v8 = vpop.f32.mrf.mxu1  ;;  %4665 = vmatpush3.bf16.msra.mxu1 %v2524_v6 }
0x1478   : > { %4678 = vmatprep.subr.bf16.mxu1 %v5066_v9 }
0x1479   : > { %v2386_v12 = vpop.f32.mrf.mxu0 }
0x147a   : > { %v2387_v13 = vadd.f32 %v4158_v10, %v2386_v12 }
0x147b   : > { %v4648_v22 = vpop.f32.mrf.mxu0 }
0x147c   : > { %v2458_v16 = vpack.c.bf16 %v2387_v13, %v2387_v13 }
0x147d   : > { %v2389_v17 = vpop.f32.mrf.mxu0 }
0x147e   : > { %v2463_v18 = vsel %vm811_vm3, %v2458_v16, 0 }
0x147f   : > { %v4649_v19 = vpop.f32.mrf.mxu0  ;;  %4659 = vmatpush3.bf16.xpose.msra.mxu0 %v2463_v18 }
0x1480   : > { %4670 = vmatprep.subr.bf16.mxu0 %v5066_v9  ;;  %v4205_v19 = vld [vmem:[%s5992_s9 + $0x14] sm:$0xf] }
0x1481   : > { %v2881_v20 = vsel %vm875_vm2, %v4205_v19, 0 }
0x1486   : > { %4661 = vmatmul.mubr.msk.bf16.vlgmr.msra.gmra.mxu0 %vm811_vm3, %v2457_v23 }
0x1487   : > { %4671 = vmatpush3.bf16.msra.mxu0 %v4906_v21  ;;  %4674 = vmatprep.mubr.msk.bf16.mxu0 %vm5067_vm1, %v5066_v9 }
0x1488   : > { %4672 = vmatprep.subr.bf16.mxu0 %v5066_v9 }
0x148b   : > { %4673 = vmatpush3.bf16.msra.mxu0 %v4907_v24  ;;  %v4174_v24 = vld [vmem:[%s5992_s9 + $0x10] sm:$0xf] }
0x148c   : > { %4686 = vmatprep.subr.bf16.mxu0 %v5066_v9 }
0x148e   : > { %4675 = vmatmul.mubr.msk.bf16.vlgmr.msra.gmra.mxu0 %vm584_vm0, %v5599_v58 }
0x148f   : > { %4687 = vmatpush3.bf16.msra.mxu0 %v4908_v25  ;;  %4690 = vmatprep.mubr.msk.bf16.mxu0 %vm5067_vm1, %v5066_v9 }
0x1490   : > { %4688 = vmatprep.subr.bf16.mxu0 %v5066_v9 }
0x1493   : > { %4689 = vmatpush3.bf16.msra.mxu0 %v4909_v26 }
0x1494   : > { %4700 = vmatprep.subr.bf16.mxu0 %v5066_v9 }
0x1496   : > { %4691 = vmatmul.mubr.msk.bf16.vlgmr.msra.gmra.mxu0 %vm584_vm0, %v5599_v58 }
0x1497   : > { %4702 = vmatprep.mubr.msk.bf16.mxu0 %vm5067_vm1, %v5066_v9 }
0x1546   : > { %v2499_v27 = vpop.f32.mrf.mxu0 }
0x1547   : > { %v2505_v28 = vsel %vm811_vm3, %v2499_v27, -inf }
0x1548   : > { %2506 = vmax.xlane.f32.xlu0 %v2505_v28  ;;  %v4662_v63 = vpop.f32.mrf.mxu0  ;;  %v4912_v28 = vld [vmem:[%s6031_s5 + $0x68] sm:$0xff]  }
0x154a   : > { %v2502_v15 = vpop.f32.mrf.mxu0 }
0x154b   : > { %v4913_v15 = vld [vmem:[%s6031_s5 + $0x60] sm:$0xff]  }
0x154c   : > { %v4663_v29 = vpop.f32.mrf.mxu0 }
0x154e   : > { %v2628_v30 = vpop.f32.mrf.mxu0 }
0x154f   : > { %v2629_v2 = vadd.f32 %v4180_v60, %v2628_v30  ;;  %v4914_v30 = vld [vmem:[%s6027_s3 + $0x68] sm:$0xff]  }
0x1550   : > { %v4676_v31 = vpop.f32.mrf.mxu0 }
0x1551   : > { %v2634_v6 = vmul.f32 0.35355338, %v2629_v2  ;;  %v4231_v2 = vld [vmem:[%s5991_s8 + $0x6] ss:$0 sm:$0xff] }
0x1552   : > { %v2631_v32 = vpop.f32.mrf.mxu0 }
0x1553   : > { %v2765_v7 = vpack.c.bf16 %v2634_v6, %v2634_v6 }
0x1554   : > { %v4677_v33 = vpop.f32.mrf.mxu0 }
0x1556   : > { %v2759_v36 = vpop.f32.mrf.mxu0 }
0x1557   : > { %v2760_v37 = vadd.f32 %v4198_v34, %v2759_v36  ;;  %v4915_v34 = vld [vmem:[%s6027_s3 + $0x60] sm:$0xff]  }
0x1558   : > { %v4692_v38 = vpop.f32.mrf.mxu0 }
0x1559   : > { %v2827_v39 = vpack.c.bf16 %v2760_v37, %v2760_v37  ;;  %v4916_v38 = vld [vmem:[%s6028_s7 + $0x68] sm:$0xff]  }
0x155a   : > { %v2762_v40 = vpop.f32.mrf.mxu0 }
0x155b   : > { %v2832_v41 = vsel %vm875_vm2, %v2827_v39, 0 }
0x155c   : > { %v4693_v42 = vpop.f32.mrf.mxu0  ;;  %4701 = vmatpush3.bf16.msra.mxu0 %v2832_v41  ;;  %v4917_v41 = vld [vmem:[%s6028_s7 + $0x60] sm:$0xff]  }
0x155d   : > { %4712 = vmatprep.subr.bf16.mxu0 %v5066_v9 }
0x15d1   : > { %v2507_v43 = vpop.xlane.xlu0 %2506 }
0x15d2   : > { %v2508_v44 = vsub.f32 %v2499_v27, %v2507_v43  ;;  %v2927_v27 = vsel %vm875_vm2, %v4174_v24, 0  ;;  %v4222_v43 = vld [vmem:[%s6032_s6 + $0x6] ss:$0 sm:$0xff] }
0x15d4   : > { %v2509_v45 = vmul.f32 1.442695, %v2508_v44 }
0x15d6   : > { %4954 = vpow2.f32 %v2509_v45 }
0x15e3   : > { %v4955_v46 = vpop.eup %4954 }
0x15e4   : > { %v2511_v47 = vsel %vm811_vm3, %v4955_v46, 0.0 }
0x15e5   : > { %2512 = vadd.xlane.f32.xlu1 %v2511_v47 }
0x166e   : > { %v2513_v48 = vpop.xlane.xlu1 %2512 }
0x166f   : > { %4956 = vrcp.f32 %v2513_v48 }
0x167c   : > { %v4957_v49 = vpop.eup %4956 }
0x167d   : > { %v2515_v50 = vmul.f32 %v4957_v49, %v4955_v46 }
0x167f   : > { %v2518_v52 = vpack.c.bf16 %v2515_v50, %v2515_v50  ;;  %4172 = vst.msk [vmem:[%s5330_s20 + $0x20] sm:$0xff] %vm811_vm3, %v2515_v50 }
0x1681   : > { %4667 = vmatmul.mubr.msk.bf16.vlgmr.msra.gmra.mxu1 %vm811_vm3, %v2518_v52 }
0x1682   : > { %4679 = vmatpush3.bf16.msra.mxu1 %v4910_v51  ;;  %4682 = vmatprep.mubr.msk.bf16.mxu1 %vm5067_vm1, %v5066_v9 }
0x1683   : > { %4680 = vmatprep.subr.bf16.mxu1 %v5066_v9 }
0x1686   : > { %4681 = vmatpush3.bf16.msra.mxu1 %v4911_v53 }
0x1687   : > { %4694 = vmatprep.subr.bf16.mxu1 %v5066_v9 }
0x1689   : > { %4683 = vmatmul.mubr.msk.bf16.vlgmr.msra.gmra.mxu1 %vm584_vm0, %v5599_v58 }
0x168a   : > { %4696 = vmatprep.mubr.msk.bf16.mxu1 %vm5067_vm1, %v5066_v9 }
0x1741   : > { %v2560_v54 = vpop.f32.mrf.mxu1 }
0x1742   : > { %v2566_v63 = vpack.c.bf16 %v2560_v54, %v2560_v54 }
0x1743   : > { %v4668_v55 = vpop.f32.mrf.mxu1 }
0x1744   : > { %v4213_v55 = vld [vmem:[%s6033_s4 + $0x6] ss:$0 sm:$0xff] }
0x1745   : > { %v2563_v56 = vpop.f32.mrf.mxu1 }
0x1747   : > { %v4669_v57 = vpop.f32.mrf.mxu1 }
0x1749   : > { %v2694_v61 = vpop.f32.mrf.mxu1 }
0x174a   : > { %v2695_v62 = vadd.f32 %v4189_v59, %v2694_v61 }
0x174b   : > { %v4684_v1 = vpop.f32.mrf.mxu1 }
0x174c   : > { %v2766_v3 = vpack.c.bf16 %v2695_v62, %v2695_v62 }
0x174d   : > { %v2697_v4 = vpop.f32.mrf.mxu1 }
0x174e   : > { %v2771_v0 = vsel %vm811_vm3, %v2766_v3, 0 }
0x174f   : > { %v4685_v5 = vpop.f32.mrf.mxu1  ;;  %4695 = vmatpush3.bf16.xpose.msra.mxu1 %v2771_v0 }
0x1750   : > { %4706 = vmatprep.subr.bf16.mxu1 %v5066_v9 }
0x1756   : > { %4697 = vmatmul.mubr.msk.bf16.vlgmr.msra.gmra.mxu1 %vm811_vm3, %v2765_v7 }
0x1757   : > { %4708 = vmatprep.mubr.msk.bf16.mxu1 %vm5067_vm1, %v5066_v9  ;;  %4707 = vmatpush3.bf16.msra.mxu1 %v2881_v20  ;;  %v4238_v20 = vld [vmem:[%s5992_s9 + $0x18] sm:$0xf] }
0x1758   : > { %4718 = vmatprep.subr.bf16.mxu1 %v5066_v9 }
0x1816   : > { %v2807_v8 = vpop.f32.mrf.mxu1 }
0x1817   : > { %v2813_v10 = vsel %vm811_vm3, %v2807_v8, -inf }
0x1818   : > { %2814 = vmax.xlane.f32.xlu0 %v2813_v10  ;;  %v4698_v11 = vpop.f32.mrf.mxu1 }
0x181a   : > { %v2810_v12 = vpop.f32.mrf.mxu1 }
0x181c   : > { %v4699_v13 = vpop.f32.mrf.mxu1 }
0x18a1   : > { %v2815_v22 = vpop.xlane.xlu0 %2814 }
0x18a2   : > { %v2816_v14 = vsub.f32 %v2807_v8, %v2815_v22 }
0x18a4   : > { %v2817_v16 = vmul.f32 1.442695, %v2816_v14 }
0x18a6   : > { %4958 = vpow2.f32 %v2817_v16 }
0x18b3   : > { %v4959_v17 = vpop.eup %4958 }
0x18b4   : > { %v2819_v18 = vsel %vm811_vm3, %v4959_v17, 0.0 }
0x18b5   : > { %2820 = vadd.xlane.f32.xlu1 %v2819_v18 }
0x193e   : > { %v2821_v21 = vpop.xlane.xlu1 %2820 }
0x193f   : > { %4960 = vrcp.f32 %v2821_v21  ;;  %v3281_v21 = vsel %vm875_vm2, %v4238_v20, 0 }
0x194c   : > { %v4961_v23 = vpop.eup %4960 }
0x194d   : > { %v2823_v25 = vmul.f32 %v4961_v23, %v4959_v17 }
0x194f   : > { %v2826_v26 = vpack.c.bf16 %v2823_v25, %v2823_v25  ;;  %4203 = vst.msk [vmem:[%s5330_s20 + $0x28] sm:$0xff] %vm811_vm3, %v2823_v25 }
0x1951   : > { %4703 = vmatmul.mubr.msk.bf16.vlgmr.msra.gmra.mxu0 %vm811_vm3, %v2826_v26  ;;  %v4918_v26 = vld [vmem:[%s6027_s3 + $0x78] sm:$0xff]  }
0x1952   : > { %4713 = vmatpush3.bf16.msra.mxu0 %v2927_v27  ;;  %4714 = vmatprep.mubr.msk.bf16.mxu0 %vm5067_vm1, %v5066_v9 }
0x1953   : > { %4726 = vmatprep.subr.bf16.mxu0 %v5066_v9 }
0x1959   : > { %4715 = vmatmul.mubr.msk.bf16.vlgmr.msra.gmra.mxu0 %vm811_vm3, %v2566_v63  ;;  %v4920_v63 = vld [vmem:[%s6028_s7 + $0x78] sm:$0xff]  }
0x195a   : > { %4727 = vmatpush3.bf16.msra.mxu0 %v4912_v28  ;;  %4730 = vmatprep.mubr.msk.bf16.mxu0 %vm5067_vm1, %v5066_v9  ;;  %v4919_v28 = vld [vmem:[%s6027_s3 + $0x70] sm:$0xff]   ;;  %s4978_s3 = sshll.u32 %s5068_s28, 4  ;;  %s4979_s3 = int_to_ptr.vmem [resolvable:$false] %s4978_s3 }
0x195b   : > { %4728 = vmatprep.subr.bf16.mxu0 %v5066_v9  ;;  %p4981_p0 = scmp.lt.s32.totalorder %s5901_s26, %s4979_s3 }
0x195e   : > { %4729 = vmatpush3.bf16.msra.mxu0 %v4913_v15  ;;  %v4921_v15 = vld [vmem:[%s6028_s7 + $0x70] sm:$0xff]  }
0x195f   : > { %4742 = vmatprep.subr.bf16.mxu0 %v5066_v9 }
0x1961   : > { %4731 = vmatmul.mubr.msk.bf16.vlgmr.msra.gmra.mxu0 %vm584_vm0, %v5599_v58 }
0x1962   : > { %4744 = vmatprep.mubr.msk.bf16.mxu0 %vm5067_vm1, %v5066_v9 }
0x1a11   : > { %v2868_v29 = vpop.f32.mrf.mxu0 }
0x1a12   : > { %v2874_v31 = vpack.c.bf16 %v2868_v29, %v2868_v29 }
0x1a13   : > { %v4704_v32 = vpop.f32.mrf.mxu0 }
0x1a14   : > { %4709 = vmatmul.mubr.msk.bf16.vlgmr.msra.gmra.mxu1 %vm811_vm3, %v2874_v31 }
0x1a15   : > { %v2871_v33 = vpop.f32.mrf.mxu0  ;;  %4719 = vmatpush3.bf16.msra.mxu1 %v4914_v30  ;;  %4722 = vmatprep.mubr.msk.bf16.mxu1 %vm5067_vm1, %v5066_v9  ;;  %v4922_v30 = vld [vmem:[%s6031_s5 + $0x78] sm:$0xff]  }
0x1a16   : > { %4720 = vmatprep.subr.bf16.mxu1 %v5066_v9 }
0x1a17   : > { %v4705_v36 = vpop.f32.mrf.mxu0 }
0x1a19   : > { %v5735_v37 = vpop.f32.mrf.mxu0  ;;  %4721 = vmatpush3.bf16.msra.mxu1 %v4915_v34  ;;  %v4923_v34 = vld [vmem:[%s6031_s5 + $0x70] sm:$0xff]  }
0x1a1a   : > { %4734 = vmatprep.subr.bf16.mxu1 %v5066_v9 }
0x1a1b   : > { %v4716_v39 = vpop.f32.mrf.mxu0 }
0x1a1c   : > { %4723 = vmatmul.mubr.msk.bf16.vlgmr.msra.gmra.mxu1 %vm584_vm0, %v5599_v58 }
0x1a1d   : > { %v2966_v40 = vpop.f32.mrf.mxu0  ;;  %4735 = vmatpush3.bf16.msra.mxu1 %v4916_v38  ;;  %4738 = vmatprep.mubr.msk.bf16.mxu1 %vm5067_vm1, %v5066_v9 }
0x1a1e   : > { %4736 = vmatprep.subr.bf16.mxu1 %v5066_v9 }
0x1a1f   : > { %v4717_v42 = vpop.f32.mrf.mxu0 }
0x1a20   : > { %v4263_v42 = vld [vmem:[%s5991_s8 + $0x7] ss:$0 sm:$0xff] }
0x1a21   : > { %v3094_v44 = vpop.f32.mrf.mxu0  ;;  %4737 = vmatpush3.bf16.msra.mxu1 %v4917_v41 }
0x1a22   : > { %v3095_v45 = vadd.f32 %v4222_v43, %v3094_v44  ;;  %4748 = vmatprep.subr.bf16.mxu1 %v5066_v9 }
0x1a23   : > { %v4732_v46 = vpop.f32.mrf.mxu0 }
0x1a24   : > { %v3166_v47 = vpack.c.bf16 %v3095_v45, %v3095_v45  ;;  %4739 = vmatmul.mubr.msk.bf16.vlgmr.msra.gmra.mxu1 %vm584_vm0, %v5599_v58 }
0x1a25   : > { %v3097_v48 = vpop.f32.mrf.mxu0  ;;  %4750 = vmatprep.mubr.msk.bf16.mxu1 %vm5067_vm1, %v5066_v9 }
0x1a26   : > { %v3171_v49 = vsel %vm811_vm3, %v3166_v47, 0 }
0x1a27   : > { %v4733_v50 = vpop.f32.mrf.mxu0  ;;  %4743 = vmatpush3.bf16.xpose.msra.mxu0 %v3171_v49 }
0x1a28   : > { %4754 = vmatprep.subr.bf16.mxu0 %v5066_v9 }
0x1ad4   : > { %v5759_v51 = vpop.f32.mrf.mxu1 }
0x1ad6   : > { %v4710_v52 = vpop.f32.mrf.mxu1 }
0x1ad8   : > { %v2920_v53 = vpop.f32.mrf.mxu1 }
0x1ada   : > { %v4711_v54 = vpop.f32.mrf.mxu1 }
0x1adc   : > { %v3028_v56 = vpop.f32.mrf.mxu1 }
0x1add   : > { %v3029_v57 = vadd.f32 %v4213_v55, %v3028_v56  ;;  %v4254_v56 = vld [vmem:[%s6032_s6 + $0x7] ss:$0 sm:$0xff] }
0x1ade   : > { %v4724_v59 = vpop.f32.mrf.mxu1 }
0x1adf   : > { %v3034_v60 = vmul.f32 0.35355338, %v3029_v57  ;;  %v4245_v57 = vld [vmem:[%s6033_s4 + $0x7] ss:$0 sm:$0xff] }
0x1ae0   : > { %v3031_v61 = vpop.f32.mrf.mxu1 }
0x1ae1   : > { %v3165_v62 = vpack.c.bf16 %v3034_v60, %v3034_v60 }
0x1ae2   : > { %v4725_v1 = vpop.f32.mrf.mxu1 }
0x1ae3   : > { %4745 = vmatmul.mubr.msk.bf16.vlgmr.msra.gmra.mxu0 %vm811_vm3, %v3165_v62 }
0x1ae4   : > { %v3159_v3 = vpop.f32.mrf.mxu1  ;;  %4756 = vmatprep.mubr.msk.bf16.mxu0 %vm5067_vm1, %v5066_v9  ;;  %4755 = vmatpush3.bf16.msra.mxu0 %v3281_v21 }
0x1ae5   : > { %v3160_v4 = vadd.f32 %v4231_v2, %v3159_v3  ;;  %4768 = vmatprep.subr.bf16.mxu0 %v5066_v9 }
0x1ae6   : > { %v4740_v0 = vpop.f32.mrf.mxu1 }
0x1ae7   : > { %v3227_v5 = vpack.c.bf16 %v3160_v4, %v3160_v4 }
0x1ae8   : > { %v3162_v6 = vpop.f32.mrf.mxu1 }
0x1ae9   : > { %v3232_v7 = vsel %vm875_vm2, %v3227_v5, 0 }
0x1aea   : > { %v4741_v8 = vpop.f32.mrf.mxu1  ;;  %4749 = vmatpush3.bf16.msra.mxu1 %v3232_v7 }
0x1aeb   : > { %4760 = vmatprep.subr.bf16.mxu1 %v5066_v9 }
0x1ba3   : > { %v3207_v10 = vpop.f32.mrf.mxu0 }
0x1ba4   : > { %v3213_v11 = vsel %vm811_vm3, %v3207_v10, -inf }
0x1ba5   : > { %3214 = vmax.xlane.f32.xlu0 %v3213_v11  ;;  %v4746_v12 = vpop.f32.mrf.mxu0 }
0x1ba7   : > { %v3210_v13 = vpop.f32.mrf.mxu0 }
0x1ba9   : > { %v4747_v22 = vpop.f32.mrf.mxu0 }
0x1c2e   : > { %v3215_v14 = vpop.xlane.xlu0 %3214 }
0x1c2f   : > { %v3216_v16 = vsub.f32 %v3207_v10, %v3215_v14  ;;  %v4270_v14 = vld [vmem:[%s5992_s9 + $0x1c] sm:$0xf] }
0x1c31   : > { %v3217_v17 = vmul.f32 1.442695, %v3216_v16  ;;  %v3636_v16 = vsel %vm875_vm2, %v4270_v14, 0 }
0x1c33   : > { %4962 = vpow2.f32 %v3217_v17 }
0x1c40   : > { %v4963_v18 = vpop.eup %4962 }
0x1c41   : > { %v3219_v19 = vsel %vm811_vm3, %v4963_v18, 0.0 }
0x1c42   : > { %3220 = vadd.xlane.f32.xlu1 %v3219_v19 }
0x1ccb   : > { %v3221_v23 = vpop.xlane.xlu1 %3220 }
0x1ccc   : > { %4964 = vrcp.f32 %v3221_v23 }
0x1cd9   : > { %v4965_v24 = vpop.eup %4964 }
0x1cda   : > { %v3223_v25 = vmul.f32 %v4965_v24, %v4963_v18 }
0x1cdc   : > { %v3226_v27 = vpack.c.bf16 %v3223_v25, %v3223_v25  ;;  %4236 = vst.msk [vmem:[%s5330_s20 + $0x30] sm:$0xff] %vm811_vm3, %v3223_v25 }
0x1cde   : > { %4751 = vmatmul.mubr.msk.bf16.vlgmr.msra.gmra.mxu1 %vm811_vm3, %v3226_v27 }
0x1cdf   : > { %4761 = vmatpush3.bf16.msra.mxu1 %v4918_v26  ;;  %4764 = vmatprep.mubr.msk.bf16.mxu1 %vm5067_vm1, %v5066_v9 }
0x1ce0   : > { %4762 = vmatprep.subr.bf16.mxu1 %v5066_v9 }
0x1ce3   : > { %4763 = vmatpush3.bf16.msra.mxu1 %v4919_v28 }
0x1ce4   : > { %4776 = vmatprep.subr.bf16.mxu1 %v5066_v9 }
0x1ce6   : > { %4765 = vmatmul.mubr.msk.bf16.vlgmr.msra.gmra.mxu1 %vm584_vm0, %v5599_v58 }
0x1ce7   : > { %4777 = vmatpush3.bf16.msra.mxu1 %v4920_v63  ;;  %4780 = vmatprep.mubr.msk.bf16.mxu1 %vm5067_vm1, %v5066_v9  ;;  %v4273_v63 = vld [vmem:[%s5993_s10 + $0x1] ss:$0 sm:$0xff] }
0x1ce8   : > { %4778 = vmatprep.subr.bf16.mxu1 %v5066_v9 }
0x1ceb   : > { %4779 = vmatpush3.bf16.msra.mxu1 %v4921_v15 }
0x1cec   : > { %4790 = vmatprep.subr.bf16.mxu1 %v5066_v9 }
0x1cee   : > { %4781 = vmatmul.mubr.msk.bf16.vlgmr.msra.gmra.mxu1 %vm584_vm0, %v5599_v58 }
0x1cef   : > { %4792 = vmatprep.mubr.msk.bf16.mxu1 %vm5067_vm1, %v5066_v9 }
0x1d9e   : > { %v3268_v29 = vpop.f32.mrf.mxu1 }
0x1d9f   : > { %v3274_v31 = vpack.c.bf16 %v3268_v29, %v3268_v29 }
0x1da0   : > { %v4752_v32 = vpop.f32.mrf.mxu1 }
0x1da1   : > { %4757 = vmatmul.mubr.msk.bf16.vlgmr.msra.gmra.mxu0 %vm811_vm3, %v3274_v31 }
0x1da2   : > { %v3271_v33 = vpop.f32.mrf.mxu1  ;;  %4769 = vmatpush3.bf16.msra.mxu0 %v4922_v30  ;;  %4772 = vmatprep.mubr.msk.bf16.mxu0 %vm5067_vm1, %v5066_v9 }
0x1da3   : > { %4770 = vmatprep.subr.bf16.mxu0 %v5066_v9 }
0x1da4   : > { %v4753_v36 = vpop.f32.mrf.mxu1 }
0x1da6   : > { %v3383_v38 = vpop.f32.mrf.mxu1  ;;  %4771 = vmatpush3.bf16.msra.mxu0 %v4923_v34 }
0x1da7   : > { %4784 = vmatprep.subr.bf16.mxu0 %v5066_v9  ;;  %v3384_v62 = vadd.f32 %v4245_v57, %v3383_v38 }
0x1da8   : > { %v4766_v39 = vpop.f32.mrf.mxu1 }
0x1da9   : > { %4773 = vmatmul.mubr.msk.bf16.vlgmr.msra.gmra.mxu0 %vm584_vm0, %v5599_v58  ;;  %v2964_v58 = vadd.f32 %v5735_v37, %v5759_v51  ;;  %v3389_v3 = vmul.f32 0.35355338, %v3384_v62 }
0x1daa   : > { %v3386_v40 = vpop.f32.mrf.mxu1  ;;  %4786 = vmatprep.mubr.msk.bf16.mxu0 %vm5067_vm1, %v5066_v9 }
0x1dab   : > { %v3520_v4 = vpack.c.bf16 %v3389_v3, %v3389_v3 }
0x1dac   : > { %v4767_v41 = vpop.f32.mrf.mxu1 }
0x1dad   : > { %v4925_v41 = vld [vmem:[%s5996_s13 + $0x10] sm:$0xff]  }
0x1dae   : > { %v3514_v43 = vpop.f32.mrf.mxu1 }
0x1daf   : > { %v3515_v44 = vadd.f32 %v4263_v42, %v3514_v43 }
0x1db0   : > { %v4782_v45 = vpop.f32.mrf.mxu1 }
0x1db1   : > { %v3582_v46 = vpack.c.bf16 %v3515_v44, %v3515_v44 }
0x1db2   : > { %v3517_v47 = vpop.f32.mrf.mxu1 }
0x1db3   : > { %v3587_v48 = vsel %vm875_vm2, %v3582_v46, 0  ;;  %v4275_v46 = vld [vmem:[%s5994_s11 + $0x1] ss:$0 sm:$0xff] }
0x1db4   : > { %v4783_v49 = vpop.f32.mrf.mxu1  ;;  %4791 = vmatpush3.bf16.msra.mxu1 %v3587_v48  ;;  %v4277_v48 = vld [vmem:[%s5995_s12 + $0x1] ss:$0 sm:$0xff] }
0x1db5   : > { %4802 = vmatprep.subr.bf16.mxu1 %v5066_v9 }
0x1e61   : > { %v3317_v50 = vpop.f32.mrf.mxu0 }
0x1e62   : > { %v3323_v52 = vadd.f32 %v3317_v50, %v2964_v58 }
0x1e63   : > { %v4758_v53 = vpop.f32.mrf.mxu0 }
0x1e64   : > { %v4927_v53 = vld [vmem:[%s5998_s15 + $0x30] sm:$0xff]  }
0x1e65   : > { %v3320_v54 = vpop.f32.mrf.mxu0 }
0x1e66   : > { %v4928_v54 = vld [vmem:[%s5998_s15 + $0x28] sm:$0xff]  }
0x1e67   : > { %v4759_v55 = vpop.f32.mrf.mxu0 }
0x1e68   : > { %v4929_v55 = vld [vmem:[%s5998_s15 + $0x20] sm:$0xff]  }
0x1e69   : > { %v3449_v59 = vpop.f32.mrf.mxu0 }
0x1e6a   : > { %v3450_v60 = vadd.f32 %v4254_v56, %v3449_v59  ;;  %v4283_v56 = vld [vmem:[%s5997_s14 + $0x1] ss:$0 sm:$0xff] }
0x1e6b   : > { %v4774_v61 = vpop.f32.mrf.mxu0 }
0x1e6c   : > { %v3521_v1 = vpack.c.bf16 %v3450_v60, %v3450_v60 }
0x1e6d   : > { %v3452_v2 = vpop.f32.mrf.mxu0 }
0x1e6e   : > { %v3526_v37 = vsel %vm811_vm3, %v3521_v1, 0 }
0x1e6f   : > { %v4775_v51 = vpop.f32.mrf.mxu0  ;;  %4785 = vmatpush3.bf16.xpose.msra.mxu0 %v3526_v37 }
0x1e70   : > { %4796 = vmatprep.subr.bf16.mxu0 %v5066_v9 }
0x1e76   : > { %4787 = vmatmul.mubr.msk.bf16.vlgmr.msra.gmra.mxu0 %vm811_vm3, %v3520_v4 }
0x1e77   : > { %4798 = vmatprep.mubr.msk.bf16.mxu0 %vm5067_vm1, %v5066_v9  ;;  %4797 = vmatpush3.bf16.msra.mxu0 %v3636_v16 }
0x1e78   : > { %4810 = vmatprep.subr.bf16.mxu0 %v5066_v9 }
0x1f36   : > { %v3562_v0 = vpop.f32.mrf.mxu0 }
0x1f37   : > { %v3568_v5 = vsel %vm811_vm3, %v3562_v0, -inf }
0x1f38   : > { %3569 = vmax.xlane.f32.xlu0 %v3568_v5  ;;  %v4788_v6 = vpop.f32.mrf.mxu0 }
0x1f3a   : > { %v3565_v7 = vpop.f32.mrf.mxu0 }
0x1f3c   : > { %v4789_v8 = vpop.f32.mrf.mxu0 }
0x1fc1   : > { %v3570_v10 = vpop.xlane.xlu0 %3569 }
0x1fc2   : > { %v3571_v11 = vsub.f32 %v3562_v0, %v3570_v10 }
0x1fc4   : > { %v3572_v12 = vmul.f32 1.442695, %v3571_v11 }
0x1fc6   : > { %4966 = vpow2.f32 %v3572_v12 }
0x1fd3   : > { %v4967_v13 = vpop.eup %4966 }
0x1fd4   : > { %v3574_v22 = vsel %vm811_vm3, %v4967_v13, 0.0 }
0x1fd5   : > { %3575 = vadd.xlane.f32.xlu1 %v3574_v22 }
0x205e   : > { %v3576_v17 = vpop.xlane.xlu1 %3575 }
0x205f   : > { %4968 = vrcp.f32 %v3576_v17 }
0x206c   : > { %v4969_v18 = vpop.eup %4968 }
0x206d   : > { %v3578_v19 = vmul.f32 %v4969_v18, %v4967_v13 }
0x206f   : > { %v3581_v20 = vpack.c.bf16 %v3578_v19, %v3578_v19  ;;  %4268 = vst.msk [vmem:[%s5330_s20 + $0x38] sm:$0xff] %vm811_vm3, %v3578_v19  ;;  %s4980_s20 = scalar_lea.vmem %s4979_s3, 2048 }
0x2070   : > { %p4982_p1 = scmp.lt.s32.totalorder %s4980_s20, %s4974_s23 }
0x2071   : > { %4793 = vmatmul.mubr.msk.bf16.vlgmr.msra.gmra.mxu1 %vm811_vm3, %v3581_v20 }
0x2072   : > { %4806 = vmatprep.mubr.msk.bf16.mxu1 %vm5067_vm1, %v5066_v9  ;;  %p4983_p2 = por %p4982_p1, %p4981_p0 }
0x2074   : > { %p4984_p3 = pnand %p4983_p2, %p4977_p13 }
0x2131   : > { %v3623_v21 = vpop.f32.mrf.mxu1 }
0x2132   : > { %v3629_v23 = vpack.c.bf16 %v3623_v21, %v3623_v21 }
0x2133   : > { %v4794_v24 = vpop.f32.mrf.mxu1 }
0x2134   : > { %4799 = vmatmul.mubr.msk.bf16.vlgmr.msra.gmra.mxu0 %vm811_vm3, %v3629_v23 }
0x2135   : > { %v3626_v25 = vpop.f32.mrf.mxu1  ;;  %4818 = vmatprep.mubr.msk.bf16.mxu0 %vm5067_vm1, %v5066_v9 }
0x2137   : > { %v4795_v26 = vpop.f32.mrf.mxu1 }
0x21f4   : > { %v3672_v27 = vpop.f32.mrf.mxu0 }
0x21f5   : > { %v3678_v28 = vadd.f32 %v3672_v27, %v3323_v52  ;;  %v4926_v52 = vld [vmem:[%s5998_s15 + $0x38] sm:$0xff]  }
0x21f6   : > { %v4800_v15 = vpop.f32.mrf.mxu0  ;;  %4811 = vmatpush3.bf16.msra.mxu0 %v4926_v52 }
0x21f7   : > { %v3679_v29 = vadd.f32 %v3678_v28, %v5568_v35  ;;  %v4924_v35 = vld [vmem:[%s5996_s13 + $0x18] sm:$0xff]   ;;  %4812 = vmatprep.subr.bf16.mxu0 %v5066_v9 }
0x21f8   : > { %v3675_v30 = vpop.f32.mrf.mxu0  ;;  %4803 = vmatpush3.bf16.msra.mxu1 %v4924_v35 }
0x21f9   : > { %v5860_v31 = vadd.f32 %v4273_v63, %v3679_v29  ;;  %4804 = vmatprep.subr.bf16.mxu1 %v5066_v9 }
0x21fa   : > { %v4801_v32 = vpop.f32.mrf.mxu0  ;;  %4813 = vmatpush3.bf16.msra.mxu0 %v4927_v53 }
0x21fb   : > { %v3689_v33 = vsel %vm584_vm0, %v5860_v31, 0.0  ;;  %4814 = vmatprep.subr.bf16.mxu0 %v5066_v9 }
0x21fc   : > { %3690 = vadd.xlane.f32.xlu0 %v3689_v33  ;;  %4805 = vmatpush3.bf16.msra.mxu1 %v4925_v41 }
0x21fe   : > { %4815 = vmatpush3.bf16.msra.mxu0 %v4928_v54 }
0x21ff   : > { %4816 = vmatprep.subr.bf16.mxu0 %v5066_v9 }
0x2202   : > { %4817 = vmatpush3.bf16.msra.mxu0 %v4929_v55 }
0x2285   : > { %v3691_v34 = vpop.xlane.xlu0 %3690 }
0x2286   : > { %v3692_v36 = vmul.f32 0.03125, %v3691_v34 }
0x2288   : > { %v3693_v38 = vsub.f32 %v5860_v31, %v3692_v36 }
0x228a   : > { %v3694_v39 = vmul.f32 %v3693_v38, %v3693_v38 }
0x228c   : > { %v3695_v40 = vsel %vm584_vm0, %v3694_v39, 0.0 }
0x228d   : > { %3696 = vadd.xlane.f32.xlu1 %v3695_v40 }
0x2316   : > { %v3697_v42 = vpop.xlane.xlu1 %3696 }
0x2317   : > { %v3698_v43 = vmul.f32 0.03125, %v3697_v42 }
0x2319   : > { %v3699_v44 = vadd.f32 1e-05, %v3698_v43 }
0x231b   : > { %4970 = vrsqrt.f32 %v3699_v44 }
0x2328   : > { %v4971_v45 = vpop.eup %4970 }
0x2329   : > { %v3701_v47 = vmul.f32 %v4971_v45, %v3693_v38 }
0x232b   : > { %v3710_v49 = vmul.f32 %v4275_v46, %v3701_v47 }
0x232d   : > { %v3719_v58 = vadd.f32 %v4277_v48, %v3710_v49 }
0x232f   : > { %v3720_v50 = vpack.c.bf16 %v3719_v58, %v3719_v58 }
0x2331   : > { %4807 = vmatmul.mubr.msk.bf16.vlgmr.msra.gmra.mxu1 %vm584_vm0, %v3720_v50 }
0x23f1   : > { %v3783_v57 = vpop.f32.mrf.mxu1 }
0x23f2   : > { %v3784_v59 = vadd.f32 %v4283_v56, %v3783_v57 }
0x23f3   : > { %v4808_v60 = vpop.f32.mrf.mxu1 }
0x23f4   : > { %v3790_v61 = vmul.f32 0.70710677, %v3784_v59  ;;  %v3789_v2 = vmul.f32 0.5, %v3784_v59 }
0x23f5   : > { %v3786_v62 = vpop.f32.mrf.mxu1 }
0x23f6   : > { %4972 = verf.f32 %v3790_v61 }
0x23f7   : > { %v4809_v9 = vpop.f32.mrf.mxu1 }
0x2403   : > { %v4973_v1 = vpop.eup %4972 }
0x2404   : > { %v3792_v37 = vadd.f32 1.0, %v4973_v1 }
0x2406   : > { %v3793_v51 = vmul.f32 %v3792_v37, %v3789_v2 }
0x2408   : > { %v3794_v3 = vpack.c.bf16 %v3793_v51, %v3793_v51 }
0x240a   : > { %4819 = vmatmul.mubr.msk.bf16.vlgmr.msra.gmra.mxu0 %vm2181_vm4, %v3794_v3 }
0x240b   : > { %4987 = shalt.err (!%p4984_p3)
}
0x240c   : > { %s4988_s29 = scalar_lea.hbm %s5906_s27, 1024  ;;  %s4992_s28 = scalar_lea.hbm %s6001_s18, 2048 }
0x240d   : > { %p4989_p4 = scmp.ne.s32.totalorder %s5906_s27, %s4988_s29  ;;  %p4993_p9 = scmp.lt.s32.totalorder %s5906_s27, %s6001_s18 }
0x240e   : > { %p4994_p10 = scmp.lt.s32.totalorder %s4992_s28, %s4988_s29 }
0x240f   : > { %p4990_p7 = pnand %p4989_p4, %p5205_p5 }
0x2410   : > { %p4995_p11 = por %p4994_p10, %p4993_p9 }
0x2411   : > { %p4991_p8 = pneg %p4990_p7 }
0x2413   : > { %p4996_p12 = pnand %p4995_p11, %p4991_p8 }
0x2415   : > { %4999 = shalt.err (!%p4996_p12)
}
0x2416   : > { %s5069_s3 = smov 128   ;;  %s5070_s23 = smov 8   ;;  %v4296_v4 = vld [vmem:[%s5999_s16 + $0x1] ss:$0 sm:$0xff] }
0x2417   : > { %s6034_s20 = scalar_lea.sflag [#allocation5], %s5324_s24  ;;  %s4011_s19 = sshll.u32 %s5324_s24, 3 }
0x2418   : > { %4823 = dma.vmem_to_hbm [thread:$0]  (%p5205_p5), %s5901_s26, 1024, %s5906_s27, %s6034_s20, %s5069_s3, %s5069_s3, %s5070_s23  }
0x2419   : > { %s4304_s1 = sshll.u32 %s5188_s0, 7  ;;  %s570_s29 = scalar_lea.vmem [#allocation2], %s4011_s19 }
0x241a   : > { %s3900_s28 = sshll.u32 %s570_s29, 4  ;;  %s5940_s7 = scalar_lea.hbm %s6000_s17, %s4304_s1  ;;  %s5942_s28 = int_to_ptr.vmem [resolvable:$true] %s3900_s28 }
0x241b   : > { %s3882_s0 = scalar_lea.sflag [#allocation3], %s5324_s24  ;;  %s5000_s26 = scalar_lea.vmem %s5942_s28, 128 }
0x241c   : > { %p5001_p13 = scmp.ne.s32.totalorder %s5942_s28, %s5000_s26  ;;  %s5071_s27 = smov [#allocation2]  }
0x241d   : > { %s5004_s3 = sshll.u32 %s5071_s27, 4  ;;  %s5005_s3 = int_to_ptr.vmem [resolvable:$false] %s5004_s3 }
0x241e   : > { %p5002_p0 = pnand %p5001_p13, %p5205_p5  ;;  %s5006_s5 = scalar_lea.vmem %s5005_s3, 256 }
0x241f   : > { %p5007_p2 = scmp.lt.s32.totalorder %s5942_s28, %s5005_s3  ;;  %p5008_p3 = scmp.lt.s32.totalorder %s5006_s5, %s5000_s26 }
0x2420   : > { %p5003_p1 = pneg %p5002_p0 }
0x2421   : > { %p5009_p4 = por %p5008_p3, %p5007_p2 }
0x2423   : > { %p5010_p7 = pnand %p5009_p4, %p5003_p1 }
0x24ca   : > { %v3873_v0 = vpop.f32.mrf.mxu0 }
0x24cb   : > { %v3874_v5 = vadd.f32 %v4296_v4, %v3873_v0 }
0x24cc   : > { %v4820_v6 = vpop.f32.mrf.mxu0 }
0x24cd   : > { %v3879_v7 = vadd.f32 %v3874_v5, %v5860_v31 }
0x24ce   : > { %v3876_v8 = vpop.f32.mrf.mxu0 }
0x24cf   : > { %3880 = vst.msk [vmem:[%s570_s29] sm:$0xff] %vm584_vm0, %v3879_v7 }
0x24d0   : > { %v4821_v10 = vpop.f32.mrf.mxu0 }
0x24d1   : > { %5013 = shalt.err (!%p5010_p7)
}
0x24d2   : > { %s5014_s6 = scalar_lea.hbm %s5940_s7, 128  ;;  %s5018_s20 = scalar_lea.hbm %s6000_s17, 256 }
0x24d3   : > { %p5015_p8 = scmp.ne.s32.totalorder %s5940_s7, %s5014_s6  ;;  %p5019_p11 = scmp.lt.s32.totalorder %s5940_s7, %s6000_s17 }
0x24d4   : > { %p5020_p12 = scmp.lt.s32.totalorder %s5018_s20, %s5014_s6 }
0x24d5   : > { %p5016_p9 = pnand %p5015_p8, %p5205_p5 }
0x24d6   : > { %p5021_p13 = por %p5020_p12, %p5019_p11 }
0x24d7   : > { %p5017_p10 = pneg %p5016_p9 }
0x24d9   : > { %p5022_p0 = pnand %p5021_p13, %p5017_p10 }
0x24db   : > { %5025 = shalt.err (!%p5022_p0)
}
0x24dc   : > { %4822 = dma.vmem_to_hbm [thread:$0]  (%p5205_p5), %s5942_s28, 128, %s5940_s7, %s3882_s0  }
0x24dd PF: > { %s6035_s4 = sld [smem:[#allocation8_spill]]  ;;  %p4833_p1 = scmp.ge.s32.totalorder %s5064_s30, 2 }
0x24df   : > { %p4827_p2 = pnand %p4833_p1, %p5209_p6 }
0x24e1   : > { %p4828_p3 = pneg %p4827_p2 }
0x24e3   : > { %s3928_s29 = sand.u32 1, %s6035_s4  }
0x24e4   : > { %s3929_s26 = scalar_lea.sflag [#allocation3], %s3928_s29 }
0x24e5   : > { %5043 = dma.done.wait (%p4828_p3), %s3929_s26, 128  }
0x24e6   : > { %5045 = vsyncadd (%p4828_p3), %s3929_s26, 4294967168  ;;  %s3938_s27 = scalar_lea.sflag [#allocation5], %s3928_s29 }
0x24e7   : > { %5047 = dma.done.wait (%p4828_p3), %s3938_s27, 1024  }
0x24e8   : > { %5049 = vsyncadd (%p4828_p3), %s3938_s27, 4294966272  ;;  %s6037_s30 = sld [smem:[#allocation11_spill]] }
0x24e9   : > { %s6038_s27 = sld [smem:[#allocation9_spill]] }
0x24ea   : > { %s6039_s28 = sld [smem:[#allocation10_spill]] }
0x24eb   : > { %s6040_s29 = sld [smem:[#allocation12_spill]] }
0x24ee   : > { %p32_p5 = scmp.ge.s32.totalorder %s6037_s30, 4  }
0x24f0   :  { %34 = sbr.rel (!%p32_p5) target bundleno = 14 (0xe), region = 205 }
0x24f5   :  { %3943 = vsyncpa [#allocation3], 1 }
0x24f6   :  { %3945 = vsyncpa [#allocation3 + $0x1], 1 }
0x24f7   :  { %3946 = vsyncpa [#allocation5], 1 }
0x24f8   :  { %3948 = vsyncpa [#allocation5 + $0x1], 1 }

</bundles_post_ra>
